<compile_context>
chip_gen: v7x
topology: tpu7x:2x2x1
jax: 0.10.0
libtpu: 0.0.40
codegen_flags: <defaults>
</compile_context>

<pallas_src>
from functools import partial

import jax
import jax.numpy as jnp
from jax import lax
from jax.experimental import pallas as pl
from jax.experimental.pallas import tpu as pltpu


def bottleneck_kernel(xb_ref, xt_ref, xbt_ref,
                      w1_ref, b1_ref, w2_ref, b2_ref, w3_ref, b3_ref,
                      o_ref, h1_ref, *, real_w):
    TH, Wp, Cp = xb_ref.shape          # row band (N squeezed out of the block)
    Pp = w1_ref.shape[1]
    R = TH + 2                          # band + 1-row halo on each side
    hb = pl.program_id(1)
    last_hb = pl.num_programs(1) - 1
    cdt = w1_ref.dtype                  # matmul operand dtype (bf16 or f32)

    w1 = w1_ref[...]
    b1 = b1_ref[...]

    def conv1(rows):                    # (r, Wp, Cp) f32 -> (r*Wp, Pp) cdt
        rr = rows.shape[0] * rows.shape[1]
        z = jnp.dot(rows.reshape(rr, Cp).astype(cdt), w1,
                    preferred_element_type=jnp.float32)
        return jnp.maximum(z + b1, 0.0).astype(cdt)

    # ---- conv1 (1x1) + bn1 + relu, written straight into the haloed scratch.
    h1_ref[Wp:(TH + 1) * Wp, :] = conv1(xb_ref[...])

    # Halo rows: recompute conv1 on the neighbouring row; rows outside the
    # image are zeroed (3x3 SAME zero padding applies to the post-conv1
    # activations, exactly like PyTorch pads conv2's input).
    @pl.when(hb == 0)
    def _():
        h1_ref[0:Wp, :] = jnp.zeros((Wp, Pp), cdt)

    @pl.when(hb > 0)
    def _():
        h1_ref[0:Wp, :] = conv1(xt_ref[...])

    @pl.when(hb == last_hb)
    def _():
        h1_ref[(TH + 1) * Wp:(TH + 2) * Wp, :] = jnp.zeros((Wp, Pp), cdt)

    @pl.when(hb < last_hb)
    def _():
        h1_ref[(TH + 1) * Wp:(TH + 2) * Wp, :] = conv1(xbt_ref[...])

    # ---- conv2 (3x3, SAME) + bn2 + relu.
    # W shifts via sublane rolls of the compute-dtype h1; the wrap-around
    # elements land exactly on the W-border / padded columns, which must be
    # zeroed anyway, so one column mask handles both.
    h1 = h1_ref[...]                                            # (R*Wp, Pp) cdt
    col = lax.broadcasted_iota(jnp.int32, (R * Wp, 1), 0) % Wp
    tap_m = jnp.where(col == 0, 0.0,
                      pltpu.roll(h1, shift=1, axis=0))          # tap (., w-1)
    tap_p = jnp.where(col == real_w - 1, 0.0,
                      pltpu.roll(h1, shift=R * Wp - 1, axis=0)) # tap (., w+1)

    # K-pack the three w-taps along lanes: 3 MXU matmuls with K = 3*Pp instead
    # of 9 with K = Pp (fills the 256-deep MXU on v6e/v7x).
    taps = jnp.concatenate([tap_m, h1, tap_p], axis=-1)         # (R*Wp, 3*Pp)

    acc = None
    for dh in range(3):
        lhs = taps[dh * Wp:(dh + TH) * Wp, :]                   # aligned slice
        part = jnp.dot(lhs, w2_ref[dh], preferred_element_type=jnp.float32)
        acc = part if acc is None else acc + part
    h2 = jnp.maximum(acc + b2_ref[...], 0.0)

    # ---- conv3 (1x1) + bn3, identity residual (f32), final relu.
    h3 = jnp.dot(h2.astype(cdt), w3_ref[...],
                 preferred_element_type=jnp.float32) + b3_ref[...]
    res = xb_ref[...].reshape(TH * Wp, Cp).astype(jnp.float32)
    out = jnp.maximum(h3 + res, 0.0)
    o_ref[...] = out.reshape(TH, Wp, Cp).astype(o_ref.dtype)


def _vmem_capacity_bytes():
    try:
        return int(pltpu.get_tpu_info().vmem_capacity_bytes)
    except Exception:
        return 64 * 1024 * 1024          # conservative (v7x-sized) fallback


def _vmem_estimate(TH, Wp, Cp, Pp, in_bytes, out_bytes, c_bytes):
    """Rough per-step VMEM working-set estimate (double-buffered I/O)."""
    R = TH + 2
    band_in = TH * Wp * Cp * in_bytes
    halos = 2 * Wp * Cp * in_bytes
    band_out = TH * Wp * Cp * out_bytes
    weights = (Cp * Pp + 9 * Pp * Pp + Pp * Cp) * c_bytes + 3 * Pp * 4
    h1_scr = R * Wp * Pp * c_bytes
    temps = (3 * R * Wp * Pp * c_bytes           # rolled taps
             + R * Wp * 3 * Pp * c_bytes         # lane-packed concat
             + 2 * TH * Wp * Pp * 4              # acc / h2
             + 2 * TH * Wp * Cp * 4)             # h3 / residual
    return 2 * (band_in + halos + band_out) + weights + h1_scr + temps


def _pick_tile_h(H, Wp, Cp, Pp, in_bytes, out_bytes, c_bytes, budget):
    for d in range(H, 0, -1):
        if H % d == 0 and _vmem_estimate(d, Wp, Cp, Pp, in_bytes, out_bytes,
                                         c_bytes) <= budget:
            return d
    return 1


def bottleneck(x, params, *, tile_h=None, compute_dtype=jnp.bfloat16,
               out_dtype=None):
    """x: (N, H, W, Cin) NHWC; params = (w1,s1,b1,w2,s2,b2,w3,s3,b3)."""
    w1, s1, b1, w2, s2, b2, w3, s3, b3 = params
    N, H, W, Cin = x.shape
    P = w1.shape[1]
    Cout = w3.shape[1]
    assert Cout == Cin, "identity residual requires inplanes == planes*expansion"
    out_dtype = x.dtype if out_dtype is None else out_dtype
    cdt = compute_dtype

    LANE, SUB = 128, 8
    Cp = -(-Cin // LANE) * LANE
    Pp = -(-P // LANE) * LANE
    Wp = -(-W // SUB) * SUB

    # Fold eval-mode BN scale into the conv weights; pad channels to lane
    # multiples (a no-op for real ResNet widths); K-pack w2 per kernel row.
    w1f = jnp.pad((w1 * s1[None, :]).astype(cdt), ((0, Cp - Cin), (0, Pp - P)))
    w2f = jnp.pad((w2 * s2[None, None, None, :]).astype(cdt),
                  ((0, 0), (0, 0), (0, Pp - P), (0, Pp - P)))
    w2f = w2f.reshape(3, 3 * Pp, Pp)
    w3f = jnp.pad((w3 * s3[None, :]).astype(cdt), ((0, Pp - P), (0, Cp - Cout)))
    b1f = jnp.pad(b1.astype(jnp.float32)[None, :], ((0, 0), (0, Pp - P)))
    b2f = jnp.pad(b2.astype(jnp.float32)[None, :], ((0, 0), (0, Pp - P)))
    b3f = jnp.pad(b3.astype(jnp.float32)[None, :], ((0, 0), (0, Cp - Cout)))

    # Activations stay in their original dtype (exact residual add; the cast
    # to the compute dtype happens per-band inside the kernel).
    if Cp == Cin and Wp == W:
        xp = x
    else:
        xp = jnp.pad(x, ((0, 0), (0, 0), (0, Wp - W), (0, Cp - Cin)))

    in_bytes = xp.dtype.itemsize
    out_bytes = jnp.dtype(out_dtype).itemsize
    c_bytes = jnp.dtype(cdt).itemsize

    # Per-generation VMEM budget (v7x: 64 MiB physical -> ~48 MiB; v5e/v6e:
    # raise toward 96 MiB), and the largest row band that fits it.
    vmem_cap = _vmem_capacity_bytes()
    vmem_limit = max(32 * 1024 * 1024,
                     min((vmem_cap * 3) // 4, 96 * 1024 * 1024))
    if tile_h is None:
        TH = _pick_tile_h(H, Wp, Cp, Pp, in_bytes, out_bytes, c_bytes,
                          budget=int(vmem_limit * 0.85))
    else:
        TH = min(tile_h, H)
        assert H % TH == 0, "H must be divisible by the row-band size"
    HB = H // TH

    def band_map(n, hb):
        return (n, hb, 0, 0)

    def top_map(n, hb):                        # row above the band, clamped
        return (n, jnp.maximum(hb * TH - 1, 0), 0, 0)

    def bot_map(n, hb):                        # row below the band, clamped
        return (n, jnp.minimum(hb * TH + TH, H - 1), 0, 0)

    flops = 2 * N * H * W * (Cin * P + 9 * P * P + P * Cout)
    bytes_accessed = (xp.size * in_bytes + N * H * Wp * Cp * out_bytes
                      + (w1f.size + w2f.size + w3f.size) * c_bytes)
    cost = pl.CostEstimate(flops=flops, transcendentals=0,
                           bytes_accessed=bytes_accessed)

    kernel = partial(bottleneck_kernel, real_w=W)

    def run(weight_mode):
        def const_spec(a):                     # whole (small) array in VMEM
            nd = a.ndim
            return pl.BlockSpec(a.shape, lambda n, hb, _nd=nd: (0,) * _nd,
                                pipeline_mode=weight_mode)

        grid_spec = pltpu.PrefetchScalarGridSpec(
            num_scalar_prefetch=0,
            grid=(N, HB),
            in_specs=[
                pl.BlockSpec((None, TH, Wp, Cp), band_map),   # band
                pl.BlockSpec((None, 1, Wp, Cp), top_map),     # top halo row
                pl.BlockSpec((None, 1, Wp, Cp), bot_map),     # bottom halo row
                const_spec(w1f), const_spec(b1f),
                const_spec(w2f), const_spec(b2f),
                const_spec(w3f), const_spec(b3f),
            ],
            out_specs=pl.BlockSpec((None, TH, Wp, Cp), band_map),
            scratch_shapes=[pltpu.VMEM(((TH + 2) * Wp, Pp), cdt)],
        )
        return pl.pallas_call(
            kernel,
            out_shape=jax.ShapeDtypeStruct((N, H, Wp, Cp), out_dtype),
            grid_spec=grid_spec,
            compiler_params=pltpu.CompilerParams(
                dimension_semantics=("parallel", "parallel"),
                vmem_limit_bytes=int(vmem_limit)),
            cost_estimate=cost,
        )(xp, xp, xp, w1f, b1f, w2f, b2f, w3f, b3f)

    try:
        # Single-buffer the constant weights/biases (their block index never
        # changes), freeing VMEM for larger bands.
        out_p = run(pl.Buffered(1))
    except Exception:
        out_p = run(None)                      # fall back to default buffering

    if Wp == W and Cp == Cout:
        return out_p
    return out_p[:, :, :W, :Cout]


def bottleneck_ref(x, params):
    """Pure-JAX f32 reference (lax convs), eval-mode BN as scale/bias."""
    w1, s1, b1, w2, s2, b2, w3, s3, b3 = params
    Cin = x.shape[-1]
    P = w1.shape[1]
    Cout = w3.shape[1]
    dn = ('NHWC', 'HWIO', 'NHWC')
    prec = lax.Precision.HIGHEST
    h = lax.conv_general_dilated(
        x, w1.reshape(1, 1, Cin, P), (1, 1), 'VALID',
        dimension_numbers=lax.conv_dimension_numbers(x.shape, (1, 1, Cin, P), dn),
        precision=prec)
    h = jnp.maximum(h * s1 + b1, 0.0)
    h = lax.conv_general_dilated(
        h, w2, (1, 1), 'SAME',
        dimension_numbers=lax.conv_dimension_numbers(h.shape, w2.shape, dn),
        precision=prec)
    h = jnp.maximum(h * s2 + b2, 0.0)
    h = lax.conv_general_dilated(
        h, w3.reshape(1, 1, P, Cout), (1, 1), 'VALID',
        dimension_numbers=lax.conv_dimension_numbers(h.shape, (1, 1, P, Cout), dn),
        precision=prec)
    h = h * s3 + b3
    return jnp.maximum(h + x, 0.0)


if __name__ == "__main__":
    key = jax.random.PRNGKey(0)
    N, H, W = 2, 16, 16
    planes = 4
    inplanes = planes * 4      # identity residual valid (downsample=None)
    eps = 1e-5
    ks = jax.random.split(key, 16)

    def bn_fold(kg, kb, km, kv, c):
        gamma = 1.0 + 0.1 * jax.random.normal(kg, (c,), jnp.float32)
        beta = 0.1 * jax.random.normal(kb, (c,), jnp.float32)
        mean = 0.1 * jax.random.normal(km, (c,), jnp.float32)
        var = jax.random.uniform(kv, (c,), jnp.float32, 0.5, 1.5)
        scale = gamma / jnp.sqrt(var + eps)
        bias = beta - mean * scale
        return scale, bias

    # conv1: 1x1 (inplanes -> planes)
    w1 = 0.2 * jax.random.normal(ks[0], (inplanes, planes), jnp.float32)
    s1, b1 = bn_fold(ks[1], ks[2], ks[3], ks[4], planes)
    # conv2: 3x3 (planes -> planes), stride=1, padding=1, HWIO
    w2 = 0.2 * jax.random.normal(ks[5], (3, 3, planes, planes), jnp.float32)
    s2, b2 = bn_fold(ks[6], ks[7], ks[8], ks[9], planes)
    # conv3: 1x1 (planes -> planes*4)
    w3 = 0.2 * jax.random.normal(ks[10], (planes, planes * 4), jnp.float32)
    s3, b3 = bn_fold(ks[11], ks[12], ks[13], ks[14], planes * 4)

    x = jax.random.normal(ks[15], (N, H, W, inplanes), jnp.float32)
    params = (w1, s1, b1, w2, s2, b2, w3, s3, b3)

    ref = bottleneck_ref(x, params)

    # f32 operands + explicit small row bands: exercises the halo paths and
    # gives a tight correctness check of the fused/tiled kernel math.
    out_f32 = jax.block_until_ready(
        bottleneck(x, params, tile_h=4, compute_dtype=jnp.float32))
    assert out_f32.shape == (N, H, W, inplanes)
    err32 = float(jnp.max(jnp.abs(out_f32 - ref)))
    assert jnp.allclose(out_f32, ref, rtol=1e-3, atol=1e-3), f"f32 max_err={err32}"

    # Default config: bf16 MXU operands, auto (VMEM-derived) row-band size.
    out_b16 = jax.block_until_ready(bottleneck(x, params))
    err16 = float(jnp.max(jnp.abs(out_b16 - ref)))
    assert jnp.allclose(out_b16, ref, rtol=5e-2, atol=1.5e-1), f"bf16 max_err={err16}"

    print("KERNEL_OK")
</pallas_src>

<mosaic_0001>
module attributes {stable_mosaic.version = 11 : i64} {
  func.func @bottleneck_kernel(%arg0: i32, %arg1: i32, %arg2: memref<1x4x16x128xf32, #tpu.memory_space<vmem>>, %arg3: memref<1x1x16x128xf32, #tpu.memory_space<vmem>>, %arg4: memref<1x1x16x128xf32, #tpu.memory_space<vmem>>, %arg5: memref<128x128xf32, #tpu.memory_space<vmem>>, %arg6: memref<1x128xf32, #tpu.memory_space<vmem>>, %arg7: memref<3x384x128xf32, #tpu.memory_space<vmem>>, %arg8: memref<1x128xf32, #tpu.memory_space<vmem>>, %arg9: memref<128x128xf32, #tpu.memory_space<vmem>>, %arg10: memref<1x128xf32, #tpu.memory_space<vmem>>, %arg11: memref<1x4x16x128xf32, #tpu.memory_space<vmem>>, %arg12: memref<96x128xf32, #tpu.memory_space<vmem>>) attributes {dimension_semantics = [#tpu.dimension_semantics<parallel>, #tpu.dimension_semantics<parallel>], iteration_bounds = array<i64: 2, 4>, scalar_prefetch = 0 : i64, scratch_operands = 1 : i64, tpu.core_type = #tpu.core_type<tc>, window_params = [{transform_indices = @transform_0, window_bounds = array<i64: 1, 4, 16, 128>}, {transform_indices = @transform_1, window_bounds = array<i64: 1, 1, 16, 128>}, {transform_indices = @transform_2, window_bounds = array<i64: 1, 1, 16, 128>}, {pipeline_mode = #tpu.pipeline_mode<synchronous>, transform_indices = @transform_3, window_bounds = array<i64: 128, 128>}, {pipeline_mode = #tpu.pipeline_mode<synchronous>, transform_indices = @transform_4, window_bounds = array<i64: 1, 128>}, {pipeline_mode = #tpu.pipeline_mode<synchronous>, transform_indices = @transform_5, window_bounds = array<i64: 3, 384, 128>}, {pipeline_mode = #tpu.pipeline_mode<synchronous>, transform_indices = @transform_6, window_bounds = array<i64: 1, 128>}, {pipeline_mode = #tpu.pipeline_mode<synchronous>, transform_indices = @transform_7, window_bounds = array<i64: 128, 128>}, {pipeline_mode = #tpu.pipeline_mode<synchronous>, transform_indices = @transform_8, window_bounds = array<i64: 1, 128>}, {transform_indices = @transform_9, window_bounds = array<i64: 1, 4, 16, 128>}]} {
    %c0 = arith.constant 0 : index
    %c0_0 = arith.constant 0 : index
    %0 = vector.load %arg5[%c0, %c0_0] : memref<128x128xf32, #tpu.memory_space<vmem>>, vector<128x128xf32>
    %c0_1 = arith.constant 0 : index
    %c0_2 = arith.constant 0 : index
    %1 = vector.load %arg6[%c0_1, %c0_2] : memref<1x128xf32, #tpu.memory_space<vmem>>, vector<1x128xf32>
    %c0_3 = arith.constant 0 : index
    %c0_4 = arith.constant 0 : index
    %c0_5 = arith.constant 0 : index
    %c0_6 = arith.constant 0 : index
    %2 = vector.load %arg2[%c0_3, %c0_4, %c0_5, %c0_6] : memref<1x4x16x128xf32, #tpu.memory_space<vmem>>, vector<1x4x16x128xf32>
    %3 = vector.shape_cast %2 : vector<1x4x16x128xf32> to vector<4x16x128xf32>
    %4 = vector.shape_cast %3 : vector<4x16x128xf32> to vector<64x128xf32>
    %cst = arith.constant dense<0.000000e+00> : vector<64x128xf32>
    %5 = tpu.matmul %4, %0, %cst {dimension_numbers = #tpu.dot_dimension_numbers<[1], [0], [0], [1], [0, 0, 1, 1], [], []>} : vector<64x128xf32>, vector<128x128xf32>, vector<64x128xf32> -> vector<64x128xf32>
    %6 = vector.broadcast %1 : vector<1x128xf32> to vector<64x128xf32>
    %7 = arith.addf %5, %6 : vector<64x128xf32>
    %cst_7 = arith.constant 0.000000e+00 : f32
    %8 = vector.broadcast %cst_7 : f32 to vector<64x128xf32>
    %9 = arith.maximumf %7, %8 : vector<64x128xf32>
    %c16 = arith.constant 16 : index
    %c0_8 = arith.constant 0 : index
    %10 = vector.load %arg12[%c16, %c0_8] : memref<96x128xf32, #tpu.memory_space<vmem>>, vector<64x128xf32>
    tpu.vector_store %arg12[%c16, %c0_8], %9 {strides = array<i32>} : memref<96x128xf32, #tpu.memory_space<vmem>>, vector<64x128xf32>,
    %c0_i32 = arith.constant 0 : i32
    %11 = arith.cmpi eq, %arg1, %c0_i32 : i32
    %12 = arith.extui %11 : i1 to i32
    %c0_i32_9 = arith.constant 0 : i32
    %13 = arith.cmpi ne, %12, %c0_i32_9 : i32
    scf.if %13 {
      %cst_52 = arith.constant 0.000000e+00 : f32
      %90 = vector.broadcast %cst_52 : f32 to vector<16x128xf32>
      %c0_53 = arith.constant 0 : index
      %c0_54 = arith.constant 0 : index
      %91 = vector.load %arg12[%c0_53, %c0_54] : memref<96x128xf32, #tpu.memory_space<vmem>>, vector<16x128xf32>
      tpu.vector_store %arg12[%c0_53, %c0_54], %90 {strides = array<i32>} : memref<96x128xf32, #tpu.memory_space<vmem>>, vector<16x128xf32>,
    } else {
    }
    %c0_i32_10 = arith.constant 0 : i32
    %14 = arith.cmpi sgt, %arg1, %c0_i32_10 : i32
    %15 = arith.extui %14 : i1 to i32
    %c0_i32_11 = arith.constant 0 : i32
    %16 = arith.cmpi ne, %15, %c0_i32_11 : i32
    scf.if %16 {
      %c0_52 = arith.constant 0 : index
      %c0_53 = arith.constant 0 : index
      %c0_54 = arith.constant 0 : index
      %c0_55 = arith.constant 0 : index
      %90 = vector.load %arg3[%c0_52, %c0_53, %c0_54, %c0_55] : memref<1x1x16x128xf32, #tpu.memory_space<vmem>>, vector<1x1x16x128xf32>
      %91 = vector.shape_cast %90 : vector<1x1x16x128xf32> to vector<1x16x128xf32>
      %92 = vector.shape_cast %91 : vector<1x16x128xf32> to vector<16x128xf32>
      %cst_56 = arith.constant dense<0.000000e+00> : vector<16x128xf32>
      %93 = tpu.matmul %92, %0, %cst_56 {dimension_numbers = #tpu.dot_dimension_numbers<[1], [0], [0], [1], [0, 0, 1, 1], [], []>} : vector<16x128xf32>, vector<128x128xf32>, vector<16x128xf32> -> vector<16x128xf32>
      %94 = vector.broadcast %1 : vector<1x128xf32> to vector<16x128xf32>
      %95 = arith.addf %93, %94 : vector<16x128xf32>
      %cst_57 = arith.constant 0.000000e+00 : f32
      %96 = vector.broadcast %cst_57 : f32 to vector<16x128xf32>
      %97 = arith.maximumf %95, %96 : vector<16x128xf32>
      %c0_58 = arith.constant 0 : index
      %c0_59 = arith.constant 0 : index
      %98 = vector.load %arg12[%c0_58, %c0_59] : memref<96x128xf32, #tpu.memory_space<vmem>>, vector<16x128xf32>
      tpu.vector_store %arg12[%c0_58, %c0_59], %97 {strides = array<i32>} : memref<96x128xf32, #tpu.memory_space<vmem>>, vector<16x128xf32>,
    } else {
    }
    %c3_i32 = arith.constant 3 : i32
    %17 = arith.cmpi eq, %arg1, %c3_i32 : i32
    %18 = arith.extui %17 : i1 to i32
    %c0_i32_12 = arith.constant 0 : i32
    %19 = arith.cmpi ne, %18, %c0_i32_12 : i32
    scf.if %19 {
      %cst_52 = arith.constant 0.000000e+00 : f32
      %90 = vector.broadcast %cst_52 : f32 to vector<16x128xf32>
      %c80 = arith.constant 80 : index
      %c0_53 = arith.constant 0 : index
      %91 = vector.load %arg12[%c80, %c0_53] : memref<96x128xf32, #tpu.memory_space<vmem>>, vector<16x128xf32>
      tpu.vector_store %arg12[%c80, %c0_53], %90 {strides = array<i32>} : memref<96x128xf32, #tpu.memory_space<vmem>>, vector<16x128xf32>,
    } else {
    }
    %c3_i32_13 = arith.constant 3 : i32
    %20 = arith.cmpi slt, %arg1, %c3_i32_13 : i32
    %21 = arith.extui %20 : i1 to i32
    %c0_i32_14 = arith.constant 0 : i32
    %22 = arith.cmpi ne, %21, %c0_i32_14 : i32
    scf.if %22 {
      %c0_52 = arith.constant 0 : index
      %c0_53 = arith.constant 0 : index
      %c0_54 = arith.constant 0 : index
      %c0_55 = arith.constant 0 : index
      %90 = vector.load %arg4[%c0_52, %c0_53, %c0_54, %c0_55] : memref<1x1x16x128xf32, #tpu.memory_space<vmem>>, vector<1x1x16x128xf32>
      %91 = vector.shape_cast %90 : vector<1x1x16x128xf32> to vector<1x16x128xf32>
      %92 = vector.shape_cast %91 : vector<1x16x128xf32> to vector<16x128xf32>
      %cst_56 = arith.constant dense<0.000000e+00> : vector<16x128xf32>
      %93 = tpu.matmul %92, %0, %cst_56 {dimension_numbers = #tpu.dot_dimension_numbers<[1], [0], [0], [1], [0, 0, 1, 1], [], []>} : vector<16x128xf32>, vector<128x128xf32>, vector<16x128xf32> -> vector<16x128xf32>
      %94 = vector.broadcast %1 : vector<1x128xf32> to vector<16x128xf32>
      %95 = arith.addf %93, %94 : vector<16x128xf32>
      %cst_57 = arith.constant 0.000000e+00 : f32
      %96 = vector.broadcast %cst_57 : f32 to vector<16x128xf32>
      %97 = arith.maximumf %95, %96 : vector<16x128xf32>
      %c80 = arith.constant 80 : index
      %c0_58 = arith.constant 0 : index
      %98 = vector.load %arg12[%c80, %c0_58] : memref<96x128xf32, #tpu.memory_space<vmem>>, vector<16x128xf32>
      tpu.vector_store %arg12[%c80, %c0_58], %97 {strides = array<i32>} : memref<96x128xf32, #tpu.memory_space<vmem>>, vector<16x128xf32>,
    } else {
    }
    %c0_15 = arith.constant 0 : index
    %c0_16 = arith.constant 0 : index
    %23 = vector.load %arg12[%c0_15, %c0_16] : memref<96x128xf32, #tpu.memory_space<vmem>>, vector<96x128xf32>
    %24 = tpu.iota {dimensions = array<i32: 0>} : vector<96x1xi32>
    %c16_i32 = arith.constant 16 : i32
    %c0_i32_17 = arith.constant 0 : i32
    %25 = arith.cmpi eq, %c16_i32, %c0_i32_17 : i32
    %c1_i32 = arith.constant 1 : i32
    %26 = arith.select %25, %c1_i32, %c16_i32 : i32
    %27 = vector.broadcast %26 : i32 to vector<96x1xi32>
    %28 = arith.remsi %24, %27 : vector<96x1xi32>
    %c0_i32_18 = arith.constant 0 : i32
    %29 = vector.broadcast %c0_i32_18 : i32 to vector<96x1xi32>
    %30 = arith.cmpi ne, %28, %29 : vector<96x1xi32>
    %c0_i32_19 = arith.constant 0 : i32
    %31 = vector.broadcast %c0_i32_19 : i32 to vector<96x1xi32>
    %32 = arith.cmpi slt, %28, %31 : vector<96x1xi32>
    %c0_i32_20 = arith.constant 0 : i32
    %33 = arith.cmpi slt, %26, %c0_i32_20 : i32
    %34 = vector.broadcast %33 : i1 to vector<96x1xi1>
    %35 = vector.broadcast %34 : vector<96x1xi1> to vector<96x1xi1>
    %36 = arith.xori %32, %35 : vector<96x1xi1>
    %37 = arith.andi %36, %30 : vector<96x1xi1>
    %38 = vector.broadcast %26 : i32 to vector<96x1xi32>
    %39 = arith.addi %28, %38 : vector<96x1xi32>
    %40 = arith.select %37, %39, %28 : vector<96x1xi1>, vector<96x1xi32>
    %c0_i32_21 = arith.constant 0 : i32
    %41 = vector.broadcast %c0_i32_21 : i32 to vector<96x1xi32>
    %42 = arith.cmpi eq, %40, %41 : vector<96x1xi32>
    %c1_i32_22 = arith.constant 1 : i32
    %43 = tpu.dynamic_rotate %23 by %c1_i32_22 dim 0 : vector<96x128xf32>, i32 -> vector<96x128xf32>
    %cst_23 = arith.constant 0.000000e+00 : f32
    %44 = vector.shape_cast %42 : vector<96x1xi1> to vector<96x1xi1>
    %45 = vector.broadcast %44 : vector<96x1xi1> to vector<96x128xi1>
    %46 = vector.broadcast %cst_23 : f32 to vector<96x128xf32>
    %47 = arith.select %45, %46, %43 : vector<96x128xi1>, vector<96x128xf32>
    %c15_i32 = arith.constant 15 : i32
    %48 = vector.broadcast %c15_i32 : i32 to vector<96x1xi32>
    %49 = arith.cmpi eq, %40, %48 : vector<96x1xi32>
    %c95_i32 = arith.constant 95 : i32
    %50 = tpu.dynamic_rotate %23 by %c95_i32 dim 0 : vector<96x128xf32>, i32 -> vector<96x128xf32>
    %cst_24 = arith.constant 0.000000e+00 : f32
    %51 = vector.shape_cast %49 : vector<96x1xi1> to vector<96x1xi1>
    %52 = vector.broadcast %51 : vector<96x1xi1> to vector<96x128xi1>
    %53 = vector.broadcast %cst_24 : f32 to vector<96x128xf32>
    %54 = arith.select %52, %53, %50 : vector<96x128xi1>, vector<96x128xf32>
    %55 = tpu.concatenate %47, %23, %54 in 1 : vector<96x128xf32>, vector<96x128xf32>, vector<96x128xf32> -> vector<96x384xf32>
    %56 = vector.extract_strided_slice %55 {offsets = [0, 0], sizes = [64, 384], strides = [1, 1]} : vector<96x384xf32> to vector<64x384xf32>
    %c0_25 = arith.constant 0 : index
    %c0_26 = arith.constant 0 : index
    %c0_27 = arith.constant 0 : index
    %57 = vector.load %arg7[%c0_25, %c0_26, %c0_27] : memref<3x384x128xf32, #tpu.memory_space<vmem>>, vector<1x384x128xf32>
    %58 = vector.shape_cast %57 : vector<1x384x128xf32> to vector<384x128xf32>
    %cst_28 = arith.constant dense<0.000000e+00> : vector<64x128xf32>
    %59 = tpu.matmul %56, %58, %cst_28 {dimension_numbers = #tpu.dot_dimension_numbers<[1], [0], [0], [1], [0, 0, 1, 1], [], []>} : vector<64x384xf32>, vector<384x128xf32>, vector<64x128xf32> -> vector<64x128xf32>
    %60 = vector.extract_strided_slice %55 {offsets = [16, 0], sizes = [64, 384], strides = [1, 1]} : vector<96x384xf32> to vector<64x384xf32>
    %c1 = arith.constant 1 : index
    %c0_29 = arith.constant 0 : index
    %c0_30 = arith.constant 0 : index
    %61 = vector.load %arg7[%c1, %c0_29, %c0_30] : memref<3x384x128xf32, #tpu.memory_space<vmem>>, vector<1x384x128xf32>
    %62 = vector.shape_cast %61 : vector<1x384x128xf32> to vector<384x128xf32>
    %cst_31 = arith.constant dense<0.000000e+00> : vector<64x128xf32>
    %63 = tpu.matmul %60, %62, %cst_31 {dimension_numbers = #tpu.dot_dimension_numbers<[1], [0], [0], [1], [0, 0, 1, 1], [], []>} : vector<64x384xf32>, vector<384x128xf32>, vector<64x128xf32> -> vector<64x128xf32>
    %64 = arith.addf %59, %63 : vector<64x128xf32>
    %65 = vector.extract_strided_slice %55 {offsets = [32, 0], sizes = [64, 384], strides = [1, 1]} : vector<96x384xf32> to vector<64x384xf32>
    %c2 = arith.constant 2 : index
    %c0_32 = arith.constant 0 : index
    %c0_33 = arith.constant 0 : index
    %66 = vector.load %arg7[%c2, %c0_32, %c0_33] : memref<3x384x128xf32, #tpu.memory_space<vmem>>, vector<1x384x128xf32>
    %67 = vector.shape_cast %66 : vector<1x384x128xf32> to vector<384x128xf32>
    %cst_34 = arith.constant dense<0.000000e+00> : vector<64x128xf32>
    %68 = tpu.matmul %65, %67, %cst_34 {dimension_numbers = #tpu.dot_dimension_numbers<[1], [0], [0], [1], [0, 0, 1, 1], [], []>} : vector<64x384xf32>, vector<384x128xf32>, vector<64x128xf32> -> vector<64x128xf32>
    %69 = arith.addf %64, %68 : vector<64x128xf32>
    %c0_35 = arith.constant 0 : index
    %c0_36 = arith.constant 0 : index
    %70 = vector.load %arg8[%c0_35, %c0_36] : memref<1x128xf32, #tpu.memory_space<vmem>>, vector<1x128xf32>
    %71 = vector.broadcast %70 : vector<1x128xf32> to vector<64x128xf32>
    %72 = arith.addf %69, %71 : vector<64x128xf32>
    %cst_37 = arith.constant 0.000000e+00 : f32
    %73 = vector.broadcast %cst_37 : f32 to vector<64x128xf32>
    %74 = arith.maximumf %72, %73 : vector<64x128xf32>
    %c0_38 = arith.constant 0 : index
    %c0_39 = arith.constant 0 : index
    %75 = vector.load %arg9[%c0_38, %c0_39] : memref<128x128xf32, #tpu.memory_space<vmem>>, vector<128x128xf32>
    %cst_40 = arith.constant dense<0.000000e+00> : vector<64x128xf32>
    %76 = tpu.matmul %74, %75, %cst_40 {dimension_numbers = #tpu.dot_dimension_numbers<[1], [0], [0], [1], [0, 0, 1, 1], [], []>} : vector<64x128xf32>, vector<128x128xf32>, vector<64x128xf32> -> vector<64x128xf32>
    %c0_41 = arith.constant 0 : index
    %c0_42 = arith.constant 0 : index
    %77 = vector.load %arg10[%c0_41, %c0_42] : memref<1x128xf32, #tpu.memory_space<vmem>>, vector<1x128xf32>
    %78 = vector.broadcast %77 : vector<1x128xf32> to vector<64x128xf32>
    %79 = arith.addf %76, %78 : vector<64x128xf32>
    %c0_43 = arith.constant 0 : index
    %c0_44 = arith.constant 0 : index
    %c0_45 = arith.constant 0 : index
    %c0_46 = arith.constant 0 : index
    %80 = vector.load %arg2[%c0_43, %c0_44, %c0_45, %c0_46] : memref<1x4x16x128xf32, #tpu.memory_space<vmem>>, vector<1x4x16x128xf32>
    %81 = vector.shape_cast %80 : vector<1x4x16x128xf32> to vector<4x16x128xf32>
    %82 = vector.shape_cast %81 : vector<4x16x128xf32> to vector<64x128xf32>
    %83 = arith.addf %79, %82 : vector<64x128xf32>
    %cst_47 = arith.constant 0.000000e+00 : f32
    %84 = vector.broadcast %cst_47 : f32 to vector<64x128xf32>
    %85 = arith.maximumf %83, %84 : vector<64x128xf32>
    %86 = vector.shape_cast %85 : vector<64x128xf32> to vector<4x16x128xf32>
    %c0_48 = arith.constant 0 : index
    %c0_49 = arith.constant 0 : index
    %c0_50 = arith.constant 0 : index
    %c0_51 = arith.constant 0 : index
    %87 = vector.load %arg11[%c0_48, %c0_49, %c0_50, %c0_51] : memref<1x4x16x128xf32, #tpu.memory_space<vmem>>, vector<1x4x16x128xf32>
    %88 = vector.shape_cast %87 : vector<1x4x16x128xf32> to vector<4x16x128xf32>
    %89 = vector.shape_cast %86 : vector<4x16x128xf32> to vector<1x4x16x128xf32>
    tpu.vector_store %arg11[%c0_48, %c0_49, %c0_50, %c0_51], %89 {strides = array<i32>} : memref<1x4x16x128xf32, #tpu.memory_space<vmem>>, vector<1x4x16x128xf32>,
    return
  }
  func.func @transform_0(%arg0: i32, %arg1: i32) -> (i32, i32, i32, i32) {
    %c0_i32 = arith.constant 0 : i32
    %c0_i32_0 = arith.constant 0 : i32
    %c0_i32_1 = arith.constant 0 : i32
    return %arg0, %arg1, %c0_i32, %c0_i32_0 : i32, i32, i32, i32
  }
  func.func @transform_1(%arg0: i32, %arg1: i32) -> (i32, i32, i32, i32) {
    %c4_i32 = arith.constant 4 : i32
    %0 = arith.muli %arg1, %c4_i32 : i32
    %c1_i32 = arith.constant 1 : i32
    %1 = arith.subi %0, %c1_i32 : i32
    %c0_i32 = arith.constant 0 : i32
    %2 = arith.maxsi %1, %c0_i32 : i32
    %c0_i32_0 = arith.constant 0 : i32
    %c0_i32_1 = arith.constant 0 : i32
    %c0_i32_2 = arith.constant 0 : i32
    return %arg0, %2, %c0_i32_0, %c0_i32_1 : i32, i32, i32, i32
  }
  func.func @transform_2(%arg0: i32, %arg1: i32) -> (i32, i32, i32, i32) {
    %c4_i32 = arith.constant 4 : i32
    %0 = arith.muli %arg1, %c4_i32 : i32
    %c4_i32_0 = arith.constant 4 : i32
    %1 = arith.addi %0, %c4_i32_0 : i32
    %c15_i32 = arith.constant 15 : i32
    %2 = arith.minsi %1, %c15_i32 : i32
    %c0_i32 = arith.constant 0 : i32
    %c0_i32_1 = arith.constant 0 : i32
    %c0_i32_2 = arith.constant 0 : i32
    return %arg0, %2, %c0_i32, %c0_i32_1 : i32, i32, i32, i32
  }
  func.func @transform_3(%arg0: i32, %arg1: i32) -> (i32, i32) {
    %c0_i32 = arith.constant 0 : i32
    %c0_i32_0 = arith.constant 0 : i32
    %c0_i32_1 = arith.constant 0 : i32
    return %c0_i32, %c0_i32_0 : i32, i32
  }
  func.func @transform_4(%arg0: i32, %arg1: i32) -> (i32, i32) {
    %c0_i32 = arith.constant 0 : i32
    %c0_i32_0 = arith.constant 0 : i32
    %c0_i32_1 = arith.constant 0 : i32
    return %c0_i32, %c0_i32_0 : i32, i32
  }
  func.func @transform_5(%arg0: i32, %arg1: i32) -> (i32, i32, i32) {
    %c0_i32 = arith.constant 0 : i32
    %c0_i32_0 = arith.constant 0 : i32
    %c0_i32_1 = arith.constant 0 : i32
    %c0_i32_2 = arith.constant 0 : i32
    return %c0_i32, %c0_i32_0, %c0_i32_1 : i32, i32, i32
  }
  func.func @transform_6(%arg0: i32, %arg1: i32) -> (i32, i32) {
    %c0_i32 = arith.constant 0 : i32
    %c0_i32_0 = arith.constant 0 : i32
    %c0_i32_1 = arith.constant 0 : i32
    return %c0_i32, %c0_i32_0 : i32, i32
  }
  func.func @transform_7(%arg0: i32, %arg1: i32) -> (i32, i32) {
    %c0_i32 = arith.constant 0 : i32
    %c0_i32_0 = arith.constant 0 : i32
    %c0_i32_1 = arith.constant 0 : i32
    return %c0_i32, %c0_i32_0 : i32, i32
  }
  func.func @transform_8(%arg0: i32, %arg1: i32) -> (i32, i32) {
    %c0_i32 = arith.constant 0 : i32
    %c0_i32_0 = arith.constant 0 : i32
    %c0_i32_1 = arith.constant 0 : i32
    return %c0_i32, %c0_i32_0 : i32, i32
  }
  func.func @transform_9(%arg0: i32, %arg1: i32) -> (i32, i32, i32, i32) {
    %c0_i32 = arith.constant 0 : i32
    %c0_i32_0 = arith.constant 0 : i32
    %c0_i32_1 = arith.constant 0 : i32
    return %arg0, %arg1, %c0_i32, %c0_i32_0 : i32, i32, i32, i32
  }
}

module attributes {stable_mosaic.version = 11 : i64} {
  func.func @bottleneck_kernel(%arg0: i32, %arg1: i32, %arg2: memref<1x4x16x128xf32, #tpu.memory_space<vmem>>, %arg3: memref<1x1x16x128xf32, #tpu.memory_space<vmem>>, %arg4: memref<1x1x16x128xf32, #tpu.memory_space<vmem>>, %arg5: memref<128x128xf32, #tpu.memory_space<vmem>>, %arg6: memref<1x128xf32, #tpu.memory_space<vmem>>, %arg7: memref<3x384x128xf32, #tpu.memory_space<vmem>>, %arg8: memref<1x128xf32, #tpu.memory_space<vmem>>, %arg9: memref<128x128xf32, #tpu.memory_space<vmem>>, %arg10: memref<1x128xf32, #tpu.memory_space<vmem>>, %arg11: memref<1x4x16x128xf32, #tpu.memory_space<vmem>>, %arg12: memref<96x128xf32, #tpu.memory_space<vmem>>) attributes {dimension_semantics = [#tpu.dimension_semantics<parallel>, #tpu.dimension_semantics<parallel>], iteration_bounds = array<i64: 2, 4>, scalar_prefetch = 0 : i64, scratch_operands = 1 : i64, tpu.core_type = #tpu.core_type<tc>, window_params = [{transform_indices = @transform_0, window_bounds = array<i64: 1, 4, 16, 128>}, {transform_indices = @transform_1, window_bounds = array<i64: 1, 1, 16, 128>}, {transform_indices = @transform_2, window_bounds = array<i64: 1, 1, 16, 128>}, {pipeline_mode = #tpu.pipeline_mode<synchronous>, transform_indices = @transform_3, window_bounds = array<i64: 128, 128>}, {pipeline_mode = #tpu.pipeline_mode<synchronous>, transform_indices = @transform_4, window_bounds = array<i64: 1, 128>}, {pipeline_mode = #tpu.pipeline_mode<synchronous>, transform_indices = @transform_5, window_bounds = array<i64: 3, 384, 128>}, {pipeline_mode = #tpu.pipeline_mode<synchronous>, transform_indices = @transform_6, window_bounds = array<i64: 1, 128>}, {pipeline_mode = #tpu.pipeline_mode<synchronous>, transform_indices = @transform_7, window_bounds = array<i64: 128, 128>}, {pipeline_mode = #tpu.pipeline_mode<synchronous>, transform_indices = @transform_8, window_bounds = array<i64: 1, 128>}, {transform_indices = @transform_9, window_bounds = array<i64: 1, 4, 16, 128>}]} {
    %c0 = arith.constant 0 : index
    %c0_0 = arith.constant 0 : index
    %0 = vector.load %arg5[%c0, %c0_0] : memref<128x128xf32, #tpu.memory_space<vmem>>, vector<128x128xf32>
    %c0_1 = arith.constant 0 : index
    %c0_2 = arith.constant 0 : index
    %1 = vector.load %arg6[%c0_1, %c0_2] : memref<1x128xf32, #tpu.memory_space<vmem>>, vector<1x128xf32>
    %c0_3 = arith.constant 0 : index
    %c0_4 = arith.constant 0 : index
    %c0_5 = arith.constant 0 : index
    %c0_6 = arith.constant 0 : index
    %2 = vector.load %arg2[%c0_3, %c0_4, %c0_5, %c0_6] : memref<1x4x16x128xf32, #tpu.memory_space<vmem>>, vector<1x4x16x128xf32>
    %3 = vector.shape_cast %2 : vector<1x4x16x128xf32> to vector<4x16x128xf32>
    %4 = vector.shape_cast %3 : vector<4x16x128xf32> to vector<64x128xf32>
    %cst = arith.constant dense<0.000000e+00> : vector<64x128xf32>
    %5 = tpu.matmul %4, %0, %cst {dimension_numbers = #tpu.dot_dimension_numbers<[1], [0], [0], [1], [0, 0, 1, 1], [], []>} : vector<64x128xf32>, vector<128x128xf32>, vector<64x128xf32> -> vector<64x128xf32>
    %6 = vector.broadcast %1 : vector<1x128xf32> to vector<64x128xf32>
    %7 = arith.addf %5, %6 : vector<64x128xf32>
    %cst_7 = arith.constant 0.000000e+00 : f32
    %8 = vector.broadcast %cst_7 : f32 to vector<64x128xf32>
    %9 = arith.maximumf %7, %8 : vector<64x128xf32>
    %c16 = arith.constant 16 : index
    %c0_8 = arith.constant 0 : index
    %10 = vector.load %arg12[%c16, %c0_8] : memref<96x128xf32, #tpu.memory_space<vmem>>, vector<64x128xf32>
    tpu.vector_store %arg12[%c16, %c0_8], %9 {strides = array<i32>} : memref<96x128xf32, #tpu.memory_space<vmem>>, vector<64x128xf32>,
    %c0_i32 = arith.constant 0 : i32
    %11 = arith.cmpi eq, %arg1, %c0_i32 : i32
    %12 = arith.extui %11 : i1 to i32
    %c0_i32_9 = arith.constant 0 : i32
    %13 = arith.cmpi ne, %12, %c0_i32_9 : i32
    scf.if %13 {
      %cst_52 = arith.constant 0.000000e+00 : f32
      %90 = vector.broadcast %cst_52 : f32 to vector<16x128xf32>
      %c0_53 = arith.constant 0 : index
      %c0_54 = arith.constant 0 : index
      %91 = vector.load %arg12[%c0_53, %c0_54] : memref<96x128xf32, #tpu.memory_space<vmem>>, vector<16x128xf32>
      tpu.vector_store %arg12[%c0_53, %c0_54], %90 {strides = array<i32>} : memref<96x128xf32, #tpu.memory_space<vmem>>, vector<16x128xf32>,
    } else {
    }
    %c0_i32_10 = arith.constant 0 : i32
    %14 = arith.cmpi sgt, %arg1, %c0_i32_10 : i32
    %15 = arith.extui %14 : i1 to i32
    %c0_i32_11 = arith.constant 0 : i32
    %16 = arith.cmpi ne, %15, %c0_i32_11 : i32
    scf.if %16 {
      %c0_52 = arith.constant 0 : index
      %c0_53 = arith.constant 0 : index
      %c0_54 = arith.constant 0 : index
      %c0_55 = arith.constant 0 : index
      %90 = vector.load %arg3[%c0_52, %c0_53, %c0_54, %c0_55] : memref<1x1x16x128xf32, #tpu.memory_space<vmem>>, vector<1x1x16x128xf32>
      %91 = vector.shape_cast %90 : vector<1x1x16x128xf32> to vector<1x16x128xf32>
      %92 = vector.shape_cast %91 : vector<1x16x128xf32> to vector<16x128xf32>
      %cst_56 = arith.constant dense<0.000000e+00> : vector<16x128xf32>
      %93 = tpu.matmul %92, %0, %cst_56 {dimension_numbers = #tpu.dot_dimension_numbers<[1], [0], [0], [1], [0, 0, 1, 1], [], []>} : vector<16x128xf32>, vector<128x128xf32>, vector<16x128xf32> -> vector<16x128xf32>
      %94 = vector.broadcast %1 : vector<1x128xf32> to vector<16x128xf32>
      %95 = arith.addf %93, %94 : vector<16x128xf32>
      %cst_57 = arith.constant 0.000000e+00 : f32
      %96 = vector.broadcast %cst_57 : f32 to vector<16x128xf32>
      %97 = arith.maximumf %95, %96 : vector<16x128xf32>
      %c0_58 = arith.constant 0 : index
      %c0_59 = arith.constant 0 : index
      %98 = vector.load %arg12[%c0_58, %c0_59] : memref<96x128xf32, #tpu.memory_space<vmem>>, vector<16x128xf32>
      tpu.vector_store %arg12[%c0_58, %c0_59], %97 {strides = array<i32>} : memref<96x128xf32, #tpu.memory_space<vmem>>, vector<16x128xf32>,
    } else {
    }
    %c3_i32 = arith.constant 3 : i32
    %17 = arith.cmpi eq, %arg1, %c3_i32 : i32
    %18 = arith.extui %17 : i1 to i32
    %c0_i32_12 = arith.constant 0 : i32
    %19 = arith.cmpi ne, %18, %c0_i32_12 : i32
    scf.if %19 {
      %cst_52 = arith.constant 0.000000e+00 : f32
      %90 = vector.broadcast %cst_52 : f32 to vector<16x128xf32>
      %c80 = arith.constant 80 : index
      %c0_53 = arith.constant 0 : index
      %91 = vector.load %arg12[%c80, %c0_53] : memref<96x128xf32, #tpu.memory_space<vmem>>, vector<16x128xf32>
      tpu.vector_store %arg12[%c80, %c0_53], %90 {strides = array<i32>} : memref<96x128xf32, #tpu.memory_space<vmem>>, vector<16x128xf32>,
    } else {
    }
    %c3_i32_13 = arith.constant 3 : i32
    %20 = arith.cmpi slt, %arg1, %c3_i32_13 : i32
    %21 = arith.extui %20 : i1 to i32
    %c0_i32_14 = arith.constant 0 : i32
    %22 = arith.cmpi ne, %21, %c0_i32_14 : i32
    scf.if %22 {
      %c0_52 = arith.constant 0 : index
      %c0_53 = arith.constant 0 : index
      %c0_54 = arith.constant 0 : index
      %c0_55 = arith.constant 0 : index
      %90 = vector.load %arg4[%c0_52, %c0_53, %c0_54, %c0_55] : memref<1x1x16x128xf32, #tpu.memory_space<vmem>>, vector<1x1x16x128xf32>
      %91 = vector.shape_cast %90 : vector<1x1x16x128xf32> to vector<1x16x128xf32>
      %92 = vector.shape_cast %91 : vector<1x16x128xf32> to vector<16x128xf32>
      %cst_56 = arith.constant dense<0.000000e+00> : vector<16x128xf32>
      %93 = tpu.matmul %92, %0, %cst_56 {dimension_numbers = #tpu.dot_dimension_numbers<[1], [0], [0], [1], [0, 0, 1, 1], [], []>} : vector<16x128xf32>, vector<128x128xf32>, vector<16x128xf32> -> vector<16x128xf32>
      %94 = vector.broadcast %1 : vector<1x128xf32> to vector<16x128xf32>
      %95 = arith.addf %93, %94 : vector<16x128xf32>
      %cst_57 = arith.constant 0.000000e+00 : f32
      %96 = vector.broadcast %cst_57 : f32 to vector<16x128xf32>
      %97 = arith.maximumf %95, %96 : vector<16x128xf32>
      %c80 = arith.constant 80 : index
      %c0_58 = arith.constant 0 : index
      %98 = vector.load %arg12[%c80, %c0_58] : memref<96x128xf32, #tpu.memory_space<vmem>>, vector<16x128xf32>
      tpu.vector_store %arg12[%c80, %c0_58], %97 {strides = array<i32>} : memref<96x128xf32, #tpu.memory_space<vmem>>, vector<16x128xf32>,
    } else {
    }
    %c0_15 = arith.constant 0 : index
    %c0_16 = arith.constant 0 : index
    %23 = vector.load %arg12[%c0_15, %c0_16] : memref<96x128xf32, #tpu.memory_space<vmem>>, vector<96x128xf32>
    %24 = tpu.iota {dimensions = array<i32: 0>} : vector<96x1xi32>
    %c16_i32 = arith.constant 16 : i32
    %c0_i32_17 = arith.constant 0 : i32
    %25 = arith.cmpi eq, %c16_i32, %c0_i32_17 : i32
    %c1_i32 = arith.constant 1 : i32
    %26 = arith.select %25, %c1_i32, %c16_i32 : i32
    %27 = vector.broadcast %26 : i32 to vector<96x1xi32>
    %28 = arith.remsi %24, %27 : vector<96x1xi32>
    %c0_i32_18 = arith.constant 0 : i32
    %29 = vector.broadcast %c0_i32_18 : i32 to vector<96x1xi32>
    %30 = arith.cmpi ne, %28, %29 : vector<96x1xi32>
    %c0_i32_19 = arith.constant 0 : i32
    %31 = vector.broadcast %c0_i32_19 : i32 to vector<96x1xi32>
    %32 = arith.cmpi slt, %28, %31 : vector<96x1xi32>
    %c0_i32_20 = arith.constant 0 : i32
    %33 = arith.cmpi slt, %26, %c0_i32_20 : i32
    %34 = vector.broadcast %33 : i1 to vector<96x1xi1>
    %35 = vector.broadcast %34 : vector<96x1xi1> to vector<96x1xi1>
    %36 = arith.xori %32, %35 : vector<96x1xi1>
    %37 = arith.andi %36, %30 : vector<96x1xi1>
    %38 = vector.broadcast %26 : i32 to vector<96x1xi32>
    %39 = arith.addi %28, %38 : vector<96x1xi32>
    %40 = arith.select %37, %39, %28 : vector<96x1xi1>, vector<96x1xi32>
    %c0_i32_21 = arith.constant 0 : i32
    %41 = vector.broadcast %c0_i32_21 : i32 to vector<96x1xi32>
    %42 = arith.cmpi eq, %40, %41 : vector<96x1xi32>
    %c1_i32_22 = arith.constant 1 : i32
    %43 = tpu.dynamic_rotate %23 by %c1_i32_22 dim 0 : vector<96x128xf32>, i32 -> vector<96x128xf32>
    %cst_23 = arith.constant 0.000000e+00 : f32
    %44 = vector.shape_cast %42 : vector<96x1xi1> to vector<96x1xi1>
    %45 = vector.broadcast %44 : vector<96x1xi1> to vector<96x128xi1>
    %46 = vector.broadcast %cst_23 : f32 to vector<96x128xf32>
    %47 = arith.select %45, %46, %43 : vector<96x128xi1>, vector<96x128xf32>
    %c15_i32 = arith.constant 15 : i32
    %48 = vector.broadcast %c15_i32 : i32 to vector<96x1xi32>
    %49 = arith.cmpi eq, %40, %48 : vector<96x1xi32>
    %c95_i32 = arith.constant 95 : i32
    %50 = tpu.dynamic_rotate %23 by %c95_i32 dim 0 : vector<96x128xf32>, i32 -> vector<96x128xf32>
    %cst_24 = arith.constant 0.000000e+00 : f32
    %51 = vector.shape_cast %49 : vector<96x1xi1> to vector<96x1xi1>
    %52 = vector.broadcast %51 : vector<96x1xi1> to vector<96x128xi1>
    %53 = vector.broadcast %cst_24 : f32 to vector<96x128xf32>
    %54 = arith.select %52, %53, %50 : vector<96x128xi1>, vector<96x128xf32>
    %55 = tpu.concatenate %47, %23, %54 in 1 : vector<96x128xf32>, vector<96x128xf32>, vector<96x128xf32> -> vector<96x384xf32>
    %56 = vector.extract_strided_slice %55 {offsets = [0, 0], sizes = [64, 384], strides = [1, 1]} : vector<96x384xf32> to vector<64x384xf32>
    %c0_25 = arith.constant 0 : index
    %c0_26 = arith.constant 0 : index
    %c0_27 = arith.constant 0 : index
    %57 = vector.load %arg7[%c0_25, %c0_26, %c0_27] : memref<3x384x128xf32, #tpu.memory_space<vmem>>, vector<1x384x128xf32>
    %58 = vector.shape_cast %57 : vector<1x384x128xf32> to vector<384x128xf32>
    %cst_28 = arith.constant dense<0.000000e+00> : vector<64x128xf32>
    %59 = tpu.matmul %56, %58, %cst_28 {dimension_numbers = #tpu.dot_dimension_numbers<[1], [0], [0], [1], [0, 0, 1, 1], [], []>} : vector<64x384xf32>, vector<384x128xf32>, vector<64x128xf32> -> vector<64x128xf32>
    %60 = vector.extract_strided_slice %55 {offsets = [16, 0], sizes = [64, 384], strides = [1, 1]} : vector<96x384xf32> to vector<64x384xf32>
    %c1 = arith.constant 1 : index
    %c0_29 = arith.constant 0 : index
    %c0_30 = arith.constant 0 : index
    %61 = vector.load %arg7[%c1, %c0_29, %c0_30] : memref<3x384x128xf32, #tpu.memory_space<vmem>>, vector<1x384x128xf32>
    %62 = vector.shape_cast %61 : vector<1x384x128xf32> to vector<384x128xf32>
    %cst_31 = arith.constant dense<0.000000e+00> : vector<64x128xf32>
    %63 = tpu.matmul %60, %62, %cst_31 {dimension_numbers = #tpu.dot_dimension_numbers<[1], [0], [0], [1], [0, 0, 1, 1], [], []>} : vector<64x384xf32>, vector<384x128xf32>, vector<64x128xf32> -> vector<64x128xf32>
    %64 = arith.addf %59, %63 : vector<64x128xf32>
    %65 = vector.extract_strided_slice %55 {offsets = [32, 0], sizes = [64, 384], strides = [1, 1]} : vector<96x384xf32> to vector<64x384xf32>
    %c2 = arith.constant 2 : index
    %c0_32 = arith.constant 0 : index
    %c0_33 = arith.constant 0 : index
    %66 = vector.load %arg7[%c2, %c0_32, %c0_33] : memref<3x384x128xf32, #tpu.memory_space<vmem>>, vector<1x384x128xf32>
    %67 = vector.shape_cast %66 : vector<1x384x128xf32> to vector<384x128xf32>
    %cst_34 = arith.constant dense<0.000000e+00> : vector<64x128xf32>
    %68 = tpu.matmul %65, %67, %cst_34 {dimension_numbers = #tpu.dot_dimension_numbers<[1], [0], [0], [1], [0, 0, 1, 1], [], []>} : vector<64x384xf32>, vector<384x128xf32>, vector<64x128xf32> -> vector<64x128xf32>
    %69 = arith.addf %64, %68 : vector<64x128xf32>
    %c0_35 = arith.constant 0 : index
    %c0_36 = arith.constant 0 : index
    %70 = vector.load %arg8[%c0_35, %c0_36] : memref<1x128xf32, #tpu.memory_space<vmem>>, vector<1x128xf32>
    %71 = vector.broadcast %70 : vector<1x128xf32> to vector<64x128xf32>
    %72 = arith.addf %69, %71 : vector<64x128xf32>
    %cst_37 = arith.constant 0.000000e+00 : f32
    %73 = vector.broadcast %cst_37 : f32 to vector<64x128xf32>
    %74 = arith.maximumf %72, %73 : vector<64x128xf32>
    %c0_38 = arith.constant 0 : index
    %c0_39 = arith.constant 0 : index
    %75 = vector.load %arg9[%c0_38, %c0_39] : memref<128x128xf32, #tpu.memory_space<vmem>>, vector<128x128xf32>
    %cst_40 = arith.constant dense<0.000000e+00> : vector<64x128xf32>
    %76 = tpu.matmul %74, %75, %cst_40 {dimension_numbers = #tpu.dot_dimension_numbers<[1], [0], [0], [1], [0, 0, 1, 1], [], []>} : vector<64x128xf32>, vector<128x128xf32>, vector<64x128xf32> -> vector<64x128xf32>
    %c0_41 = arith.constant 0 : index
    %c0_42 = arith.constant 0 : index
    %77 = vector.load %arg10[%c0_41, %c0_42] : memref<1x128xf32, #tpu.memory_space<vmem>>, vector<1x128xf32>
    %78 = vector.broadcast %77 : vector<1x128xf32> to vector<64x128xf32>
    %79 = arith.addf %76, %78 : vector<64x128xf32>
    %c0_43 = arith.constant 0 : index
    %c0_44 = arith.constant 0 : index
    %c0_45 = arith.constant 0 : index
    %c0_46 = arith.constant 0 : index
    %80 = vector.load %arg2[%c0_43, %c0_44, %c0_45, %c0_46] : memref<1x4x16x128xf32, #tpu.memory_space<vmem>>, vector<1x4x16x128xf32>
    %81 = vector.shape_cast %80 : vector<1x4x16x128xf32> to vector<4x16x128xf32>
    %82 = vector.shape_cast %81 : vector<4x16x128xf32> to vector<64x128xf32>
    %83 = arith.addf %79, %82 : vector<64x128xf32>
    %cst_47 = arith.constant 0.000000e+00 : f32
    %84 = vector.broadcast %cst_47 : f32 to vector<64x128xf32>
    %85 = arith.maximumf %83, %84 : vector<64x128xf32>
    %86 = vector.shape_cast %85 : vector<64x128xf32> to vector<4x16x128xf32>
    %c0_48 = arith.constant 0 : index
    %c0_49 = arith.constant 0 : index
    %c0_50 = arith.constant 0 : index
    %c0_51 = arith.constant 0 : index
    %87 = vector.load %arg11[%c0_48, %c0_49, %c0_50, %c0_51] : memref<1x4x16x128xf32, #tpu.memory_space<vmem>>, vector<1x4x16x128xf32>
    %88 = vector.shape_cast %87 : vector<1x4x16x128xf32> to vector<4x16x128xf32>
    %89 = vector.shape_cast %86 : vector<4x16x128xf32> to vector<1x4x16x128xf32>
    tpu.vector_store %arg11[%c0_48, %c0_49, %c0_50, %c0_51], %89 {strides = array<i32>} : memref<1x4x16x128xf32, #tpu.memory_space<vmem>>, vector<1x4x16x128xf32>,
    return
  }
  func.func @transform_0(%arg0: i32, %arg1: i32) -> (i32, i32, i32, i32) {
    %c0_i32 = arith.constant 0 : i32
    %c0_i32_0 = arith.constant 0 : i32
    %c0_i32_1 = arith.constant 0 : i32
    return %arg0, %arg1, %c0_i32, %c0_i32_0 : i32, i32, i32, i32
  }
  func.func @transform_1(%arg0: i32, %arg1: i32) -> (i32, i32, i32, i32) {
    %c4_i32 = arith.constant 4 : i32
    %0 = arith.muli %arg1, %c4_i32 : i32
    %c1_i32 = arith.constant 1 : i32
    %1 = arith.subi %0, %c1_i32 : i32
    %c0_i32 = arith.constant 0 : i32
    %2 = arith.maxsi %1, %c0_i32 : i32
    %c0_i32_0 = arith.constant 0 : i32
    %c0_i32_1 = arith.constant 0 : i32
    %c0_i32_2 = arith.constant 0 : i32
    return %arg0, %2, %c0_i32_0, %c0_i32_1 : i32, i32, i32, i32
  }
  func.func @transform_2(%arg0: i32, %arg1: i32) -> (i32, i32, i32, i32) {
    %c4_i32 = arith.constant 4 : i32
    %0 = arith.muli %arg1, %c4_i32 : i32
    %c4_i32_0 = arith.constant 4 : i32
    %1 = arith.addi %0, %c4_i32_0 : i32
    %c15_i32 = arith.constant 15 : i32
    %2 = arith.minsi %1, %c15_i32 : i32
    %c0_i32 = arith.constant 0 : i32
    %c0_i32_1 = arith.constant 0 : i32
    %c0_i32_2 = arith.constant 0 : i32
    return %arg0, %2, %c0_i32, %c0_i32_1 : i32, i32, i32, i32
  }
  func.func @transform_3(%arg0: i32, %arg1: i32) -> (i32, i32) {
    %c0_i32 = arith.constant 0 : i32
    %c0_i32_0 = arith.constant 0 : i32
    %c0_i32_1 = arith.constant 0 : i32
    return %c0_i32, %c0_i32_0 : i32, i32
  }
  func.func @transform_4(%arg0: i32, %arg1: i32) -> (i32, i32) {
    %c0_i32 = arith.constant 0 : i32
    %c0_i32_0 = arith.constant 0 : i32
    %c0_i32_1 = arith.constant 0 : i32
    return %c0_i32, %c0_i32_0 : i32, i32
  }
  func.func @transform_5(%arg0: i32, %arg1: i32) -> (i32, i32, i32) {
    %c0_i32 = arith.constant 0 : i32
    %c0_i32_0 = arith.constant 0 : i32
    %c0_i32_1 = arith.constant 0 : i32
    %c0_i32_2 = arith.constant 0 : i32
    return %c0_i32, %c0_i32_0, %c0_i32_1 : i32, i32, i32
  }
  func.func @transform_6(%arg0: i32, %arg1: i32) -> (i32, i32) {
    %c0_i32 = arith.constant 0 : i32
    %c0_i32_0 = arith.constant 0 : i32
    %c0_i32_1 = arith.constant 0 : i32
    return %c0_i32, %c0_i32_0 : i32, i32
  }
  func.func @transform_7(%arg0: i32, %arg1: i32) -> (i32, i32) {
    %c0_i32 = arith.constant 0 : i32
    %c0_i32_0 = arith.constant 0 : i32
    %c0_i32_1 = arith.constant 0 : i32
    return %c0_i32, %c0_i32_0 : i32, i32
  }
  func.func @transform_8(%arg0: i32, %arg1: i32) -> (i32, i32) {
    %c0_i32 = arith.constant 0 : i32
    %c0_i32_0 = arith.constant 0 : i32
    %c0_i32_1 = arith.constant 0 : i32
    return %c0_i32, %c0_i32_0 : i32, i32
  }
  func.func @transform_9(%arg0: i32, %arg1: i32) -> (i32, i32, i32, i32) {
    %c0_i32 = arith.constant 0 : i32
    %c0_i32_0 = arith.constant 0 : i32
    %c0_i32_1 = arith.constant 0 : i32
    return %arg0, %arg1, %c0_i32, %c0_i32_0 : i32, i32, i32, i32
  }
}

</mosaic_0001>

<bundles_post_ra>
// kernel: tpu_custom_call.1
= control target key start
LH: loop header
LB: loop body
LE: loop exit
PB: predicated region body
PF: predicated region fallthrough
CT: control target
= control target key end

     0   :  { %s5040_s0 = inlined_call_operand.hbm [shape: f32[2,16,16,128], index: 0, kind: input, shape index: {}]   ;;  %s5041_s1 = inlined_call_operand.hbm [shape: f32[2,16,16,128], index: 1, kind: input, shape index: {}]   ;;  %s5042_s2 = inlined_call_operand.hbm [shape: f32[2,16,16,128], index: 2, kind: input, shape index: {}]   ;;  %s5043_s3 = inlined_call_operand.hbm [shape: f32[128,128], index: 3, kind: input, shape index: {}]   ;;  %s5044_s4 = inlined_call_operand.vmem [shape: f32[1,128], index: 4, kind: input, shape index: {}]   ;;  %s5045_s5 = inlined_call_operand.hbm [shape: f32[3,384,128], index: 5, kind: input, shape index: {}]   ;;  %s5046_s6 = inlined_call_operand.vmem [shape: f32[1,128], index: 6, kind: input, shape index: {}]   ;;  %s5047_s7 = inlined_call_operand.hbm [shape: f32[128,128], index: 7, kind: input, shape index: {}]   ;;  %s5048_s8 = inlined_call_operand.vmem [shape: f32[1,128], index: 8, kind: input, shape index: {}]   ;;  %s5049_s9 = inlined_call_operand.hbm [shape: f32[2,16,16,128], index: 9, kind: output, shape index: {}]  }
   0x1   :  { %5083 = sst [smem:[#allocation37_spill]] %s5040_s0 }
   0x2   :  { %5084 = sst [smem:[#allocation38_spill]] %s5041_s1 }
   0x3   :  { %5085 = sst [smem:[#allocation39_spill]] %s5042_s2 }
   0x4   :  { %5086 = sst [smem:[#allocation40_spill]] %s5043_s3 }
   0x5   :  { %5087 = sst [smem:[#allocation41_spill]] %s5044_s4 }
   0x6   :  { %5088 = sst [smem:[#allocation42_spill]] %s5045_s5 }
   0x7   :  { %5089 = sst [smem:[#allocation43_spill]] %s5046_s6 }
   0x8   :  { %5090 = sst [smem:[#allocation44_spill]] %s5047_s7 }
   0x9   :  { %5091 = sst [smem:[#allocation45_spill]] %s5048_s8 }
   0xa   :  { %5092 = sst [smem:[#allocation46_spill]] %s5049_s9 }
   0xb   :  { %14 = vsyncpa [#allocation4], 0 }
   0xc   :  { %16 = vsyncpa [#allocation4 + $0x1], 0 }
   0xd   :  { %17 = vsyncpa [#allocation7], 0 }
   0xe   :  { %19 = vsyncpa [#allocation7 + $0x1], 0 }
   0xf   :  { %20 = vsyncpa [#allocation10], 0 }
  0x10   :  { %21 = vsyncpa [#allocation13], 0 }
  0x11   :  { %22 = vsyncpa [#allocation5], 0 }
  0x12   :  { %24 = vsyncpa [#allocation5 + $0x1], 0  ;;  %s4027_s30 = smov 0   ;;  %s4029_s10 = smov 0  }
  0x13   :  { %s4031_s11 = smov 0   ;;  %s4033_s12 = smov 0  }
  0x14   :  { %s4035_s13 = smov 0   ;;  %s4037_s14 = smov 0  }
  0x15   :  { %s4039_s15 = smov 0   ;;  %s4041_s16 = smov 0  }
  0x16   :  { %s4043_s17 = smov 0   ;;  %s4045_s18 = smov 0  }
  0x17   :  { %s4047_s19 = smov 0   ;;  %s4049_s20 = smov 0  }
  0x18   :  { %s4051_s21 = smov 0   ;;  %s4053_s22 = smov 0  }
  0x19 LB: > { %5093 = sst [smem:[#allocation21_spill]] %s3910_s30  ;;  %s4098_s23 = sadd.s32 4294967295, %s3962_s22   ;;  %s3962_s22 = sphi %s4053_s22, %s30_s22   ;;  %s3958_s21 = sphi %s4051_s21, %s5198_s21   ;;  %s3954_s20 = sphi %s4049_s20, %s5197_s20   ;;  %s3950_s19 = sphi %s4047_s19, %s5206_s19   ;;  %s3946_s18 = sphi %s4045_s18, %s5195_s18   ;;  %s3942_s17 = sphi %s4043_s17, %s5205_s17   ;;  %s3938_s16 = sphi %s4041_s16, %s5204_s16   ;;  %s3934_s15 = sphi %s4039_s15, %s5203_s15   ;;  %s3930_s14 = sphi %s4037_s14, %s5202_s14   ;;  %s3926_s13 = sphi %s4035_s13, %s5201_s13   ;;  %s3922_s12 = sphi %s4033_s12, %s5200_s12   ;;  %s3918_s11 = sphi %s4031_s11, %s5199_s11   ;;  %s3914_s10 = sphi %s4029_s10, %s5191_s10   ;;  %s3910_s30 = sphi %s4027_s30, %s5190_s30  }
  0x1a   : > { %5094 = sst [smem:[#allocation22_spill]] %s3914_s10  ;;  %p2342_p0 = scmp.ge.s32.totalorder %s3962_s22, 1 }
  0x1b   : > { %5095 = sst [smem:[#allocation23_spill]] %s3918_s11  ;;  %p5051_p1 = scmp.eq.s32.totalorder %s4098_s23, 0 }
  0x1c   : > { %5096 = sst [smem:[#allocation24_spill]] %s3926_s13  ;;  %p301_p3 = scmp.lt.s32.totalorder %s3962_s22, 9 }
  0x1d   : > { %5097 = sst [smem:[#allocation25_spill]] %s3946_s18  ;;  %s3964_s25 = smov [#allocation9]  }
  0x1e   : > { %5098 = sst [smem:[#allocation26_spill]] %s3950_s19  ;;  %p4104_p4 = pnand %p2342_p0, %p301_p3 }
  0x1f   : > { %5099 = sst [smem:[#allocation27_spill]] %s3954_s20  ;;  %s313_s26 = sshll.u32 %s3964_s25, 4  ;;  %s314_s26 = int_to_ptr.vmem [resolvable:$true] %s313_s26 }
  0x20   : > { %5100 = sst [smem:[#allocation28_spill]] %s3958_s21  ;;  %p3473_p5 = pneg %p4104_p4 }
  0x21   : > { %s5101_s24 = scalar_select %p4104_p4, 1, 0 }
  0x22   : > { %p4112_p6 = pnand %p3473_p5, %p5051_p1  ;;  %s5104_s3 = sld [smem:[#allocation40_spill]] }
  0x23   : > { %5102 = sst [smem:[#allocation29_spill]] %s5101_s24 }
  0x24   : > { %s5103_s27 = scalar_select %p4112_p6, 1, 0 }
  0x25   : > { %p4124_p8 = pneg %p4112_p6 }
  0x28   : > { %s3626_s9 = scalar_lea.hbm %s5104_s3, 2048 }
  0x29   : > { %p3627_p7 = scmp.ne.s32.totalorder %s5104_s3, %s3626_s9  ;;  %p3633_p11 = scmp.lt.u32.totalorder %s3626_s9, %s5104_s3 }
  0x2b   : > { %p3629_p9 = pnand %p4124_p8, %p3627_p7 }
  0x2d   : > { %p3630_p10 = pneg %p3629_p9 }
  0x2f   : > { %p3635_p12 = pnand %p3633_p11, %p3630_p10 }
  0x31   : > { %3638 = shalt.err (!%p3635_p12)
}
  0x32   : > { %s3639_s28 = scalar_lea.vmem %s314_s26, 2048  ;;  %p3647_p5 = scmp.lt.s32.totalorder %s314_s26, %s314_s26 }
  0x33   : > { %p3640_p13 = scmp.ne.s32.totalorder %s314_s26, %s3639_s28  ;;  %p3648_p2 = scmp.lt.s32.totalorder %s3639_s28, %s3639_s28 }
  0x35   : > { %p3642_p0 = pnand %p3640_p13, %p4124_p8  ;;  %p3649_p1 = por %p3648_p2, %p3647_p5 }
  0x37   : > { %p3643_p3 = pneg %p3642_p0 }
  0x39   : > { %p3650_p4 = pnand %p3649_p1, %p3643_p3 }
  0x3b   : > { %3653 = shalt.err (!%p3650_p4)
}
  0x3c   : > { %s5055_s8 = smov 128   ;;  %s5057_s6 = smov 8  }
  0x3d   : > { %3476 = dma.hbm_to_vmem [thread:$0]  (!%p4112_p6), %s5104_s3, 2048, %s314_s26, [#allocation10], %s5055_s8, %s5055_s8, %s5057_s6  }
  0x3e   : > { %s39_s19 = sadd.s32 1, %s3954_s20  ;;  %s42_s29 = sadd.s32 1, %s3958_s21 }
  0x3f   : > { %p40_p1 = scmp.ge.s32.totalorder %s39_s19, 4  ;;  %p5071_p2 = scmp.eq.s32.totalorder %s3962_s22, 0 }
  0x40   : > { %s2336_s28 = sshll.u32 %s3954_s20, 2  ;;  %s87_s4 = sadd.s32 1, %s3930_s14 }
  0x41   : > { %s5208_s19 = smov (%p40_p1, %s39_s19), 0  ;;  %s5210_s29 = smov (!%p40_p1, %s42_s29), %s3958_s21 }
  0x42   : > { %5106 = sst [smem:[#allocation30_spill]] %s5208_s19  ;;  %s47_s24 = ssub.s32 %s3954_s20, %s5208_s19 }
  0x43   : > { %s2337_s2 = sadd.s32 4294967295, %s2336_s28  ;;  %p44_p4 = scmp.ge.s32.totalorder %s5210_s29, 2 }
  0x44   : > { %p76_p7 = scmp.gt.s32.totalorder %s2337_s2, 0  ;;  %s2338_s26 = sshll.u32 %s5208_s19, 2 }
  0x45   : > { %p94_p9 = scmp.ne.s32.totalorder %s3930_s14, %s3926_s13  ;;  %s5212_s29 = smov (%p44_p4, %s5210_s29), 0 }
  0x46   : > { %5107 = sst [smem:[#allocation31_spill]] %s5212_s29  ;;  %s5214_s2 = smov (!%p76_p7, %s2337_s2), 0 }
  0x47   : > { %s4160_s9 = ssub.s32 %s3958_s21, %s5212_s29  ;;  %s2339_s18 = sadd.s32 4294967295, %s2338_s26 }
  0x48   : > { %5108 = sst [smem:[#allocation32_spill]] %s4160_s9  ;;  %s4163_s8 = sor.u32 %s47_s24, %s4160_s9 }
  0x49   : > { %p80_p10 = scmp.gt.s32.totalorder %s2339_s18, 0  ;;  %p4168_p12 = por %p94_p9, %p5071_p2 }
  0x4a   : > { %p100_p13 = scmp.ne.s32.totalorder %s3926_s13, %s3922_s12  ;;  %s4174_s3 = sadd.s32 4, %s2336_s28 }
  0x4b   : > { %s5216_s18 = smov (!%p80_p10, %s2339_s18), 0  ;;  %5110 = sst [smem:[#allocation33_spill]] %s4174_s3 }
  0x4c   : > { %s83_s29 = ssub.s32 %s5214_s2, %s5216_s18  ;;  %p5111_p3 = scmp.eq.s32.totalorder %s4098_s23, 0 }
  0x4d   : > { %s84_s24 = sor.u32 %s83_s29, %s4160_s9  ;;  %s4184_s30 = sadd.s32 4, %s2338_s26 }
  0x4e   : > { %p4180_p5 = por %p100_p13, %p5111_p3  ;;  %p85_p1 = scmp.eq.s32.totalorder %s84_s24, 0 }
  0x4f   : > { %p5070_p7 = scmp.lt.s32.totalorder %s3962_s22, 8  ;;  %s4192_s28 = sshll.u32 %s3958_s21, 5 }
  0x50   : > { %s5112_s19 = scalar_select %p4180_p5, 1, 0 }
  0x51   : > { %s4189_s12 = scalar_select %p85_p1, %s3930_s14, %s87_s4  }
  0x52   : > { %5113 = sst [smem:[#allocation34_spill]] %s5112_s19  ;;  %s386_s18 = sand.u32 1, %s3962_s22  }
  0x53   : > { %s388_s29 = sand.u32 1, %s3930_s14   ;;  %s2355_s9 = sshll.u32 %s5214_s2, 1 }
  0x54   : > { %s2352_s13 = sshll.u32 %s388_s29, 4  ;;  %s400_s10 = sadd.s32 %s2355_s9, %s4192_s28 }
  0x55   : > { %s2357_s3 = sshll.u32 %s400_s10, 7  ;;  %s390_s19 = scalar_lea.vmem [#allocation6], %s2352_s13 }
  0x56   : > { %s403_s24 = sshll.u32 %s390_s19, 4  ;;  %s5114_s1 = sld [smem:[#allocation38_spill]]  ;;  %s4202_s24 = int_to_ptr.vmem [resolvable:$true] %s403_s24 }
  0x57   : > { %p4208_p9 = pnand %p5070_p7, %p4168_p12  ;;  %s3967_s2 = smov [#allocation11]  }
  0x58   : > { %s329_s10 = sshll.u32 %s3967_s2, 4  ;;  %s4214_s0 = scalar_lea.sflag [#allocation7], %s386_s18  ;;  %s4212_s10 = int_to_ptr.vmem [resolvable:$true] %s329_s10 }
  0x59   : > { %p3656_p13 = pneg %p4208_p9 }
  0x5c   : > { %s4200_s26 = scalar_lea.hbm %s5114_s1, %s2357_s3  ;;  %s3659_s6 = scalar_lea.hbm %s5114_s1, 8192 }
  0x5d   : > { %s3654_s3 = scalar_lea.hbm %s4200_s26, 256  ;;  %p3660_p12 = scmp.lt.u32.totalorder %s4200_s26, %s5114_s1 }
  0x5e   : > { %p3655_p10 = scmp.ne.s32.totalorder %s4200_s26, %s3654_s3  ;;  %p3661_p4 = scmp.lt.u32.totalorder %s3659_s6, %s3654_s3 }
  0x5f   : > { %p3663_p7 = scmp.lt.u32.totalorder %s3654_s3, %s4200_s26 }
  0x60   : > { %p3657_p3 = pnand %p3656_p13, %p3655_p10  ;;  %p3662_p0 = por %p3661_p4, %p3660_p12 }
  0x62   : > { %p3658_p1 = pneg %p3657_p3  ;;  %p3664_p2 = por %p3663_p7, %p3662_p0 }
  0x64   : > { %p3665_p11 = pnand %p3664_p2, %p3658_p1 }
  0x66   : > { %3668 = shalt.err (!%p3665_p11)
}
  0x67   : > { %s3669_s18 = scalar_lea.vmem %s4202_s24, 256  ;;  %s3968_s29 = smov [#allocation6]  }
  0x68   : > { %p3670_p10 = scmp.ne.s32.totalorder %s4202_s24, %s3669_s18  ;;  %s3674_s2 = sshll.u32 %s3968_s29, 4  ;;  %s3675_s2 = int_to_ptr.vmem [resolvable:$false] %s3674_s2 }
  0x69   : > { %s3676_s11 = scalar_lea.vmem %s3675_s2, 512  ;;  %p3677_p6 = scmp.lt.s32.totalorder %s4202_s24, %s3675_s2 }
  0x6a   : > { %p3672_p3 = pnand %p3670_p10, %p3656_p13  ;;  %p3678_p4 = scmp.lt.s32.totalorder %s3676_s11, %s3669_s18 }
  0x6c   : > { %p3673_p5 = pneg %p3672_p3  ;;  %p3679_p12 = por %p3678_p4, %p3677_p6 }
  0x6e   : > { %p3680_p0 = pnand %p3679_p12, %p3673_p5 }
  0x70   : > { %3683 = shalt.err (!%p3680_p0)
}
  0x71   : > { %s5116_s3 = smov 8   ;;  %s5117_s13 = smov 128  }
  0x72   : > { %3489 = dma.hbm_to_vmem [thread:$0]  (!%p4208_p9), %s4200_s26, 256, %s4202_s24, %s4214_s0, %s5117_s13, %s5117_s13, %s5116_s3  }
  0x73   : > { %s5118_s5 = sld [smem:[#allocation42_spill]] }
  0x79   : > { %s3684_s9 = scalar_lea.hbm %s5118_s5, 18432 }
  0x7a   : > { %p3685_p6 = scmp.ne.s32.totalorder %s5118_s5, %s3684_s9  ;;  %p3691_p5 = scmp.lt.u32.totalorder %s3684_s9, %s5118_s5 }
  0x7c   : > { %p3687_p2 = pnand %p3685_p6, %p4124_p8 }
  0x7e   : > { %p3688_p11 = pneg %p3687_p2 }
  0x80   : > { %p3693_p7 = pnand %p3691_p5, %p3688_p11 }
  0x82   : > { %3696 = shalt.err (!%p3693_p7)
}
  0x83   : > { %s3697_s24 = scalar_lea.vmem %s4212_s10, 18432  ;;  %p3705_p10 = scmp.lt.s32.totalorder %s4212_s10, %s4212_s10 }
  0x84   : > { %p3698_p9 = scmp.ne.s32.totalorder %s4212_s10, %s3697_s24  ;;  %p3706_p3 = scmp.lt.s32.totalorder %s3697_s24, %s3697_s24 }
  0x86   : > { %p3700_p13 = pnand %p3698_p9, %p4124_p8  ;;  %p3707_p4 = por %p3706_p3, %p3705_p10 }
  0x88   : > { %p3701_p1 = pneg %p3700_p13 }
  0x8a   : > { %p3708_p12 = pnand %p3707_p4, %p3701_p1 }
  0x8c   : > { %3711 = shalt.err (!%p3708_p12)
}
  0x8d   : > { %p5119_p0 = scmp.ne.s32.totalorder %s5103_s27, 0  ;;  %s3969_s6 = smov [#allocation12]  }
  0x8e   : > { %s345_s19 = sshll.u32 %s3969_s6, 4  ;;  %s5120_s7 = sld [smem:[#allocation44_spill]]  ;;  %s346_s19 = int_to_ptr.vmem [resolvable:$true] %s345_s19 }
  0x8f   : > { %3479 = dma.hbm_to_vmem [thread:$0]  (!%p5119_p0), %s5118_s5, 18432, %s4212_s10, [#allocation10], %s5117_s13, %s5117_s13, %s5116_s3  }
  0x94   : > { %s3712_s2 = scalar_lea.hbm %s5120_s7, 2048 }
  0x95   : > { %p3713_p6 = scmp.ne.s32.totalorder %s5120_s7, %s3712_s2  ;;  %p3719_p5 = scmp.lt.u32.totalorder %s3712_s2, %s5120_s7 }
  0x97   : > { %p3715_p2 = pnand %p3713_p6, %p4124_p8 }
  0x99   : > { %p3716_p11 = pneg %p3715_p2 }
  0x9b   : > { %p3721_p7 = pnand %p3719_p5, %p3716_p11 }
  0x9d   : > { %3724 = shalt.err (!%p3721_p7)
}
  0x9e   : > { %s3725_s10 = scalar_lea.vmem %s346_s19, 2048  ;;  %p3733_p10 = scmp.lt.s32.totalorder %s346_s19, %s346_s19 }
  0x9f   : > { %p3726_p9 = scmp.ne.s32.totalorder %s346_s19, %s3725_s10  ;;  %p3734_p3 = scmp.lt.s32.totalorder %s3725_s10, %s3725_s10 }
  0xa1   : > { %p3728_p13 = pnand %p3726_p9, %p4124_p8  ;;  %p3735_p4 = por %p3734_p3, %p3733_p10 }
  0xa3   : > { %p3729_p1 = pneg %p3728_p13 }
  0xa5   : > { %p3736_p12 = pnand %p3735_p4, %p3729_p1 }
  0xa7   : > { %3739 = shalt.err (!%p3736_p12)
}
  0xa8   : > { %3482 = dma.hbm_to_vmem [thread:$0]  (!%p5119_p0), %s5120_s7, 2048, %s346_s19, [#allocation13], %s5117_s13, %s5117_s13, %s5116_s3  }
  0xa9   : > { %s2335_s27 = sadd.s32 4294967294, %s3962_s22   ;;  %s51_s25 = sadd.s32 1, %s3942_s17 }
  0xaa   : > { %p5121_p8 = scmp.eq.s32.totalorder %s4163_s8, 0  ;;  %p58_p6 = scmp.ne.s32.totalorder %s3942_s17, %s3938_s16 }
  0xab   : > { %p64_p2 = scmp.ne.s32.totalorder %s3938_s16, %s3934_s15  ;;  %p294_p11 = scmp.eq.s32.totalorder %s2335_s27, 7 }
  0xac   : > { %s4297_s11 = scalar_select %p5121_p8, %s3942_s17, %s51_s25  }
  0xad   : > { %s362_s6 = sand.u32 1, %s3942_s17   ;;  %p5123_p5 = scmp.eq.s32.totalorder %s3962_s22, 0 }
  0xae   : > { %5122 = sst [smem:[#allocation35_spill]] %s4297_s11  ;;  %p5124_p9 = scmp.eq.s32.totalorder %s4098_s23, 0 }
  0xaf   : > { %p60_p7 = por %p5123_p5, %p58_p6  ;;  %p5126_p1 = scmp.eq.s32.totalorder %s4098_s23, 7 }
  0xb0   : > { %p4308_p13 = por %p5124_p9, %p64_p2  ;;  %p4318_p0 = por %p294_p11, %p64_p2 }
  0xb1   : > { %p4314_p10 = por %p5126_p1, %p58_p6  ;;  %s2347_s29 = sshll.u32 %s362_s6, 6 }
  0xb2   : > { %s5128_s8 = scalar_select %p4318_p0, 1, 0 }
  0xb3   : > { %s5127_s19 = scalar_select %p4314_p10, 1, 0 }
  0xb4   : > { %5129 = sst [smem:[#allocation36_spill]] %s5128_s8  ;;  %s2433_s2 = sshll.u32 %s3954_s20, 3 }
  0xb5   : > { %s373_s4 = sadd.s32 %s2433_s2, %s4192_s28  ;;  %s366_s18 = scalar_lea.vmem [#allocation3], %s2347_s29 }
  0xb6   : > { %s376_s24 = sshll.u32 %s366_s18, 4  ;;  %s2351_s10 = sshll.u32 %s373_s4, 7  ;;  %s4324_s24 = int_to_ptr.vmem [resolvable:$true] %s376_s24 }
  0xb7   : > { %s5130_s27 = sld [smem:[#allocation37_spill]]  ;;  %p5131_p3 = scmp.lt.s32.totalorder %s3962_s22, 8 }
  0xb8   : > { %s4337_s29 = scalar_lea.sflag [#allocation4], %s362_s6 }
  0xb9   : > { %p4333_p4 = pnand %p5131_p3, %p60_p7 }
  0xbb   : > { %p3742_p8 = pneg %p4333_p4 }
  0xbd   : > { %s4329_s25 = scalar_lea.hbm %s5130_s27, %s2351_s10  ;;  %s3745_s10 = scalar_lea.hbm %s5130_s27, 8192 }
  0xbe   : > { %s3740_s2 = scalar_lea.hbm %s4329_s25, 1024  ;;  %p3746_p11 = scmp.lt.u32.totalorder %s4329_s25, %s5130_s27 }
  0xbf   : > { %p3741_p12 = scmp.ne.s32.totalorder %s4329_s25, %s3740_s2  ;;  %p3747_p5 = scmp.lt.u32.totalorder %s3745_s10, %s3740_s2 }
  0xc0   : > { %p3749_p9 = scmp.lt.u32.totalorder %s3740_s2, %s4329_s25 }
  0xc1   : > { %p3743_p6 = pnand %p3742_p8, %p3741_p12  ;;  %p3748_p7 = por %p3747_p5, %p3746_p11 }
  0xc3   : > { %p3744_p2 = pneg %p3743_p6  ;;  %p3750_p1 = por %p3749_p9, %p3748_p7 }
  0xc5   : > { %p3751_p3 = pnand %p3750_p1, %p3744_p2 }
  0xc7   : > { %3754 = shalt.err (!%p3751_p3)
}
  0xc8   : > { %s3755_s6 = scalar_lea.vmem %s4324_s24, 1024  ;;  %s3970_s4 = smov [#allocation3]  }
  0xc9   : > { %p3756_p12 = scmp.ne.s32.totalorder %s4324_s24, %s3755_s6  ;;  %s3760_s18 = sshll.u32 %s3970_s4, 4  ;;  %s3761_s18 = int_to_ptr.vmem [resolvable:$false] %s3760_s18 }
  0xca   : > { %s3762_s1 = scalar_lea.vmem %s3761_s18, 2048  ;;  %p3763_p10 = scmp.lt.s32.totalorder %s4324_s24, %s3761_s18 }
  0xcb   : > { %p3758_p6 = pnand %p3756_p12, %p3742_p8  ;;  %p3764_p11 = scmp.lt.s32.totalorder %s3762_s1, %s3755_s6 }
  0xcd   : > { %p3759_p0 = pneg %p3758_p6  ;;  %p3765_p5 = por %p3764_p11, %p3763_p10 }
  0xcf   : > { %p3766_p7 = pnand %p3765_p5, %p3759_p0 }
  0xd1   : > { %3769 = shalt.err (!%p3766_p7)
}
  0xd2   : > { %s5133_s2 = sld [smem:[#allocation23_spill]]  ;;  %s5134_s10 = sld [smem:[#allocation33_spill]] }
  0xd3   : > { %s5135_s26 = sld [smem:[#allocation22_spill]]  ;;  %s5137_s6 = sld [smem:[#allocation32_spill]] }
  0xd4   : > { %s5136_s4 = sld [smem:[#allocation21_spill]]  ;;  %p5139_p0 = scmp.lt.s32.totalorder %s4184_s30, 15 }
  0xd5   : > { %3486 = dma.hbm_to_vmem [thread:$0]  (!%p4333_p4), %s4329_s25, 1024, %s4324_s24, %s4337_s29, %s5117_s13, %s5117_s13, %s5116_s3  }
  0xd6   : > { %s5220_s30 = smov (!%p5139_p0, %s4184_s30), 15  ;;  %p5140_p9 = scmp.eq.s32.totalorder %s3962_s22, 0 }
  0xd7   : > { %p5141_p12 = scmp.eq.s32.totalorder %s4098_s23, 0  ;;  %s5143_s11 = sld [smem:[#allocation39_spill]] }
  0xd8   : > { %s123_s5 = sadd.s32 1, %s5133_s2  ;;  %p5138_p10 = scmp.lt.s32.totalorder %s5134_s10, 15 }
  0xd9   : > { %p130_p8 = scmp.ne.s32.totalorder %s5133_s2, %s5135_s26  ;;  %s415_s1 = sand.u32 1, %s5133_s2  }
  0xda   : > { %s5218_s10 = smov (!%p5138_p10, %s5134_s10), 15  ;;  %p136_p2 = scmp.ne.s32.totalorder %s5135_s26, %s5136_s4 }
  0xdb   : > { %s119_s18 = ssub.s32 %s5218_s10, %s5220_s30  ;;  %p132_p1 = por %p130_p8, %p5140_p9 }
  0xdc   : > { %s120_s7 = sor.u32 %s119_s18, %s5137_s6  ;;  %p4385_p6 = por %p136_p2, %p5141_p12 }
  0xdd   : > { %p121_p3 = scmp.eq.s32.totalorder %s120_s7, 0  ;;  %s2358_s24 = sshll.u32 %s415_s1, 4 }
  0xde   : > { %s5142_s27 = scalar_select %p4385_p6, 1, 0 }
  0xdf   : > { %s2360_s25 = sshll.u32 %s5218_s10, 1  ;;  %s5222_s2 = smov (!%p121_p3, %s5133_s2), %s123_s5 }
  0xe0   : > { %s427_s29 = sadd.s32 %s2360_s25, %s4192_s28  ;;  %s417_s20 = scalar_lea.vmem [#allocation8], %s2358_s24 }
  0xe1   : > { %s2362_s21 = sshll.u32 %s427_s29, 7  ;;  %s430_s26 = sshll.u32 %s417_s20, 4  ;;  %s4398_s26 = int_to_ptr.vmem [resolvable:$true] %s430_s26 }
  0xe2   : > { %s5144_s8 = smov %s5143_s11  ;;  %s4396_s6 = scalar_lea.hbm %s5143_s11, %s2362_s21 }
  0xe3   : > { %p5145_p4 = scmp.lt.s32.totalorder %s3962_s22, 8  ;;  %s3770_s28 = scalar_lea.hbm %s4396_s6, 256 }
  0xe4   : > { %p3771_p5 = scmp.ne.s32.totalorder %s4396_s6, %s3770_s28  ;;  %s3775_s11 = scalar_lea.hbm %s5144_s8, 8192 }
  0xe5   : > { %p4402_p11 = pnand %p5145_p4, %p132_p1  ;;  %p3776_p8 = scmp.lt.u32.totalorder %s4396_s6, %s5144_s8 }
  0xe6   : > { %p3777_p2 = scmp.lt.u32.totalorder %s3775_s11, %s3770_s28  ;;  %p3779_p1 = scmp.lt.u32.totalorder %s3770_s28, %s4396_s6 }
  0xe7   : > { %p3772_p7 = pneg %p4402_p11 }
  0xe8   : > { %p3778_p9 = por %p3777_p2, %p3776_p8 }
  0xe9   : > { %p3773_p10 = pnand %p3772_p7, %p3771_p5 }
  0xea   : > { %p3780_p3 = por %p3779_p1, %p3778_p9 }
  0xeb   : > { %p3774_p0 = pneg %p3773_p10 }
  0xed   : > { %p3781_p12 = pnand %p3780_p3, %p3774_p0 }
  0xef   : > { %3784 = shalt.err (!%p3781_p12)
}
  0xf0   : > { %s3785_s18 = scalar_lea.vmem %s4398_s26, 256  ;;  %s3971_s1 = smov [#allocation8]  }
  0xf1   : > { %p3786_p4 = scmp.ne.s32.totalorder %s4398_s26, %s3785_s18  ;;  %s3790_s24 = sshll.u32 %s3971_s1, 4  ;;  %s3791_s24 = int_to_ptr.vmem [resolvable:$false] %s3790_s24 }
  0xf2   : > { %s3792_s25 = scalar_lea.vmem %s3791_s24, 512  ;;  %p3793_p6 = scmp.lt.s32.totalorder %s4398_s26, %s3791_s24 }
  0xf3   : > { %p3788_p5 = pnand %p3786_p4, %p3772_p7  ;;  %p3794_p8 = scmp.lt.s32.totalorder %s3792_s25, %s3785_s18 }
  0xf5   : > { %p3789_p10 = pneg %p3788_p5  ;;  %p3795_p2 = por %p3794_p8, %p3793_p6 }
  0xf7   : > { %p3796_p9 = pnand %p3795_p2, %p3789_p10 }
  0xf9   : > { %3799 = shalt.err (!%p3796_p9)
}
  0xfa   : > { %3492 = dma.hbm_to_vmem [thread:$0]  (!%p4402_p11), %s4396_s6, 256, %s4398_s26, %s4214_s0, %s5117_s13, %s5117_s13, %s5116_s3  }
  0xfb   : > { %s5147_s29 = sld [smem:[#allocation29_spill]] }
 0x101   : > { %p5148_p7 = scmp.ne.s32.totalorder %s5147_s29, 0 }
 0x102   : > { %s4438_s4 = sand.u32 (!%p5148_p7), 1, %s3938_s16  }
 0x103   : > { %442 = sbr.rel (%p5148_p7) target bundleno = 1665 (0x681), region = 56  ;;  %s2364_s30 = sshll.u32 (!%p5148_p7), %s4438_s4, 6 }
 0x104   : > { %s445_s28 = scalar_lea.sflag (!%p5148_p7), [#allocation4], %s4438_s4  ;;  %s4444_s7 = scalar_lea.vmem (!%p5148_p7), [#allocation3], %s2364_s30 }
 0x10a   : > { %3885 = dma.done.wait (%p4308_p13), %s445_s28, 1024  }
 0x10b   : > { %3887 = vsyncadd (%p4308_p13), %s445_s28, 4294966272  ;;  %s5149_s0 = sld [smem:[#allocation24_spill]]  ;;  %s5150_s3 = sld [smem:[#allocation34_spill]] }
 0x10c   : > { %s453_s13 = sand.u32 1, %s4098_s23  }
 0x10d   : > { %s454_s20 = scalar_lea.sflag [#allocation7], %s453_s13 }
 0x111   : > { %s455_s26 = sand.u32 1, %s5149_s0   ;;  %p5151_p6 = scmp.ne.s32.totalorder %s5150_s3, 0 }
 0x112   : > { %s4452_s6 = sshll.u32 %s455_s26, 4 }
 0x113   : > { %s457_s21 = scalar_lea.vmem [#allocation6], %s4452_s6 }
 0x114   : > { %3889 = dma.done.wait (%p5151_p6), %s454_s20, 256  }
 0x115   : > { %3891 = vsyncadd (%p5151_p6), %s454_s20, 4294967040  ;;  %s5152_s11 = sld [smem:[#allocation22_spill]]  ;;  %p5153_p13 = scmp.ne.s32.totalorder %s5142_s27, 0 }
 0x11b   : > { %s464_s10 = sand.u32 1, %s5152_s11  }
 0x11c   : > { %s4460_s9 = sshll.u32 %s464_s10, 4 }
 0x11d   : > { %s466_s5 = scalar_lea.vmem [#allocation8], %s4460_s9 }
 0x11e   : > { %3893 = dma.done.wait (%p5153_p13), %s454_s20, 256  }
 0x11f   : > { %3895 = vsyncadd (%p5153_p13), %s454_s20, 4294967040  ;;  %p5154_p11 = scmp.eq.s32.totalorder %s4098_s23, 0 }
 0x121   : > { %3897 = dma.done.wait (%p5154_p11), [#allocation10], 20480   ;;  %p5155_p0 = pmov %p5154_p11 }
 0x123   : > { %3899 = vsyncadd (%p5155_p0), [#allocation10], 4294946816  ;;  %p5156_p1 = pmov %p5155_p0 }
 0x124   : > { %p5157_p3 = pmov %p5155_p0 }
 0x125   : > { %3901 = dma.done.wait (%p5156_p1), [#allocation13], 2048  }
 0x126   : > { %3903 = vsyncadd (%p5157_p3), [#allocation13], 4294965248  ;;  %v533_v0 = vld [vmem:[#allocation9] sm:$0xff]  ;;  %v534_v1 = vld [vmem:[#allocation9 + $0x8] sm:$0xff]  ;;  %s5158_s18 = sld [smem:[#allocation41_spill]]  ;;  %s4546_s1 = scalar_lea.vmem [#allocation14], %s2364_s30 }
 0x127   : > { %v535_v2 = vld [vmem:[#allocation9 + $0x10] sm:$0xff]  ;;  %v4475_v3 = vpack.c.bf16 %v534_v1, %v533_v0  ;;  %v536_v4 = vld [vmem:[#allocation9 + $0x18] sm:$0xff]  ;;  %v537_v6 = vld [vmem:[#allocation9 + $0x20] sm:$0xff]  ;;  %s5159_s24 = sld [smem:[#allocation25_spill]] }
 0x128   : > { %v4477_v5 = vpack.c.bf16 %v536_v4, %v535_v2  ;;  %v538_v7 = vld [vmem:[#allocation9 + $0x28] sm:$0xff]  ;;  %v550_v9 = vld [vmem:[%s4444_s7] sm:$0xff]  ;;  %v539_v11 = vld [vmem:[#allocation9 + $0x30] sm:$0xff] }
 0x129   : > { %3062 = vmatprep.subr.bf16.mxu0 %v4475_v3  ;;  %3381 = vmatprep.subr.bf16.mxu1 %v4475_v3  ;;  %v4485_v8 = vpack.c.bf16 %v538_v7, %v537_v6  ;;  %v554_v10 = vld [vmem:[%s4444_s7 + $0x20] sm:$0xff]  ;;  %v540_v12 = vld [vmem:[#allocation9 + $0x38] sm:$0xff]  ;;  %v542_v15 = vld [vmem:[#allocation9 + $0x48] sm:$0xff] }
 0x12a   : > { %3064 = vmatpush3.bf16.msra.mxu0 %v4475_v3  ;;  %3389 = vmatpush3.bf16.msra.mxu1 %v4475_v3  ;;  %v4493_v13 = vpack.c.bf16 %v540_v12, %v539_v11  ;;  %v541_v14 = vld [vmem:[#allocation9 + $0x40] sm:$0xff]  ;;  %v543_v17 = vld [vmem:[#allocation9 + $0x50] sm:$0xff]  ;;  %v544_v18 = vld [vmem:[#allocation9 + $0x58] sm:$0xff] }
 0x12b   : > { %3066 = vmatprep.subr.bf16.mxu0 %v4477_v5  ;;  %3382 = vmatprep.subr.bf16.mxu1 %v4477_v5  ;;  %v4499_v16 = vpack.c.bf16 %v542_v15, %v541_v14  ;;  %v4505_v19 = vpack.c.bf16 %v544_v18, %v543_v17  ;;  %v545_v20 = vld [vmem:[#allocation9 + $0x60] sm:$0xff]  ;;  %v546_v21 = vld [vmem:[#allocation9 + $0x68] sm:$0xff]  ;;  %v547_v23 = vld [vmem:[#allocation9 + $0x70] sm:$0xff] }
 0x12c   : > { %2803 = vmatprep.mubr.f32.mxu0 %v550_v9  ;;  %2809 = vmatprep.mubr.f32.mxu1 %v554_v10  ;;  %v4511_v22 = vpack.c.bf16 %v546_v21, %v545_v20  ;;  %v548_v24 = vld [vmem:[#allocation9 + $0x78] sm:$0xff]  ;;  %v551_v26 = vld [vmem:[%s4444_s7 + $0x8] sm:$0xff]  ;;  %v552_v28 = vld [vmem:[%s4444_s7 + $0x10] sm:$0xff] }
 0x12d   : > { %v4517_v25 = vpack.c.bf16 %v548_v24, %v547_v23  ;;  %v555_v27 = vld [vmem:[%s4444_s7 + $0x28] sm:$0xff]  ;;  %v556_v29 = vld [vmem:[%s4444_s7 + $0x30] sm:$0xff]  ;;  %v553_v30 = vld [vmem:[%s4444_s7 + $0x18] sm:$0xff]  ;;  %p2372_p12 = scmp.ne.s32.totalorder %s5159_s24, 0 }
 0x12e   : > { %3068 = vmatpush3.bf16.msra.mxu0 %v4477_v5  ;;  %3390 = vmatpush3.bf16.msra.mxu1 %v4477_v5  ;;  %v557_v31 = vld [vmem:[%s4444_s7 + $0x38] sm:$0xff]  ;;  %v4534_v32 = vld [vmem:[%s5158_s18] ss:$0 sm:$0xff]  ;;  %v3972_v57 = vmov (!%p2372_p12), 0.0  }
 0x12f   : > { %3070 = vmatprep.subr.bf16.mxu0 %v4485_v8  ;;  %3383 = vmatprep.subr.bf16.mxu1 %v4485_v8  ;;  %689 = vst [vmem:[#allocation2] sm:$0xff] (!%p2372_p12), %v3972_v57  ;;  %690 = vst [vmem:[#allocation2 + $0x8] sm:$0xff] (!%p2372_p12), %v3972_v57 }
 0x132   : > { %3072 = vmatpush3.bf16.msra.mxu0 %v4485_v8  ;;  %3391 = vmatpush3.bf16.msra.mxu1 %v4485_v8 }
 0x133   : > { %3074 = vmatprep.subr.bf16.mxu0 %v4493_v13  ;;  %3384 = vmatprep.subr.bf16.mxu1 %v4493_v13 }
 0x136   : > { %3076 = vmatpush3.bf16.msra.mxu0 %v4493_v13  ;;  %3392 = vmatpush3.bf16.msra.mxu1 %v4493_v13 }
 0x137   : > { %3078 = vmatprep.subr.bf16.mxu0 %v4499_v16  ;;  %3385 = vmatprep.subr.bf16.mxu1 %v4499_v16 }
 0x13a   : > { %3080 = vmatpush3.bf16.msra.mxu0 %v4499_v16  ;;  %3393 = vmatpush3.bf16.msra.mxu1 %v4499_v16 }
 0x13b   : > { %3082 = vmatprep.subr.bf16.mxu0 %v4505_v19  ;;  %3386 = vmatprep.subr.bf16.mxu1 %v4505_v19 }
 0x13e   : > { %3084 = vmatpush3.bf16.msra.mxu0 %v4505_v19  ;;  %3394 = vmatpush3.bf16.msra.mxu1 %v4505_v19 }
 0x13f   : > { %3086 = vmatprep.subr.bf16.mxu0 %v4511_v22  ;;  %3387 = vmatprep.subr.bf16.mxu1 %v4511_v22 }
 0x142   : > { %3088 = vmatpush3.bf16.msra.mxu0 %v4511_v22  ;;  %3395 = vmatpush3.bf16.msra.mxu1 %v4511_v22 }
 0x143   : > { %3090 = vmatprep.subr.bf16.mxu0 %v4517_v25  ;;  %3388 = vmatprep.subr.bf16.mxu1 %v4517_v25 }
 0x146   : > { %3092 = vmatpush3.bf16.msra.mxu0 %v4517_v25  ;;  %3396 = vmatpush3.bf16.msra.mxu1 %v4517_v25 }
 0x149   : > { %2804 = vmatmul.mubr.f32.vlgmr.msra.gmra.mrb[0].mxu0 %v551_v26  ;;  %2810 = vmatmul.mubr.f32.vlgmr.msra.gmra.mrb[0].mxu1 %v555_v27 }
 0x14a   : > { %2806 = vmatprep.mubr.f32.mxu0 %v552_v28  ;;  %2812 = vmatprep.mubr.f32.mxu1 %v556_v29 }
 0x14d   : > { %2807 = vmatmul.mubr.f32.gmra.mrb[2].mxu0 %v553_v30  ;;  %2813 = vmatmul.mubr.f32.gmra.mrb[2].mxu1 %v557_v31 }
 0x21c   : > { %v2805_v33 = vpop.f32.mrb[0].mxu0  ;;  %v2811_v34 = vpop.f32.mrb[0].mxu1 }
 0x21d   : > { %v636_v35 = vadd.f32 %v2805_v33, %v4534_v32  ;;  %v656_v36 = vadd.f32 %v2811_v34, %v4534_v32  ;;  %v630_v37 = vpop.f32.mrb[1].mxu0  ;;  %v650_v38 = vpop.f32.mrb[1].mxu1 }
 0x21e   : > { %v631_v39 = vadd.f32 %v4534_v32, %v630_v37  ;;  %v651_v40 = vadd.f32 %v4534_v32, %v650_v38 }
 0x21f   : > { %v670_v41 = vmax.f32 %v636_v35, 0.0  ;;  %v674_v42 = vmax.f32 %v656_v36, 0.0 }
 0x220   : > { %v669_v43 = vmax.f32 %v631_v39, 0.0  ;;  %v673_v44 = vmax.f32 %v651_v40, 0.0  ;;  %v2808_v45 = vpop.f32.mrb[2].mxu0  ;;  %v2814_v46 = vpop.f32.mrb[2].mxu1  ;;  %688 = sbr.rel (%p2372_p12) target bundleno = 551 (0x227), region = 84 }
 0x221   : > { %678 = vst [vmem:[#allocation2 + $0x18] sm:$0xff] %v670_v41  ;;  %682 = vst [vmem:[#allocation2 + $0x38] sm:$0xff] %v674_v42  ;;  %v646_v47 = vadd.f32 %v2808_v45, %v4534_v32  ;;  %v666_v48 = vadd.f32 %v2814_v46, %v4534_v32  ;;  %v640_v49 = vpop.f32.mrb[3].mxu0  ;;  %v660_v50 = vpop.f32.mrb[3].mxu1 }
 0x222   : > { %677 = vst [vmem:[#allocation2 + $0x10] sm:$0xff] %v669_v43  ;;  %681 = vst [vmem:[#allocation2 + $0x30] sm:$0xff] %v673_v44  ;;  %v641_v51 = vadd.f32 %v4534_v32, %v640_v49  ;;  %v661_v52 = vadd.f32 %v4534_v32, %v660_v50 }
 0x223   : > { %v672_v53 = vmax.f32 %v646_v47, 0.0  ;;  %v676_v54 = vmax.f32 %v666_v48, 0.0 }
 0x224   : > { %v671_v55 = vmax.f32 %v641_v51, 0.0  ;;  %v675_v56 = vmax.f32 %v661_v52, 0.0 }
 0x225   : > { %680 = vst [vmem:[#allocation2 + $0x28] sm:$0xff] %v672_v53  ;;  %684 = vst [vmem:[#allocation2 + $0x48] sm:$0xff] %v676_v54 }
 0x226   : > { %679 = vst [vmem:[#allocation2 + $0x20] sm:$0xff] %v671_v55  ;;  %683 = vst [vmem:[#allocation2 + $0x40] sm:$0xff] %v675_v56 }
 0x227 PF: > { %s5160_s25 = sld [smem:[#allocation25_spill]] }
 0x22d   : > { %p2373_p4 = scmp.le.s32.totalorder %s5160_s25, 0 }
 0x22e   : > { %3094 = vmatprep.subr.bf16.mxu0 (!%p2373_p4), %v4475_v3  ;;  %v695_v58 = vld [vmem:[%s457_s21] sm:$0xff] (!%p2373_p4)  ;;  %v696_v59 = vld [vmem:[%s457_s21 + $0x8] sm:$0xff] (!%p2373_p4) }
 0x22f   : > { %694 = sbr.rel (%p2373_p4) target bundleno = 808 (0x328), region = 88  ;;  %3096 = vmatpush3.bf16.msra.mxu0 (!%p2373_p4), %v4475_v3  ;;  %2847 = vmatprep.mubr.f32.mxu0 (!%p2373_p4), %v695_v58 }
 0x230   : > { %3098 = vmatprep.subr.bf16.mxu0 (!%p2373_p4), %v4477_v5 }
 0x233   : > { %3100 = vmatpush3.bf16.msra.mxu0 (!%p2373_p4), %v4477_v5 }
 0x234   : > { %3102 = vmatprep.subr.bf16.mxu0 (!%p2373_p4), %v4485_v8 }
 0x237   : > { %3104 = vmatpush3.bf16.msra.mxu0 %v4485_v8 }
 0x238   : > { %3106 = vmatprep.subr.bf16.mxu0 %v4493_v13 }
 0x23b   : > { %3108 = vmatpush3.bf16.msra.mxu0 %v4493_v13 }
 0x23c   : > { %3110 = vmatprep.subr.bf16.mxu0 %v4499_v16 }
 0x23f   : > { %3112 = vmatpush3.bf16.msra.mxu0 %v4499_v16 }
 0x240   : > { %3114 = vmatprep.subr.bf16.mxu0 %v4505_v19 }
 0x243   : > { %3116 = vmatpush3.bf16.msra.mxu0 %v4505_v19 }
 0x244   : > { %3118 = vmatprep.subr.bf16.mxu0 %v4511_v22 }
 0x247   : > { %3120 = vmatpush3.bf16.msra.mxu0 %v4511_v22 }
 0x248   : > { %3122 = vmatprep.subr.bf16.mxu0 %v4517_v25 }
 0x24b   : > { %3124 = vmatpush3.bf16.msra.mxu0 %v4517_v25 }
 0x24e   : > { %2848 = vmatmul.mubr.f32.vlgmr.msra.gmra.mrb[0].mxu0 %v696_v59 }
 0x321   : > { %v2849_v60 = vpop.f32.mrb[0].mxu0 }
 0x322   : > { %v769_v61 = vadd.f32 %v2849_v60, %v4534_v32  ;;  %v763_v62 = vpop.f32.mrb[1].mxu0 }
 0x323   : > { %v764_v63 = vadd.f32 %v4534_v32, %v763_v62 }
 0x324   : > { %v773_v0 = vmax.f32 %v769_v61, 0.0 }
 0x325   : > { %v772_v1 = vmax.f32 %v764_v63, 0.0 }
 0x326   : > { %775 = vst [vmem:[#allocation2 + $0x8] sm:$0xff] %v773_v0 }
 0x327   : > { %774 = vst [vmem:[#allocation2] sm:$0xff] %v772_v1 }
 0x328 PF: > { %s5161_s29 = sld [smem:[#allocation25_spill]] }
 0x32e   : > { %p2374_p5 = scmp.ne.s32.totalorder %s5161_s29, 3 }
 0x32f   : > { %v3973_v2 = vmov (!%p2374_p5), 0.0  }
 0x330   : > { %779 = sbr.rel (%p2374_p5) target bundleno = 823 (0x337), region = 92  ;;  %780 = vst [vmem:[#allocation2 + $0x50] sm:$0xff] (!%p2374_p5), %v3973_v2  ;;  %781 = vst [vmem:[#allocation2 + $0x58] sm:$0xff] (!%p2374_p5), %v3973_v2 }
 0x337 PF: > { %s5162_s30 = sld [smem:[#allocation25_spill]] }
 0x33d   : > { %p2375_p10 = scmp.ge.s32.totalorder %s5162_s30, 3 }
 0x33e   : > { %3126 = vmatprep.subr.bf16.mxu0 (!%p2375_p10), %v4475_v3  ;;  %v786_v4 = vld [vmem:[%s466_s5] sm:$0xff] (!%p2375_p10) }
 0x33f   : > { %785 = sbr.rel (%p2375_p10) target bundleno = 1080 (0x438), region = 96  ;;  %3128 = vmatpush3.bf16.msra.mxu0 (!%p2375_p10), %v4475_v3  ;;  %2882 = vmatprep.mubr.f32.mxu0 (!%p2375_p10), %v786_v4  ;;  %v787_v3 = vld [vmem:[%s466_s5 + $0x8] sm:$0xff] (!%p2375_p10) }
 0x340   : > { %3130 = vmatprep.subr.bf16.mxu0 (!%p2375_p10), %v4477_v5 }
 0x343   : > { %3132 = vmatpush3.bf16.msra.mxu0 (!%p2375_p10), %v4477_v5 }
 0x344   : > { %3134 = vmatprep.subr.bf16.mxu0 (!%p2375_p10), %v4485_v8 }
 0x347   : > { %3136 = vmatpush3.bf16.msra.mxu0 %v4485_v8 }
 0x348   : > { %3138 = vmatprep.subr.bf16.mxu0 %v4493_v13 }
 0x34b   : > { %3140 = vmatpush3.bf16.msra.mxu0 %v4493_v13 }
 0x34c   : > { %3142 = vmatprep.subr.bf16.mxu0 %v4499_v16 }
 0x34f   : > { %3144 = vmatpush3.bf16.msra.mxu0 %v4499_v16 }
 0x350   : > { %3146 = vmatprep.subr.bf16.mxu0 %v4505_v19 }
 0x353   : > { %3148 = vmatpush3.bf16.msra.mxu0 %v4505_v19 }
 0x354   : > { %3150 = vmatprep.subr.bf16.mxu0 %v4511_v22 }
 0x357   : > { %3152 = vmatpush3.bf16.msra.mxu0 %v4511_v22 }
 0x358   : > { %3154 = vmatprep.subr.bf16.mxu0 %v4517_v25 }
 0x35b   : > { %3156 = vmatpush3.bf16.msra.mxu0 %v4517_v25 }
 0x35e   : > { %2883 = vmatmul.mubr.f32.vlgmr.msra.gmra.mrb[0].mxu0 %v787_v3 }
 0x431   : > { %v2884_v5 = vpop.f32.mrb[0].mxu0 }
 0x432   : > { %v860_v6 = vadd.f32 %v2884_v5, %v4534_v32  ;;  %v854_v7 = vpop.f32.mrb[1].mxu0 }
 0x433   : > { %v855_v8 = vadd.f32 %v4534_v32, %v854_v7 }
 0x434   : > { %v864_v9 = vmax.f32 %v860_v6, 0.0 }
 0x435   : > { %v863_v10 = vmax.f32 %v855_v8, 0.0 }
 0x436   : > { %866 = vst [vmem:[#allocation2 + $0x58] sm:$0xff] %v864_v9 }
 0x437   : > { %865 = vst [vmem:[#allocation2 + $0x50] sm:$0xff] %v863_v10 }
 0x438 PF: > { %v1247_v11 = vld [vmem:[#allocation11 + $0x200] sm:$0xff]  ;;  %v1248_v12 = vld [vmem:[#allocation11 + $0x208] sm:$0xff]  ;;  %v1249_v20 = vld [vmem:[#allocation11 + $0x210] sm:$0xff]  ;;  %v879_v48 = vlaneseq  ;;  %s5181_s3 = sld [smem:[#allocation43_spill]]  ;;  %s5182_s6 = sld [smem:[#allocation45_spill]] }
 0x439   : > { %v1263_v13 = vld [vmem:[#allocation11 + $0x280] sm:$0xff]  ;;  %v3157_v14 = vpack.c.bf16 %v1248_v12, %v1247_v11  ;;  %v1264_v15 = vld [vmem:[#allocation11 + $0x288] sm:$0xff]  ;;  %v1250_v21 = vld [vmem:[#allocation11 + $0x218] sm:$0xff]  ;;  %s5183_s20 = sld [smem:[#allocation25_spill]]  ;;  %s5184_s21 = sld [smem:[#allocation26_spill]] }
 0x43a   : > { %v1231_v16 = vld [vmem:[#allocation11 + $0x180] sm:$0xff]  ;;  %v1232_v17 = vld [vmem:[#allocation11 + $0x188] sm:$0xff]  ;;  %v3189_v18 = vpack.c.bf16 %v1264_v15, %v1263_v13  ;;  %v1265_v22 = vld [vmem:[#allocation11 + $0x290] sm:$0xff]  ;;  %v3161_v23 = vpack.c.bf16 %v1250_v21, %v1249_v20  ;;  %v4596_v58 = vshrl.u32 %v879_v48, 7  ;;  %s2166_s23 = sshll.u32 %s4546_s1, 4  ;;  %s5185_s24 = sld [smem:[#allocation46_spill]]  ;;  %s4960_s23 = int_to_ptr.vmem [resolvable:$true] %s2166_s23 }
 0x43b   : > { %v3159_v19 = vpack.c.bf16 %v1232_v17, %v1231_v16  ;;  %3158 = vmatprep.subr.bf16.mxu0 %v3157_v14  ;;  %v1266_v24 = vld [vmem:[#allocation11 + $0x298] sm:$0xff]  ;;  %v1233_v25 = vld [vmem:[#allocation11 + $0x190] sm:$0xff]  ;;  %v1251_v29 = vld [vmem:[#allocation11 + $0x220] sm:$0xff]  ;;  %s3800_s29 = scalar_lea.vmem %s4960_s23, 1024  ;;  %p5186_p2 = scmp.ne.s32.totalorder %s5127_s19, 0 }
 0x43c   : > { %v1234_v26 = vld [vmem:[#allocation11 + $0x198] sm:$0xff]  ;;  %3190 = vmatprep.subr.bf16.mxu1 %v3189_v18  ;;  %v3193_v27 = vpack.c.bf16 %v1266_v24, %v1265_v22  ;;  %v1252_v30 = vld [vmem:[#allocation11 + $0x228] sm:$0xff]  ;;  %v1267_v31 = vld [vmem:[#allocation11 + $0x2a0] sm:$0xff]  ;;  %vm1133_vm0 = vcmp.lt.s32.totalorder %v4596_v58, 7  ;;  %v882_v21 = vadd.s32 16, %v4596_v58  ;;  %vm1060_vm1 = vcmp.lt.s32.totalorder %v4596_v58, 1  ;;  %p3801_p8 = scmp.ne.s32.totalorder %s4960_s23, %s3800_s29 }
 0x43d   : > { %3160 = vmatpush3.bf16.msra.mxu0 %v3159_v19  ;;  %v3163_v28 = vpack.c.bf16 %v1234_v26, %v1233_v25  ;;  %3192 = vmatpush3.bf16.msra.mxu1 %v3189_v18  ;;  %v3165_v32 = vpack.c.bf16 %v1252_v30, %v1251_v29  ;;  %v1268_v33 = vld [vmem:[#allocation11 + $0x2a8] sm:$0xff]  ;;  %v1235_v34 = vld [vmem:[#allocation11 + $0x1a0] sm:$0xff]  ;;  %v1253_v37 = vld [vmem:[#allocation11 + $0x230] sm:$0xff]  ;;  %v883_v26 = vadd.s32 24, %v4596_v58  ;;  %s3974_s30 = smov [#allocation14]  }
 0x43e   : > { %3162 = vmatprep.subr.bf16.mxu0 %v3161_v23  ;;  %v1236_v35 = vld [vmem:[#allocation11 + $0x1a8] sm:$0xff]  ;;  %3194 = vmatprep.subr.bf16.mxu1 %v3193_v27  ;;  %v3197_v36 = vpack.c.bf16 %v1268_v33, %v1267_v31  ;;  %v1254_v38 = vld [vmem:[#allocation11 + $0x238] sm:$0xff]  ;;  %v1269_v39 = vld [vmem:[#allocation11 + $0x2b0] sm:$0xff]  ;;  %p3802_p9 = pnand %p3801_p8, %p5186_p2  ;;  %s3804_s28 = sshll.u32 %s3974_s30, 4  ;;  %s3805_s28 = int_to_ptr.vmem [resolvable:$false] %s3804_s28 }
 0x43f   : > { %v1270_v40 = vld [vmem:[#allocation11 + $0x2b8] sm:$0xff]  ;;  %v3167_v41 = vpack.c.bf16 %v1236_v35, %v1235_v34  ;;  %v3169_v42 = vpack.c.bf16 %v1254_v38, %v1253_v37  ;;  %v1237_v43 = vld [vmem:[#allocation11 + $0x1b0] sm:$0xff]  ;;  %v1255_v46 = vld [vmem:[#allocation11 + $0x240] sm:$0xff]  ;;  %v910_v35 = vand.u32 15, %v882_v21  ;;  %v917_v38 = vand.u32 15, %v883_v26  ;;  %s2434_s11 = sshll.u32 %s5183_s20, 3  ;;  %p3807_p6 = scmp.lt.s32.totalorder %s4960_s23, %s3805_s28 }
 0x440   : > { %v1238_v44 = vld [vmem:[#allocation11 + $0x1b8] sm:$0xff]  ;;  %v3201_v45 = vpack.c.bf16 %v1270_v40, %v1269_v39  ;;  %v1256_v47 = vld [vmem:[#allocation11 + $0x248] sm:$0xff]  ;;  %v1271_v49 = vld [vmem:[#allocation11 + $0x2c0] sm:$0xff]  ;;  %v4679_v21 = vadd.s32 48, %v4596_v58  ;;  %s2429_s10 = sshll.u32 %s5184_s21, 5  ;;  %p3803_p7 = pneg %p3802_p9 }
 0x441   : > { %3164 = vmatpush3.bf16.msra.mxu0 %v3163_v28  ;;  %3196 = vmatpush3.bf16.msra.mxu1 %v3193_v27  ;;  %v1272_v50 = vld [vmem:[#allocation11 + $0x2c8] sm:$0xff]  ;;  %v3171_v51 = vpack.c.bf16 %v1238_v44, %v1237_v43  ;;  %v3173_v52 = vpack.c.bf16 %v1256_v47, %v1255_v46  ;;  %v1239_v53 = vld [vmem:[#allocation11 + $0x1c0] sm:$0xff]  ;;  %v1257_v56 = vld [vmem:[#allocation11 + $0x250] sm:$0xff]  ;;  %vm4636_vm2 = vcmp.ne.s32.totalorder %v910_v35, 0  ;;  %vm4647_vm3 = vcmp.ne.s32.totalorder %v917_v38, 15  ;;  %s2163_s9 = sadd.s32 %s2434_s11, %s2429_s10  ;;  %s3806_s0 = scalar_lea.vmem %s3805_s28, 2048 }
 0x442   : > { %3166 = vmatprep.subr.bf16.mxu0 %v3165_v32  ;;  %3198 = vmatprep.subr.bf16.mxu1 %v3197_v36  ;;  %v1240_v54 = vld [vmem:[#allocation11 + $0x1c8] sm:$0xff]  ;;  %v3205_v55 = vpack.c.bf16 %v1272_v50, %v1271_v49  ;;  %v1258_v57 = vld [vmem:[#allocation11 + $0x258] sm:$0xff]  ;;  %v1273_v59 = vld [vmem:[#allocation11 + $0x2d0] sm:$0xff]  ;;  %v885_v50 = vadd.s32 40, %v4596_v58  ;;  %v890_v35 = vadd.s32 80, %v4596_v58  ;;  %s2430_s5 = sshll.u32 %s2163_s9, 7  ;;  %p3808_p13 = scmp.lt.s32.totalorder %s3806_s0, %s3800_s29 }
 0x443   : > { %v1274_v60 = vld [vmem:[#allocation11 + $0x2d8] sm:$0xff]  ;;  %v3175_v61 = vpack.c.bf16 %v1240_v54, %v1239_v53  ;;  %v4598_v62 = vld [vmem:[#allocation2 + $0x10] sm:$0xff]  ;;  %v3177_v0 = vpack.c.bf16 %v1258_v57, %v1257_v56  ;;  %v1259_v6 = vld [vmem:[#allocation11 + $0x260] sm:$0xff]  ;;  %s4958_s25 = scalar_lea.hbm %s5185_s24, %s2430_s5 }
 0x444   : > { %v4600_v63 = vld [vmem:[#allocation2 + $0x18] sm:$0xff]  ;;  %v1241_v1 = vld [vmem:[#allocation11 + $0x1d0] sm:$0xff]  ;;  %v1123_v4 = vrot.slane %v4598_v62, 1  ;;  %v3209_v5 = vpack.c.bf16 %v1274_v60, %v1273_v59  ;;  %v1260_v7 = vld [vmem:[#allocation11 + $0x268] sm:$0xff]  ;;  %1343 = vmatprep.mubr.f32.mxu0 %v4598_v62  ;;  %v1050_v34 = vrot.slane %v4598_v62, 7  ;;  %p3809_p11 = por %p3808_p13, %p3807_p6 }
 0x445   : > { %3168 = vmatpush3.bf16.msra.mxu0 %v3167_v41  ;;  %3200 = vmatpush3.bf16.msra.mxu1 %v3197_v36  ;;  %v1242_v2 = vld [vmem:[#allocation11 + $0x1d8] sm:$0xff]  ;;  %v1124_v3 = vrot.slane %v4600_v63, 1  ;;  %v1275_v8 = vld [vmem:[#allocation11 + $0x2e0] sm:$0xff]  ;;  %v1276_v9 = vld [vmem:[#allocation11 + $0x2e8] sm:$0xff]  ;;  %v3181_v12 = vpack.c.bf16 %v1260_v7, %v1259_v6  ;;  %v1051_v46 = vrot.slane %v4600_v63, 7  ;;  %v887_v6 = vadd.s32 56, %v4596_v58 }
 0x446   : > { %3170 = vmatprep.subr.bf16.mxu0 %v3169_v42  ;;  %3202 = vmatprep.subr.bf16.mxu1 %v3201_v45  ;;  %v3179_v11 = vpack.c.bf16 %v1242_v2, %v1241_v1  ;;  %v1243_v13 = vld [vmem:[#allocation11 + $0x1e0] sm:$0xff]  ;;  %v1244_v14 = vld [vmem:[#allocation11 + $0x1e8] sm:$0xff]  ;;  %v3213_v15 = vpack.c.bf16 %v1276_v9, %v1275_v8  ;;  %v1261_v16 = vld [vmem:[#allocation11 + $0x270] sm:$0xff]  ;;  %p3810_p0 = pnand %p3809_p11, %p3803_p7 }
 0x447   : > { %v4612_v10 = vsel %vm1133_vm0, %v1123_v4, %v1124_v3  ;;  %v1262_v17 = vld [vmem:[#allocation11 + $0x278] sm:$0xff]  ;;  %v1277_v18 = vld [vmem:[#allocation11 + $0x2f0] sm:$0xff]  ;;  %v3183_v20 = vpack.c.bf16 %v1244_v14, %v1243_v13  ;;  %v4616_v25 = vld [vmem:[#allocation2 + $0x8] sm:$0xff] }
 0x448   : > { %2917 = vmatprep.mubr.f32.mxu1 %v4612_v10  ;;  %v1278_v19 = vld [vmem:[#allocation11 + $0x2f8] sm:$0xff]  ;;  %v3185_v22 = vpack.c.bf16 %v1262_v17, %v1261_v16  ;;  %v1245_v23 = vld [vmem:[#allocation11 + $0x1f0] sm:$0xff]  ;;  %v1198_v28 = vld [vmem:[#allocation11 + $0x80] sm:$0xff]  ;;  %v1049_v36 = vrot.slane %v4616_v25, 7 }
 0x449   : > { %3172 = vmatpush3.bf16.msra.mxu0 %v3171_v51  ;;  %3204 = vmatpush3.bf16.msra.mxu1 %v3201_v45  ;;  %v1246_v24 = vld [vmem:[#allocation11 + $0x1f8] sm:$0xff]  ;;  %v3217_v27 = vpack.c.bf16 %v1278_v19, %v1277_v18  ;;  %v1199_v29 = vld [vmem:[#allocation11 + $0x88] sm:$0xff]  ;;  %v4619_v30 = vld [vmem:[#allocation2 + $0x20] sm:$0xff]  ;;  %v884_v45 = vadd.s32 32, %v4596_v58 }
 0x44a   : > { %3174 = vmatprep.subr.bf16.mxu0 %v3173_v52  ;;  %3206 = vmatprep.subr.bf16.mxu1 %v3205_v55  ;;  %v1214_v31 = vld [vmem:[#allocation11 + $0x100] sm:$0xff]  ;;  %v1215_v32 = vld [vmem:[#allocation11 + $0x108] sm:$0xff]  ;;  %v3187_v33 = vpack.c.bf16 %v1246_v24, %v1245_v23  ;;  %v3221_v37 = vpack.c.bf16 %v1199_v29, %v1198_v28  ;;  %v1125_v39 = vrot.slane %v4619_v30, 1  ;;  %v1200_v43 = vld [vmem:[#allocation11 + $0x90] sm:$0xff]  ;;  %v4634_v51 = vsel %vm1060_vm1, %v1049_v36, %v1050_v34 }
 0x44b   : > { %v1182_v40 = vld [vmem:[#allocation11] sm:$0xff]  ;;  %v1183_v41 = vld [vmem:[#allocation11 + $0x8] sm:$0xff]  ;;  %v3253_v42 = vpack.c.bf16 %v1215_v32, %v1214_v31  ;;  %v1201_v44 = vld [vmem:[#allocation11 + $0x98] sm:$0xff]  ;;  %v1052_v14 = vrot.slane %v4619_v30, 7  ;;  %v945_v28 = vand.u32 15, %v887_v6  ;;  %v889_v29 = vadd.s32 72, %v4596_v58 }
 0x44c   : > { %v1216_v47 = vld [vmem:[#allocation11 + $0x110] sm:$0xff]  ;;  %v1217_v48 = vld [vmem:[#allocation11 + $0x118] sm:$0xff]  ;;  %v4627_v49 = vld [vmem:[#allocation2 + $0x28] sm:$0xff]  ;;  %v3223_v53 = vpack.c.bf16 %v1183_v41, %v1182_v40  ;;  %v3225_v60 = vpack.c.bf16 %v1201_v44, %v1200_v43 }
 0x44d   : > { %3176 = vmatpush3.bf16.msra.mxu0 %v3175_v61  ;;  %3208 = vmatpush3.bf16.msra.mxu1 %v3205_v55  ;;  %v1126_v54 = vrot.slane %v4627_v49, 1  ;;  %v4645_v55 = vsel %vm1133_vm0, %v1124_v3, %v1125_v39  ;;  %v1184_v57 = vld [vmem:[#allocation11 + $0x10] sm:$0xff]  ;;  %v1185_v59 = vld [vmem:[#allocation11 + $0x18] sm:$0xff]  ;;  %v3257_v61 = vpack.c.bf16 %v1217_v48, %v1216_v47  ;;  %v1202_v1 = vld [vmem:[#allocation11 + $0xa0] sm:$0xff]  ;;  %v4661_v3 = vsel %vm1060_vm1, %v1050_v34, %v1051_v46 }
 0x44e   : > { %3178 = vmatprep.subr.bf16.mxu0 %v3177_v0  ;;  %3210 = vmatprep.subr.bf16.mxu1 %v3209_v5  ;;  %v924_v0 = vand.u32 15, %v884_v45  ;;  %v1203_v2 = vld [vmem:[#allocation11 + $0xa8] sm:$0xff]  ;;  %v1218_v7 = vld [vmem:[#allocation11 + $0x120] sm:$0xff]  ;;  %v4663_v9 = vld [vmem:[#allocation2 + $0x38] sm:$0xff]  ;;  %v3227_v13 = vpack.c.bf16 %v1185_v59, %v1184_v57  ;;  %v1053_v31 = vrot.slane %v4627_v49, 7  ;;  %v4705_v38 = vsel %vm1060_vm1, %v1051_v46, %v1052_v14 }
 0x44f   : > { %v1219_v8 = vld [vmem:[#allocation11 + $0x128] sm:$0xff]  ;;  %v4674_v16 = vld [vmem:[#allocation2 + $0x40] sm:$0xff]  ;;  %v1128_v17 = vrot.slane %v4663_v9, 1  ;;  %v3229_v18 = vpack.c.bf16 %v1203_v2, %v1202_v1  ;;  %v1204_v26 = vld [vmem:[#allocation11 + $0xb0] sm:$0xff]  ;;  %v938_v46 = vand.u32 15, %v4679_v21  ;;  %vm4720_vm6 = vcmp.ne.s32.totalorder %v945_v28, 15 }
 0x450   : > { %v1186_v19 = vld [vmem:[#allocation11 + $0x20] sm:$0xff]  ;;  %vm4683_vm4 = vcmp.ne.s32.totalorder %v924_v0, 0  ;;  %v3261_v24 = vpack.c.bf16 %v1219_v8, %v1218_v7  ;;  %v1220_v32 = vld [vmem:[#allocation11 + $0x130] sm:$0xff]  ;;  %v1189_v45 = vld [vmem:[#allocation11 + $0x38] sm:$0xff]  ;;  %v959_v57 = vand.u32 15, %v889_v29  ;;  %v4731_v59 = vsel %vm1060_vm1, %v1052_v14, %v1053_v31 }
 0x451   : > { %3180 = vmatpush3.bf16.msra.mxu0 %v3179_v11  ;;  %3212 = vmatpush3.bf16.msra.mxu1 %v3209_v5  ;;  %v4651_v5 = vld [vmem:[#allocation2 + $0x30] sm:$0xff]  ;;  %v931_v11 = vand.u32 15, %v885_v50  ;;  %v4714_v47 = vld [vmem:[#allocation2] sm:$0xff]  ;;  %v1122_v2 = vrot.slane %v4616_v25, 1  ;;  %v1191_v14 = vld [vmem:[#allocation11 + $0x48] sm:$0xff]  ;;  %vm4751_vm7 = vcmp.ne.s32.totalorder %v938_v46, 0 }
 0x452   : > { %3182 = vmatprep.subr.bf16.mxu0 %v3181_v12  ;;  %3214 = vmatprep.subr.bf16.mxu1 %v3213_v15  ;;  %v1127_v12 = vrot.slane %v4651_v5, 1  ;;  %v1188_v44 = vld [vmem:[#allocation11 + $0x30] sm:$0xff]  ;;  %v1206_v50 = vld [vmem:[#allocation11 + $0xc0] sm:$0xff]  ;;  %v1054_v7 = vrot.slane %v4651_v5, 7  ;;  %vm4763_vm8 = vcmp.ne.s32.totalorder %v959_v57, 15  ;;  %v1056_v57 = vrot.slane %v4674_v16, 7 }
 0x453   : > { %vm4695_vm5 = vcmp.ne.s32.totalorder %v931_v11, 15  ;;  %v3235_v6 = vpack.c.bf16 %v1189_v45, %v1188_v44  ;;  %v5081_v11 = vrot.slane %v4714_v47, 1  ;;  %v1224_v21 = vld [vmem:[#allocation11 + $0x150] sm:$0xff]  ;;  %v1210_v45 = vld [vmem:[#allocation11 + $0xe0] sm:$0xff]  ;;  %v1743_v52 = vld [vmem:[#allocation11 + $0x458] sm:$0xff] }
 0x454   : > { %v4693_v34 = vsel %vm1133_vm0, %v1126_v54, %v1127_v12  ;;  %v4709_v40 = vsel %vm1133_vm0, %v1127_v12, %v1128_v17  ;;  %v4772_v29 = vsel %vm1060_vm1, %v1053_v31, %v1054_v7  ;;  %v1211_v31 = vld [vmem:[#allocation11 + $0xe8] sm:$0xff]  ;;  %v1226_v46 = vld [vmem:[#allocation11 + $0x160] sm:$0xff]  ;;  %v1996_v28 = vld [vmem:[#allocation12 + $0x38] sm:$0xff] }
 0x455   : > { %3184 = vmatpush3.bf16.msra.mxu0 %v3183_v20  ;;  %3216 = vmatpush3.bf16.msra.mxu1 %v3213_v15  ;;  %v4672_v15 = vsel %vm1133_vm0, %v1125_v39, %v1126_v54  ;;  %v1187_v20 = vld [vmem:[#allocation11 + $0x28] sm:$0xff] }
 0x456   : > { %3186 = vmatprep.subr.bf16.mxu0 %v3185_v22  ;;  %3218 = vmatprep.subr.bf16.mxu1 %v3217_v27  ;;  %v4681_v22 = vld [vmem:[#allocation2 + $0x48] sm:$0xff]  ;;  %v3231_v39 = vpack.c.bf16 %v1187_v20, %v1186_v19  ;;  %v1209_v19 = vld [vmem:[#allocation11 + $0xd8] sm:$0xff] }
 0x457   : > { %v1130_v41 = vrot.slane %v4681_v22, 1  ;;  %v1990_v54 = vld [vmem:[#allocation12 + $0x8] sm:$0xff] }
 0x458   : > { %v1994_v20 = vld [vmem:[#allocation12 + $0x28] sm:$0xff] }
 0x459   : > { %3188 = vmatpush3.bf16.msra.mxu0 %v3187_v33  ;;  %3220 = vmatpush3.bf16.msra.mxu1 %v3217_v27  ;;  %v1205_v27 = vld [vmem:[#allocation11 + $0xb8] sm:$0xff] }
 0x45a   : > { %3222 = vmatprep.subr.bf16.mxu0 %v3221_v37  ;;  %3254 = vmatprep.subr.bf16.mxu1 %v3253_v42  ;;  %v1221_v33 = vld [vmem:[#allocation11 + $0x138] sm:$0xff]  ;;  %v1129_v37 = vrot.slane %v4674_v16, 1  ;;  %v3233_v43 = vpack.c.bf16 %v1205_v27, %v1204_v26  ;;  %v888_v26 = vadd.s32 64, %v4596_v58 }
 0x45b   : > { %v3265_v48 = vpack.c.bf16 %v1221_v33, %v1220_v32  ;;  %v1055_v33 = vrot.slane %v4663_v9, 7 }
 0x45c   : > { %2377 = vmatmul.mubr.msk.f32.vlgmr.msra.gmra.mrb[0].mxu0 %vm4636_vm2, %v4634_v51  ;;  %2918 = vmatmul.mubr.msk.f32.vlgmr.msra.gmra.mrb[0].mxu1 %vm4647_vm3, %v4645_v55  ;;  %v4736_v0 = vsel %vm1133_vm0, %v1128_v17, %v1129_v37  ;;  %v4744_v8 = vsel %vm1133_vm0, %v1129_v37, %v1130_v41  ;;  %v1144_v37 = vsel %vm1133_vm0, %v5081_v11, %v1122_v2  ;;  %v1719_v11 = vld [vmem:[#allocation11 + $0x398] sm:$0xff] }
 0x45d   : > { %3224 = vmatpush3.bf16.msra.mxu0 %v3223_v53  ;;  %3256 = vmatpush3.bf16.msra.mxu1 %v3253_v42  ;;  %v4712_v42 = vld [vmem:[#allocation2 + $0x50] sm:$0xff]  ;;  %v1207_v53 = vld [vmem:[#allocation11 + $0xc8] sm:$0xff] }
 0x45e   : > { %1348 = vmatprep.mubr.f32.mxu0 %v4600_v63  ;;  %3226 = vmatprep.subr.bf16.mxu0 %v3225_v60  ;;  %v1222_v60 = vld [vmem:[#allocation11 + $0x140] sm:$0xff]  ;;  %v5082_v1 = vrot.slane %v4712_v42, 1  ;;  %v3237_v12 = vpack.c.bf16 %v1207_v53, %v1206_v50  ;;  %v1227_v50 = vld [vmem:[#allocation11 + $0x168] sm:$0xff]  ;;  %v5179_v23 = vrot.slane %v4712_v42, 1 }
 0x45f   : > { %3258 = vmatprep.subr.bf16.mxu1 %v3257_v61  ;;  %2920 = vmatprep.mubr.f32.mxu1 %v4672_v15 }
 0x460   : > { %1349 = vmatmul.mubr.f32.gmra.mrb[2].mxu0 %v4661_v3  ;;  %2921 = vmatmul.mubr.msk.f32.gmra.mrb[2].mxu1 %vm4695_vm5, %v4693_v34  ;;  %v4761_v27 = vsel %vm1133_vm0, %v1130_v41, %v5082_v1  ;;  %v1192_v41 = vld [vmem:[#allocation11 + $0x50] sm:$0xff] }
 0x461   : > { %3228 = vmatpush3.bf16.msra.mxu0 %v3227_v13  ;;  %1353 = vmatprep.mubr.f32.mxu0 %v4619_v30  ;;  %v1190_v13 = vld [vmem:[#allocation11 + $0x40] sm:$0xff]  ;;  %v1734_v1 = vld [vmem:[#allocation11 + $0x410] sm:$0xff] }
 0x462   : > { %3260 = vmatpush3.bf16.msra.mxu1 %v3257_v61  ;;  %3230 = vmatprep.subr.bf16.mxu0 %v3229_v18  ;;  %v1223_v61 = vld [vmem:[#allocation11 + $0x148] sm:$0xff]  ;;  %v1208_v18 = vld [vmem:[#allocation11 + $0xd0] sm:$0xff]  ;;  %v3239_v32 = vpack.c.bf16 %v1191_v14, %v1190_v13  ;;  %v3277_v13 = vpack.c.bf16 %v1227_v50, %v1226_v46  ;;  %v896_v46 = vand.u32 15, %v4596_v58  ;;  %v1732_v50 = vld [vmem:[#allocation11 + $0x400] sm:$0xff] }
 0x463   : > { %3262 = vmatprep.subr.bf16.mxu1 %v3261_v24  ;;  %2923 = vmatprep.mubr.f32.mxu1 %v4709_v40  ;;  %v3269_v17 = vpack.c.bf16 %v1223_v61, %v1222_v60  ;;  %v952_v60 = vand.u32 15, %v888_v26  ;;  %v3245_v61 = vpack.c.bf16 %v1211_v31, %v1210_v45  ;;  %v1212_v14 = vld [vmem:[#allocation11 + $0xf0] sm:$0xff]  ;;  %v1057_v26 = vrot.slane %v4681_v22, 7  ;;  %v1717_v31 = vld [vmem:[#allocation11 + $0x388] sm:$0xff] }
 0x464   : > { %2379 = vmatmul.mubr.msk.f32.gmra.mrb[4].mxu0 %vm4683_vm4, %v4705_v38  ;;  %2924 = vmatmul.mubr.msk.f32.gmra.mrb[4].mxu1 %vm4720_vm6, %v4736_v0  ;;  %vm2435_vm10 = vcmp.ne.s32.totalorder %v896_v46, 0  ;;  %v1736_v46 = vld [vmem:[#allocation11 + $0x420] sm:$0xff] }
 0x465   : > { %3232 = vmatpush3.bf16.msra.mxu0 %v3231_v39  ;;  %1358 = vmatprep.mubr.f32.mxu0 %v4627_v49  ;;  %v3241_v39 = vpack.c.bf16 %v1209_v19, %v1208_v18  ;;  %v1213_v18 = vld [vmem:[#allocation11 + $0xf8] sm:$0xff]  ;;  %v1228_v19 = vld [vmem:[#allocation11 + $0x170] sm:$0xff]  ;;  %vm4799_vm9 = vcmp.ne.s32.totalorder %v952_v60, 0 }
 0x466   : > { %3264 = vmatpush3.bf16.msra.mxu1 %v3261_v24  ;;  %3234 = vmatprep.subr.bf16.mxu0 %v3233_v43  ;;  %v1225_v24 = vld [vmem:[#allocation11 + $0x158] sm:$0xff] }
 0x467   : > { %3266 = vmatprep.subr.bf16.mxu1 %v3265_v48  ;;  %2926 = vmatprep.mubr.f32.mxu1 %v4744_v8  ;;  %v1193_v43 = vld [vmem:[#allocation11 + $0x58] sm:$0xff]  ;;  %v3273_v44 = vpack.c.bf16 %v1225_v24, %v1224_v21 }
 0x468   : > { %1359 = vmatmul.mubr.f32.gmra.mrb[6].mxu0 %v4731_v59  ;;  %2927 = vmatmul.mubr.msk.f32.gmra.mrb[6].mxu1 %vm4763_vm8, %v4761_v27  ;;  %v3243_v53 = vpack.c.bf16 %v1193_v43, %v1192_v41  ;;  %v1229_v21 = vld [vmem:[#allocation11 + $0x178] sm:$0xff]  ;;  %v881_v43 = vadd.s32 8, %v4596_v58 }
 0x469   : > { %3236 = vmatpush3.bf16.msra.mxu0 %v3235_v6  ;;  %1363 = vmatprep.mubr.f32.mxu0 %v4651_v5  ;;  %v1194_v6 = vld [vmem:[#allocation11 + $0x60] sm:$0xff]  ;;  %v4804_v41 = vld [vmem:[#allocation2 + $0x58] sm:$0xff]  ;;  %v3281_v45 = vpack.c.bf16 %v1229_v21, %v1228_v19  ;;  %v1701_v19 = vld [vmem:[#allocation11 + $0x308] sm:$0xff] }
 0x46a   : > { %3268 = vmatpush3.bf16.msra.mxu1 %v3265_v48  ;;  %3238 = vmatprep.subr.bf16.mxu0 %v3237_v12  ;;  %v4790_v48 = vsel %vm1060_vm1, %v1054_v7, %v1055_v33  ;;  %v1195_v12 = vld [vmem:[#allocation11 + $0x68] sm:$0xff]  ;;  %v4797_v7 = vsel %vm1060_vm1, %v1055_v33, %v1056_v57  ;;  %v1716_v33 = vld [vmem:[#allocation11 + $0x380] sm:$0xff] }
 0x46b   : > { %3270 = vmatprep.subr.bf16.mxu1 %v3269_v17  ;;  %2961 = vmatprep.mubr.f32.mxu1 %v1144_v37  ;;  %v3247_v24 = vpack.c.bf16 %v1195_v12, %v1194_v6  ;;  %v1196_v37 = vld [vmem:[#allocation11 + $0x70] sm:$0xff]  ;;  %v1059_v6 = vrot.slane %v4804_v41, 7  ;;  %v3285_v12 = vpack.c.bf16 %v1717_v31, %v1716_v33 }
 0x46c   : > { %2381 = vmatmul.mubr.msk.f32.gmra.mrb[8].mxu0 %vm4751_vm7, %v4772_v29 }
 0x46d   : > { %3240 = vmatpush3.bf16.msra.mxu0 %v3239_v32  ;;  %1368 = vmatprep.mubr.f32.mxu0 %v4663_v9  ;;  %v3249_v32 = vpack.c.bf16 %v1213_v18, %v1212_v14  ;;  %v903_v14 = vand.u32 15, %v881_v43  ;;  %v1700_v18 = vld [vmem:[#allocation11 + $0x300] sm:$0xff]  ;;  %v1703_v43 = vld [vmem:[#allocation11 + $0x318] sm:$0xff] }
 0x46e   : > { %3272 = vmatpush3.bf16.msra.mxu1 %v3269_v17  ;;  %3242 = vmatprep.subr.bf16.mxu0 %v3241_v39  ;;  %v1197_v39 = vld [vmem:[#allocation11 + $0x78] sm:$0xff] }
 0x46f   : > { %3274 = vmatprep.subr.bf16.mxu1 %v3273_v44  ;;  %v3251_v60 = vpack.c.bf16 %v1197_v39, %v1196_v37  ;;  %v1143_v37 = vsel %vm1133_vm0, %v1122_v2, %v1123_v4  ;;  %vm2436_vm11 = vcmp.ne.s32.totalorder %v903_v14, 15  ;;  %v1702_v39 = vld [vmem:[#allocation11 + $0x310] sm:$0xff]  ;;  %v1704_v2 = vld [vmem:[#allocation11 + $0x320] sm:$0xff] }
 0x470   : > { %1369 = vmatmul.mubr.f32.gmra.mrb[10].mxu0 %v4790_v48  ;;  %v1722_v14 = vld [vmem:[#allocation11 + $0x3b0] sm:$0xff] }
 0x471   : > { %3244 = vmatpush3.bf16.msra.mxu0 %v3243_v53  ;;  %1373 = vmatprep.mubr.f32.mxu0 %v4674_v16  ;;  %v4816_v53 = vsel %vm1060_vm1, %v1056_v57, %v1057_v26  ;;  %v1735_v57 = vld [vmem:[#allocation11 + $0x418] sm:$0xff] }
 0x472   : > { %3276 = vmatpush3.bf16.msra.mxu1 %v3273_v44  ;;  %3246 = vmatprep.subr.bf16.mxu0 %v3245_v61  ;;  %v1733_v44 = vld [vmem:[#allocation11 + $0x408] sm:$0xff]  ;;  %v1048_v61 = vrot.slane %v4714_v47, 7  ;;  %v3321_v31 = vpack.c.bf16 %v1735_v57, %v1734_v1 }
 0x473   : > { %3278 = vmatprep.subr.bf16.mxu1 %v3277_v13  ;;  %v3317_v21 = vpack.c.bf16 %v1733_v44, %v1732_v50  ;;  %v1720_v50 = vld [vmem:[#allocation11 + $0x3a0] sm:$0xff]  ;;  %v1721_v44 = vld [vmem:[#allocation11 + $0x3a8] sm:$0xff] }
 0x474   : > { %2383 = vmatmul.mubr.msk.f32.gmra.mrb[12].mxu0 %vm4799_vm9, %v4797_v7  ;;  %v3293_v4 = vpack.c.bf16 %v1721_v44, %v1720_v50  ;;  %v1710_v44 = vld [vmem:[#allocation11 + $0x350] sm:$0xff] }
 0x475   : > { %3248 = vmatpush3.bf16.msra.mxu0 %v3247_v24  ;;  %1378 = vmatprep.mubr.f32.mxu0 %v4681_v22  ;;  %v1718_v24 = vld [vmem:[#allocation11 + $0x390] sm:$0xff] }
 0x476   : > { %3280 = vmatpush3.bf16.msra.mxu1 %v3277_v13  ;;  %3250 = vmatprep.subr.bf16.mxu0 %v3249_v32  ;;  %v1072_v13 = vsel %vm1060_vm1, %v1059_v6, %v1048_v61  ;;  %v3287_v32 = vpack.c.bf16 %v1701_v19, %v1700_v18  ;;  %v3289_v33 = vpack.c.bf16 %v1719_v11, %v1718_v24  ;;  %v1705_v11 = vld [vmem:[#allocation11 + $0x328] sm:$0xff]  ;;  %v1723_v18 = vld [vmem:[#allocation11 + $0x3b8] sm:$0xff]  ;;  %v1738_v19 = vld [vmem:[#allocation11 + $0x430] sm:$0xff] }
 0x477   : > { %3282 = vmatprep.subr.bf16.mxu1 %v3281_v45  ;;  %v1739_v24 = vld [vmem:[#allocation11 + $0x438] sm:$0xff] }
 0x478   : > { %1379 = vmatmul.mubr.f32.gmra.mrb[14].mxu0 %v4816_v53  ;;  %v3329_v57 = vpack.c.bf16 %v1739_v24, %v1738_v19  ;;  %v1730_v19 = vld [vmem:[#allocation11 + $0x3f0] sm:$0xff]  ;;  %v1731_v24 = vld [vmem:[#allocation11 + $0x3f8] sm:$0xff] }
 0x479   : > { %3252 = vmatpush3.bf16.msra.mxu0 %v3251_v60  ;;  %1553 = vmatprep.mubr.f32.mxu0 %v4714_v47  ;;  %v1737_v60 = vld [vmem:[#allocation11 + $0x428] sm:$0xff] }
 0x47a   : > { %3284 = vmatpush3.bf16.msra.mxu1 %v3281_v45  ;;  %3286 = vmatprep.subr.bf16.mxu0 %v3285_v12  ;;  %v1071_v45 = vsel %vm1060_vm1, %v1048_v61, %v1049_v36  ;;  %v3291_v12 = vpack.c.bf16 %v1703_v43, %v1702_v39  ;;  %v3325_v1 = vpack.c.bf16 %v1737_v60, %v1736_v46  ;;  %v1706_v61 = vld [vmem:[#allocation11 + $0x330] sm:$0xff]  ;;  %v1708_v43 = vld [vmem:[#allocation11 + $0x340] sm:$0xff]  ;;  %v1711_v46 = vld [vmem:[#allocation11 + $0x358] sm:$0xff] }
 0x47b   : > { %3318 = vmatprep.subr.bf16.mxu1 %v3317_v21  ;;  %v3295_v36 = vpack.c.bf16 %v1705_v11, %v1704_v2  ;;  %v3307_v2 = vpack.c.bf16 %v1711_v46, %v1710_v44 }
 0x47c   : > { %2393 = vmatmul.mubr.msk.f32.vlgmr.msra.gmra.mrb[16].mxu0 %vm2435_vm10, %v1072_v13  ;;  %v1724_v13 = vld [vmem:[#allocation11 + $0x3c0] sm:$0xff] }
 0x47d   : > { %2962 = vmatmul.mubr.msk.f32.vlgmr.msra.gmra.mrb[0].mxu1 %vm2436_vm11, %v1143_v37  ;;  %3288 = vmatpush3.bf16.msra.mxu0 %v3287_v32  ;;  %v1725_v32 = vld [vmem:[#allocation11 + $0x3c8] sm:$0xff] }
 0x47e   : > { %3320 = vmatpush3.bf16.msra.mxu1 %v3317_v21  ;;  %1558 = vmatprep.mubr.f32.mxu0 %v4616_v25  ;;  %v3297_v25 = vpack.c.bf16 %v1723_v18, %v1722_v14  ;;  %v1707_v21 = vld [vmem:[#allocation11 + $0x338] sm:$0xff]  ;;  %v3301_v39 = vpack.c.bf16 %v1725_v32, %v1724_v13  ;;  %v1713_v14 = vld [vmem:[#allocation11 + $0x368] sm:$0xff] }
 0x47f   : > { %3290 = vmatprep.subr.bf16.mxu0 %v3289_v33  ;;  %3322 = vmatprep.subr.bf16.mxu1 %v3321_v31  ;;  %v3299_v37 = vpack.c.bf16 %v1707_v21, %v1706_v61  ;;  %v1709_v33 = vld [vmem:[#allocation11 + $0x348] sm:$0xff]  ;;  %v3313_v61 = vpack.c.bf16 %v1731_v24, %v1730_v19  ;;  %v1714_v21 = vld [vmem:[#allocation11 + $0x370] sm:$0xff] }
 0x480   : > { %1559 = vmatmul.mubr.f32.gmra.mrb[18].mxu0 %v1071_v45  ;;  %2964 = vmatprep.mubr.f32.mxu1 %v4612_v10  ;;  %v1740_v10 = vld [vmem:[#allocation11 + $0x440] sm:$0xff] }
 0x481   : > { %3292 = vmatpush3.bf16.msra.mxu0 %v3291_v12  ;;  %1563 = vmatprep.mubr.f32.mxu0 %v4598_v62  ;;  %v1741_v62 = vld [vmem:[#allocation11 + $0x448] sm:$0xff]  ;;  %v1728_v45 = vld [vmem:[#allocation11 + $0x3e0] sm:$0xff] }
 0x482   : > { %3324 = vmatpush3.bf16.msra.mxu1 %v3321_v31  ;;  %3294 = vmatprep.subr.bf16.mxu0 %v3293_v4  ;;  %v3333_v56 = vpack.c.bf16 %v1741_v62, %v1740_v10  ;;  %v1727_v31 = vld [vmem:[#allocation11 + $0x3d8] sm:$0xff]  ;;  %v1729_v12 = vld [vmem:[#allocation11 + $0x3e8] sm:$0xff]  ;;  %v891_v10 = vadd.s32 88, %v4596_v58  ;;  %v1132_v62 = vrot.slane %v4804_v41, 1  ;;  %v1995_v58 = vld [vmem:[#allocation12 + $0x30] sm:$0xff] }
 0x483   : > { %3326 = vmatprep.subr.bf16.mxu1 %v3325_v1  ;;  %2965 = vmatmul.mubr.msk.f32.gmra.mrb[2].mxu1 %vm4647_vm3, %v4645_v55  ;;  %v1726_v55 = vld [vmem:[#allocation11 + $0x3d0] sm:$0xff]  ;;  %v1745_v4 = vld [vmem:[#allocation11 + $0x468] sm:$0xff]  ;;  %v3309_v11 = vpack.c.bf16 %v1729_v12, %v1728_v45 }
 0x484   : > { %2395 = vmatmul.mubr.msk.f32.gmra.mrb[20].mxu0 %vm4636_vm2, %v4634_v51  ;;  %2967 = vmatprep.mubr.f32.mxu1 %v4672_v15  ;;  %v1742_v51 = vld [vmem:[#allocation11 + $0x450] sm:$0xff]  ;;  %v3305_v50 = vpack.c.bf16 %v1727_v31, %v1726_v55 }
 0x485   : > { %3296 = vmatpush3.bf16.msra.mxu0 %v3295_v36  ;;  %1568 = vmatprep.mubr.f32.mxu0 %v4600_v63  ;;  %v3303_v63 = vpack.c.bf16 %v1709_v33, %v1708_v43  ;;  %v3337_v60 = vpack.c.bf16 %v1743_v52, %v1742_v51  ;;  %v1746_v36 = vld [vmem:[#allocation11 + $0x470] sm:$0xff]  ;;  %v2004_v33 = vld [vmem:[#allocation12 + $0x78] sm:$0xff] }
 0x486   : > { %3328 = vmatpush3.bf16.msra.mxu1 %v3325_v1  ;;  %3298 = vmatprep.subr.bf16.mxu0 %v3297_v25  ;;  %v1712_v1 = vld [vmem:[#allocation11 + $0x360] sm:$0xff]  ;;  %v1747_v25 = vld [vmem:[#allocation11 + $0x478] sm:$0xff]  ;;  %v2003_v43 = vld [vmem:[#allocation12 + $0x70] sm:$0xff] }
 0x487   : > { %3330 = vmatprep.subr.bf16.mxu1 %v3329_v57  ;;  %2968 = vmatmul.mubr.msk.f32.gmra.mrb[4].mxu1 %vm4695_vm5, %v4693_v34  ;;  %v3345_v13 = vpack.c.bf16 %v1747_v25, %v1746_v36 }
 0x488   : > { %1569 = vmatmul.mubr.f32.gmra.mrb[22].mxu0 %v4661_v3  ;;  %2970 = vmatprep.mubr.f32.mxu1 %v4709_v40  ;;  %v1744_v3 = vld [vmem:[#allocation11 + $0x460] sm:$0xff] }
 0x489   : > { %3300 = vmatpush3.bf16.msra.mxu0 %v3299_v37  ;;  %1573 = vmatprep.mubr.f32.mxu0 %v4619_v30  ;;  %v3341_v18 = vpack.c.bf16 %v1745_v4, %v1744_v3  ;;  %v2002_v37 = vld [vmem:[#allocation12 + $0x68] sm:$0xff] }
 0x48a   : > { %3332 = vmatpush3.bf16.msra.mxu1 %v3329_v57  ;;  %3302 = vmatprep.subr.bf16.mxu0 %v3301_v39  ;;  %v1715_v57 = vld [vmem:[#allocation11 + $0x378] sm:$0xff] }
 0x48b   : > { %3334 = vmatprep.subr.bf16.mxu1 %v3333_v56  ;;  %2971 = vmatmul.mubr.msk.f32.gmra.mrb[6].mxu1 %vm4720_vm6, %v4736_v0  ;;  %v3315_v32 = vpack.c.bf16 %v1715_v57, %v1714_v21 }
 0x48c   : > { %2397 = vmatmul.mubr.msk.f32.gmra.mrb[24].mxu0 %vm4683_vm4, %v4705_v38  ;;  %3005 = vmatprep.mubr.f32.mxu1 %v4672_v15  ;;  %v3311_v15 = vpack.c.bf16 %v1713_v14, %v1712_v1 }
 0x48d   : > { %3304 = vmatpush3.bf16.msra.mxu0 %v3303_v63  ;;  %1578 = vmatprep.mubr.f32.mxu0 %v4627_v49 }
 0x48e   : > { %3336 = vmatpush3.bf16.msra.mxu1 %v3333_v56  ;;  %3306 = vmatprep.subr.bf16.mxu0 %v3305_v50  ;;  %v3377_v56 = vpack.c.bf16 %v2004_v33, %v2003_v43 }
 0x48f   : > { %3338 = vmatprep.subr.bf16.mxu1 %v3337_v60 }
 0x490   : > { %1579 = vmatmul.mubr.f32.gmra.mrb[26].mxu0 %v4731_v59 }
 0x491   : > { %3308 = vmatpush3.bf16.msra.mxu0 %v3307_v2  ;;  %1583 = vmatprep.mubr.f32.mxu0 %v4651_v5 }
 0x492   : > { %3340 = vmatpush3.bf16.msra.mxu1 %v3337_v60  ;;  %3310 = vmatprep.subr.bf16.mxu0 %v3309_v11 }
 0x493   : > { %3342 = vmatprep.subr.bf16.mxu1 %v3341_v18 }
 0x494   : > { %2399 = vmatmul.mubr.msk.f32.gmra.mrb[28].mxu0 %vm4751_vm7, %v4772_v29 }
 0x495   : > { %3312 = vmatpush3.bf16.msra.mxu0 %v3311_v15  ;;  %1588 = vmatprep.mubr.f32.mxu0 %v4663_v9 }
 0x496   : > { %3344 = vmatpush3.bf16.msra.mxu1 %v3341_v18  ;;  %3314 = vmatprep.subr.bf16.mxu0 %v3313_v61 }
 0x497   : > { %3346 = vmatprep.subr.bf16.mxu1 %v3345_v13 }
 0x498   : > { %1589 = vmatmul.mubr.f32.gmra.mrb[30].mxu0 %v4790_v48 }
 0x499   : > { %3316 = vmatpush3.bf16.msra.mxu0 %v3315_v32  ;;  %1812 = vmatprep.mubr.f32.mxu0 %v4619_v30  ;;  %v973_v30 = vand.u32 15, %v891_v10 }
 0x49a   : > { %3348 = vmatpush3.bf16.msra.mxu1 %v3345_v13 }
 0x49b   : > { %vm2438_vm12 = vcmp.ne.s32.totalorder %v973_v30, 15 }
 0x49c   : > { %2409 = vmatmul.mubr.msk.f32.vlgmr.msra.gmra.mrb[32].mxu0 %vm4683_vm4, %v4705_v38  ;;  %v1058_v38 = vrot.slane %v4712_v42, 7 }
 0x49d   : > { %3006 = vmatmul.mubr.msk.f32.vlgmr.msra.gmra.mrb[0].mxu1 %vm4695_vm5, %v4693_v34  ;;  %1817 = vmatprep.mubr.f32.mxu0 %v4627_v49  ;;  %v1134_v49 = vsel %vm1133_vm0, %v5179_v23, %v1132_v62 }
 0x49e   : > { %3008 = vmatprep.mubr.f32.mxu1 %v4709_v40  ;;  %v1061_v40 = vsel %vm1060_vm1, %v1058_v38, %v1059_v6  ;;  %v2001_v6 = vld [vmem:[#allocation12 + $0x60] sm:$0xff] }
 0x49f   : > { %v3373_v39 = vpack.c.bf16 %v2002_v37, %v2001_v6 }
 0x4a0   : > { %1818 = vmatmul.mubr.f32.gmra.mrb[34].mxu0 %v4731_v59 }
 0x4a1   : > { %3009 = vmatmul.mubr.msk.f32.gmra.mrb[2].mxu1 %vm4720_vm6, %v4736_v0  ;;  %1822 = vmatprep.mubr.f32.mxu0 %v4651_v5  ;;  %v5180_v5 = vrot.slane %v4714_v47, 1  ;;  %v1989_v47 = vld [vmem:[#allocation12] sm:$0xff] }
 0x4a2   : > { %3011 = vmatprep.mubr.f32.mxu1 %v4744_v8  ;;  %v3349_v59 = vpack.c.bf16 %v1990_v54, %v1989_v47  ;;  %v1993_v8 = vld [vmem:[#allocation12 + $0x20] sm:$0xff] }
 0x4a3   : > { %v1145_v34 = vsel %vm1133_vm0, %v1132_v62, %v5180_v5 }
 0x4a4   : > { %2411 = vmatmul.mubr.msk.f32.gmra.mrb[36].mxu0 %vm4751_vm7, %v4772_v29  ;;  %3350 = vmatprep.subr.bf16.mxu0 %v3349_v59  ;;  %v3361_v29 = vpack.c.bf16 %v1996_v28, %v1995_v58 }
 0x4a5   : > { %3012 = vmatmul.mubr.msk.f32.gmra.mrb[4].mxu1 %vm4763_vm8, %v4761_v27  ;;  %1827 = vmatprep.mubr.f32.mxu0 %v4663_v9  ;;  %v966_v9 = vand.u32 15, %v890_v35  ;;  %v3357_v27 = vpack.c.bf16 %v1994_v20, %v1993_v8 }
 0x4a6   : > { %3014 = vmatprep.mubr.f32.mxu1 %v1134_v49  ;;  %3397 = vmatprep.subr.bf16.mxu1 %v3349_v59 }
 0x4a7   : > { %vm2437_vm13 = vcmp.ne.s32.totalorder %v966_v9, 0  ;;  %3352 = vmatpush3.bf16.msra.mxu0 %v3349_v59  ;;  %3405 = vmatpush3.bf16.msra.mxu1 %v3349_v59 }
 0x4a8   : > { %1828 = vmatmul.mubr.f32.gmra.mrb[38].mxu0 %v4790_v48  ;;  %v1997_v48 = vld [vmem:[#allocation12 + $0x40] sm:$0xff] }
 0x4a9   : > { %3015 = vmatmul.mubr.msk.f32.gmra.mrb[6].mxu1 %vm2438_vm12, %v1145_v34  ;;  %1832 = vmatprep.mubr.f32.mxu0 %v4674_v16  ;;  %v1062_v16 = vsel %vm1060_vm1, %v1057_v26, %v1058_v38  ;;  %v1999_v26 = vld [vmem:[#allocation12 + $0x50] sm:$0xff] }
 0x4ac   : > { %2413 = vmatmul.mubr.msk.f32.gmra.mrb[40].mxu0 %vm4799_vm9, %v4797_v7  ;;  %v1998_v7 = vld [vmem:[#allocation12 + $0x48] sm:$0xff] }
 0x4ad   : > { %1837 = vmatprep.mubr.f32.mxu0 %v4681_v22  ;;  %v1991_v22 = vld [vmem:[#allocation12 + $0x10] sm:$0xff]  ;;  %v3365_v17 = vpack.c.bf16 %v1998_v7, %v1997_v48 }
 0x4b0   : > { %1838 = vmatmul.mubr.f32.gmra.mrb[42].mxu0 %v4816_v53 }
 0x4b1   : > { %1842 = vmatprep.mubr.f32.mxu0 %v4712_v42  ;;  %v1992_v42 = vld [vmem:[#allocation12 + $0x18] sm:$0xff] }
 0x4b2   : > { %v3353_v0 = vpack.c.bf16 %v1992_v42, %v1991_v22 }
 0x4b4   : > { %2415 = vmatmul.mubr.msk.f32.gmra.mrb[44].mxu0 %vm2437_vm13, %v1062_v16  ;;  %3354 = vmatprep.subr.bf16.mxu0 %v3353_v0 }
 0x4b5   : > { %1847 = vmatprep.mubr.f32.mxu0 %v4804_v41  ;;  %3398 = vmatprep.subr.bf16.mxu1 %v3353_v0  ;;  %v2000_v41 = vld [vmem:[#allocation12 + $0x58] sm:$0xff] }
 0x4b6   : > { %3356 = vmatpush3.bf16.msra.mxu0 %v3353_v0  ;;  %3406 = vmatpush3.bf16.msra.mxu1 %v3353_v0  ;;  %v3369_v53 = vpack.c.bf16 %v2000_v41, %v1999_v26 }
 0x4b7   : > { %3358 = vmatprep.subr.bf16.mxu0 %v3357_v27  ;;  %3399 = vmatprep.subr.bf16.mxu1 %v3357_v27 }
 0x4b8   : > { %1848 = vmatmul.mubr.f32.gmra.mrb[46].mxu0 %v1061_v40 }
 0x4ba   : > { %3360 = vmatpush3.bf16.msra.mxu0 %v3357_v27  ;;  %3407 = vmatpush3.bf16.msra.mxu1 %v3357_v27 }
 0x4bb   : > { %3362 = vmatprep.subr.bf16.mxu0 %v3361_v29  ;;  %3400 = vmatprep.subr.bf16.mxu1 %v3361_v29 }
 0x4be   : > { %3364 = vmatpush3.bf16.msra.mxu0 %v3361_v29  ;;  %3408 = vmatpush3.bf16.msra.mxu1 %v3361_v29 }
 0x4bf   : > { %3366 = vmatprep.subr.bf16.mxu0 %v3365_v17  ;;  %3401 = vmatprep.subr.bf16.mxu1 %v3365_v17 }
 0x4c2   : > { %3368 = vmatpush3.bf16.msra.mxu0 %v3365_v17  ;;  %3409 = vmatpush3.bf16.msra.mxu1 %v3365_v17 }
 0x4c3   : > { %3370 = vmatprep.subr.bf16.mxu0 %v3369_v53  ;;  %3402 = vmatprep.subr.bf16.mxu1 %v3369_v53 }
 0x4c6   : > { %3372 = vmatpush3.bf16.msra.mxu0 %v3369_v53  ;;  %3410 = vmatpush3.bf16.msra.mxu1 %v3369_v53 }
 0x4c7   : > { %3374 = vmatprep.subr.bf16.mxu0 %v3373_v39  ;;  %3403 = vmatprep.subr.bf16.mxu1 %v3373_v39 }
 0x4ca   : > { %3376 = vmatpush3.bf16.msra.mxu0 %v3373_v39  ;;  %3411 = vmatpush3.bf16.msra.mxu1 %v3373_v39 }
 0x4cb   : > { %3378 = vmatprep.subr.bf16.mxu0 %v3377_v56  ;;  %3404 = vmatprep.subr.bf16.mxu1 %v3377_v56 }
 0x4ce   : > { %3380 = vmatpush3.bf16.msra.mxu0 %v3377_v56  ;;  %3412 = vmatpush3.bf16.msra.mxu1 %v3377_v56  ;;  %v4924_v56 = vld [vmem:[%s5181_s3] ss:$0 sm:$0xff] }
 0x52f   : > { %v2539_v55 = vpop.f32.mrb[0].mxu0 }
 0x530   : > { %v2540_v31 = vpop.f32.mrb[1].mxu0 }
 0x531   : > { %v2541_v51 = vadd.f32 %v2540_v31, %v2539_v55 }
 0x533   : > { %v2542_v52 = vpop.f32.mrb[2].mxu0 }
 0x534   : > { %v2543_v63 = vpop.f32.mrb[3].mxu0 }
 0x535   : > { %v2544_v50 = vadd.f32 %v2543_v63, %v2542_v52 }
 0x537   : > { %v2545_v44 = vpop.f32.mrb[4].mxu0 }
 0x538   : > { %v2546_v46 = vpop.f32.mrb[5].mxu0 }
 0x539   : > { %v2547_v60 = vadd.f32 %v2546_v46, %v2545_v44 }
 0x53b   : > { %v2548_v45 = vpop.f32.mrb[6].mxu0 }
 0x53c   : > { %v2549_v12 = vpop.f32.mrb[7].mxu0 }
 0x53d   : > { %v2550_v3 = vadd.f32 %v2549_v12, %v2548_v45 }
 0x53f   : > { %v2551_v4 = vpop.f32.mrb[8].mxu0 }
 0x540   : > { %v2552_v2 = vpop.f32.mrb[9].mxu0 }
 0x541   : > { %v2553_v11 = vadd.f32 %v2552_v2, %v2551_v4 }
 0x543   : > { %v2554_v1 = vpop.f32.mrb[10].mxu0 }
 0x544   : > { %v2555_v14 = vpop.f32.mrb[11].mxu0 }
 0x545   : > { %v2556_v18 = vadd.f32 %v2555_v14, %v2554_v1 }
 0x547   : > { %v2557_v19 = vpop.f32.mrb[12].mxu0 }
 0x548   : > { %v2558_v24 = vpop.f32.mrb[13].mxu0 }
 0x549   : > { %v2559_v36 = vadd.f32 %v2558_v24, %v2557_v19 }
 0x54b   : > { %v2560_v25 = vpop.f32.mrb[14].mxu0 }
 0x54c   : > { %v2561_v15 = vpop.f32.mrb[15].mxu0 }
 0x54d   : > { %v2562_v61 = vadd.f32 %v2561_v15, %v2560_v25 }
 0x54f   : > { %v2619_v21 = vpop.f32.mrb[16].mxu0 }
 0x550   : > { %v2620_v57 = vpop.f32.mrb[17].mxu0 }
 0x551   : > { %v2621_v13 = vadd.f32 %v2620_v57, %v2619_v21 }
 0x553   : > { %v3416_v32 = vadd.f32 %v2621_v13, %v2541_v51  ;;  %v2622_v10 = vpop.f32.mrb[18].mxu0 }
 0x554   : > { %v2623_v62 = vpop.f32.mrb[19].mxu0 }
 0x555   : > { %v2624_v30 = vadd.f32 %v2623_v62, %v2622_v10 }
 0x557   : > { %v3413_v23 = vadd.f32 %v2624_v30, %v2544_v50  ;;  %v2625_v49 = vpop.f32.mrb[20].mxu0 }
 0x558   : > { %v2626_v5 = vpop.f32.mrb[21].mxu0 }
 0x559   : > { %v2627_v34 = vadd.f32 %v2626_v5, %v2625_v49 }
 0x55b   : > { %v3422_v35 = vadd.f32 %v2627_v34, %v2547_v60  ;;  %v2628_v9 = vpop.f32.mrb[22].mxu0 }
 0x55c   : > { %v2629_v38 = vpop.f32.mrb[23].mxu0 }
 0x55d   : > { %v2630_v16 = vadd.f32 %v2629_v38, %v2628_v9 }
 0x55f   : > { %v3419_v40 = vadd.f32 %v2630_v16, %v2550_v3  ;;  %v2631_v47 = vpop.f32.mrb[24].mxu0 }
 0x560   : > { %v2632_v54 = vpop.f32.mrb[25].mxu0 }
 0x561   : > { %v2633_v59 = vadd.f32 %v2632_v54, %v2631_v47 }
 0x563   : > { %v3428_v22 = vadd.f32 %v2633_v59, %v2553_v11  ;;  %v2634_v42 = vpop.f32.mrb[26].mxu0 }
 0x564   : > { %v2635_v0 = vpop.f32.mrb[27].mxu0 }
 0x565   : > { %v2636_v8 = vadd.f32 %v2635_v0, %v2634_v42 }
 0x567   : > { %v3425_v20 = vadd.f32 %v2636_v8, %v2556_v18  ;;  %v2637_v27 = vpop.f32.mrb[28].mxu0 }
 0x568   : > { %v2638_v58 = vpop.f32.mrb[29].mxu0 }
 0x569   : > { %v2639_v28 = vadd.f32 %v2638_v58, %v2637_v27 }
 0x56b   : > { %v3434_v29 = vadd.f32 %v2639_v28, %v2559_v36  ;;  %v2640_v48 = vpop.f32.mrb[30].mxu0 }
 0x56c   : > { %v2641_v7 = vpop.f32.mrb[31].mxu0 }
 0x56d   : > { %v2642_v17 = vadd.f32 %v2641_v7, %v2640_v48 }
 0x56f   : > { %v4919_v26 = vadd.f32 %v2642_v17, %v2562_v61  ;;  %v2699_v41 = vpop.f32.mrb[32].mxu0 }
 0x570   : > { %v3007_v53 = vpop.f32.mrb[0].mxu1  ;;  %v2700_v6 = vpop.f32.mrb[33].mxu0 }
 0x571   : > { %v2701_v37 = vadd.f32 %v2700_v6, %v2699_v41  ;;  %v1919_v39 = vpop.f32.mrb[1].mxu1  ;;  %v2425_v6 = vld [vmem:[%s5182_s6] ss:$0 sm:$0xff] }
 0x573   : > { %v3417_v43 = vadd.f32 %v3416_v32, %v2701_v37  ;;  %v2702_v33 = vpop.f32.mrb[34].mxu0 }
 0x574   : > { %v3010_v55 = vpop.f32.mrb[2].mxu1  ;;  %v2703_v31 = vpop.f32.mrb[35].mxu0 }
 0x575   : > { %v3418_v51 = vadd.f32 %v3417_v43, %v1919_v39  ;;  %v2704_v52 = vadd.f32 %v2703_v31, %v2702_v33  ;;  %v1929_v63 = vpop.f32.mrb[3].mxu1  ;;  %v2117_v33 = vld [vmem:[%s4444_s7] sm:$0xff] }
 0x577   : > { %v1973_v50 = vadd.f32 %v3418_v51, %v4924_v56  ;;  %v3414_v44 = vadd.f32 %v3413_v23, %v2704_v52  ;;  %v2705_v46 = vpop.f32.mrb[36].mxu0 }
 0x578   : > { %v3013_v60 = vpop.f32.mrb[4].mxu1  ;;  %v2706_v45 = vpop.f32.mrb[37].mxu0 }
 0x579   : > { %v1981_v12 = vmax.f32 %v1973_v50, 0.0  ;;  %v3415_v3 = vadd.f32 %v3414_v44, %v3007_v53  ;;  %v2707_v4 = vadd.f32 %v2706_v45, %v2705_v46  ;;  %v1939_v2 = vpop.f32.mrb[5].mxu1  ;;  %v2120_v50 = vld [vmem:[%s4444_s7 + $0x18] sm:$0xff] }
 0x57b   : > { %v1974_v11 = vadd.f32 %v3415_v3, %v4924_v56  ;;  %v3423_v1 = vadd.f32 %v3422_v35, %v2707_v4  ;;  %v2708_v14 = vpop.f32.mrb[38].mxu0  ;;  %3049 = vmatprep.mubr.f32.mxu0 %v1981_v12 }
 0x57c   : > { %v3016_v18 = vpop.f32.mrb[6].mxu1  ;;  %v2709_v19 = vpop.f32.mrb[39].mxu0 }
 0x57d   : > { %v1982_v24 = vmax.f32 %v1974_v11, 0.0  ;;  %v3424_v36 = vadd.f32 %v3423_v1, %v1929_v63  ;;  %v2710_v25 = vadd.f32 %v2709_v19, %v2708_v14  ;;  %v1949_v15 = vpop.f32.mrb[7].mxu1  ;;  %v2122_v1 = vld [vmem:[%s4444_s7 + $0x28] sm:$0xff]  ;;  %v2121_v19 = vld [vmem:[%s4444_s7 + $0x20] sm:$0xff] }
 0x57f   : > { %v3420_v61 = vadd.f32 %v3419_v40, %v2710_v25  ;;  %v2711_v21 = vpop.f32.mrb[40].mxu0  ;;  %3050 = vmatmul.mubr.f32.vlgmr.msra.gmra.mrb[48].mxu0 %v1982_v24  ;;  %v1975_v57 = vadd.f32 %v3424_v36, %v4924_v56 }
 0x580   : > { %v2712_v13 = vpop.f32.mrb[41].mxu0 }
 0x581   : > { %v3421_v32 = vadd.f32 %v3420_v61, %v3010_v55  ;;  %v2713_v10 = vadd.f32 %v2712_v13, %v2711_v21  ;;  %v1983_v62 = vmax.f32 %v1975_v57, 0.0  ;;  %v2124_v57 = vld [vmem:[%s4444_s7 + $0x38] sm:$0xff] }
 0x583   : > { %v3429_v30 = vadd.f32 %v3428_v22, %v2713_v10  ;;  %v2714_v23 = vpop.f32.mrb[42].mxu0  ;;  %3052 = vmatprep.mubr.f32.mxu0 %v1983_v62  ;;  %v1976_v49 = vadd.f32 %v3421_v32, %v4924_v56  ;;  %v2123_v10 = vld [vmem:[%s4444_s7 + $0x30] sm:$0xff] }
 0x584   : > { %v2715_v5 = vpop.f32.mrb[43].mxu0 }
 0x585   : > { %v3430_v34 = vadd.f32 %v3429_v30, %v1939_v2  ;;  %v2716_v35 = vadd.f32 %v2715_v5, %v2714_v23  ;;  %v1984_v9 = vmax.f32 %v1976_v49, 0.0 }
 0x587   : > { %v3426_v38 = vadd.f32 %v3425_v20, %v2716_v35  ;;  %v2717_v16 = vpop.f32.mrb[44].mxu0  ;;  %3053 = vmatmul.mubr.f32.gmra.mrb[50].mxu0 %v1984_v9  ;;  %v1977_v40 = vadd.f32 %v3430_v34, %v4924_v56 }
 0x588   : > { %v2718_v47 = vpop.f32.mrb[45].mxu0 }
 0x589   : > { %v3427_v54 = vadd.f32 %v3426_v38, %v3013_v60  ;;  %v2719_v59 = vadd.f32 %v2718_v47, %v2717_v16  ;;  %v1985_v42 = vmax.f32 %v1977_v40, 0.0  ;;  %v2119_v60 = vld [vmem:[%s4444_s7 + $0x10] sm:$0xff] }
 0x58b   : > { %v1978_v0 = vadd.f32 %v3427_v54, %v4924_v56  ;;  %v3435_v22 = vadd.f32 %v3434_v29, %v2719_v59  ;;  %v2720_v8 = vpop.f32.mrb[46].mxu0  ;;  %3055 = vmatprep.mubr.f32.mxu1 %v1985_v42 }
 0x58c   : > { %v2721_v27 = vpop.f32.mrb[47].mxu0 }
 0x58d   : > { %v1986_v58 = vmax.f32 %v1978_v0, 0.0  ;;  %v3436_v28 = vadd.f32 %v3435_v22, %v1949_v15  ;;  %v2722_v48 = vadd.f32 %v2721_v27, %v2720_v8 }
 0x58f   : > { %v3432_v20 = vadd.f32 %v4919_v26, %v2722_v48  ;;  %3056 = vmatmul.mubr.f32.vlgmr.msra.gmra.mrb[8].mxu1 %v1986_v58  ;;  %v1979_v7 = vadd.f32 %v3436_v28, %v4924_v56  ;;  %v2118_v26 = vld [vmem:[%s4444_s7 + $0x8] sm:$0xff]  ;;  %s2150_s7 = scalar_lea.sflag [#allocation5], %s4438_s4 }
 0x591   : > { %v3433_v17 = vadd.f32 %v3432_v20, %v3016_v18  ;;  %v1987_v41 = vmax.f32 %v1979_v7, 0.0 }
 0x593   : > { %3058 = vmatprep.mubr.f32.mxu1 %v1987_v41  ;;  %v1980_v29 = vadd.f32 %v3433_v17, %v4924_v56 }
 0x595   : > { %v1988_v53 = vmax.f32 %v1980_v29, 0.0 }
 0x597   : > { %3059 = vmatmul.mubr.f32.gmra.mrb[10].mxu1 %v1988_v53 }
 0x652   : > { %v3051_v37 = vpop.f32.mrb[48].mxu0 }
 0x653   : > { %v2084_v39 = vadd.f32 %v3051_v37, %v2425_v6  ;;  %v2078_v43 = vpop.f32.mrb[49].mxu0 }
 0x654   : > { %v2079_v55 = vadd.f32 %v2425_v6, %v2078_v43 }
 0x655   : > { %v2126_v31 = vadd.f32 %v2118_v26, %v2084_v39 }
 0x656   : > { %v2125_v51 = vadd.f32 %v2117_v33, %v2079_v55 }
 0x657   : > { %v2134_v52 = vmax.f32 %v2126_v31, 0.0 }
 0x658   : > { %v2133_v56 = vmax.f32 %v2125_v51, 0.0 }
 0x659   : > { %2142 = vst [vmem:[%s4546_s1 + $0x8] sm:$0xff] %v2134_v52 }
 0x65a   : > { %2141 = vst [vmem:[%s4546_s1] sm:$0xff] %v2133_v56  ;;  %v3054_v63 = vpop.f32.mrb[50].mxu0 }
 0x65b   : > { %v2094_v44 = vadd.f32 %v3054_v63, %v2425_v6  ;;  %v2088_v46 = vpop.f32.mrb[51].mxu0 }
 0x65c   : > { %v2089_v45 = vadd.f32 %v2425_v6, %v2088_v46 }
 0x65d   : > { %v2128_v12 = vadd.f32 %v2120_v50, %v2094_v44 }
 0x65e   : > { %v2127_v3 = vadd.f32 %v2119_v60, %v2089_v45 }
 0x65f   : > { %v2136_v4 = vmax.f32 %v2128_v12, 0.0 }
 0x660   : > { %v2135_v2 = vmax.f32 %v2127_v3, 0.0 }
 0x661   : > { %2144 = vst [vmem:[%s4546_s1 + $0x18] sm:$0xff] %v2136_v4 }
 0x662   : > { %2143 = vst [vmem:[%s4546_s1 + $0x10] sm:$0xff] %v2135_v2  ;;  %v3057_v11 = vpop.f32.mrb[8].mxu1 }
 0x663   : > { %v2104_v14 = vadd.f32 %v3057_v11, %v2425_v6  ;;  %v2098_v18 = vpop.f32.mrb[9].mxu1 }
 0x664   : > { %v2099_v24 = vadd.f32 %v2425_v6, %v2098_v18 }
 0x665   : > { %v2130_v36 = vadd.f32 %v2122_v1, %v2104_v14 }
 0x666   : > { %v2129_v25 = vadd.f32 %v2121_v19, %v2099_v24 }
 0x667   : > { %v2138_v15 = vmax.f32 %v2130_v36, 0.0 }
 0x668   : > { %v2137_v61 = vmax.f32 %v2129_v25, 0.0 }
 0x669   : > { %2146 = vst [vmem:[%s4546_s1 + $0x28] sm:$0xff] %v2138_v15 }
 0x66a   : > { %2145 = vst [vmem:[%s4546_s1 + $0x20] sm:$0xff] %v2137_v61  ;;  %v3060_v21 = vpop.f32.mrb[10].mxu1 }
 0x66b   : > { %v2114_v13 = vadd.f32 %v3060_v21, %v2425_v6  ;;  %v2108_v32 = vpop.f32.mrb[11].mxu1 }
 0x66c   : > { %v2109_v62 = vadd.f32 %v2425_v6, %v2108_v32 }
 0x66d   : > { %v2132_v30 = vadd.f32 %v2124_v57, %v2114_v13 }
 0x66e   : > { %v2131_v23 = vadd.f32 %v2123_v10, %v2109_v62 }
 0x66f   : > { %v2140_v49 = vmax.f32 %v2132_v30, 0.0 }
 0x670   : > { %v2139_v5 = vmax.f32 %v2131_v23, 0.0 }
 0x671   : > { %2148 = vst [vmem:[%s4546_s1 + $0x38] sm:$0xff] %v2140_v49 }
 0x672   : > { %2147 = vst [vmem:[%s4546_s1 + $0x30] sm:$0xff] %v2139_v5 }
 0x673   : > { %3813 = shalt.err (!%p3810_p0)
}
 0x674   : > { %s3814_s1 = scalar_lea.hbm %s4958_s25, 1024  ;;  %s3818_s26 = scalar_lea.hbm %s5185_s24, 8192 }
 0x675   : > { %p3815_p1 = scmp.ne.s32.totalorder %s4958_s25, %s3814_s1  ;;  %p3819_p4 = scmp.lt.u32.totalorder %s4958_s25, %s5185_s24 }
 0x676   : > { %p3820_p5 = scmp.lt.u32.totalorder %s3818_s26, %s3814_s1  ;;  %p3822_p8 = scmp.lt.u32.totalorder %s3814_s1, %s4958_s25 }
 0x677   : > { %p3816_p3 = pnand %p3815_p1, %p5186_p2 }
 0x678   : > { %p3821_p10 = por %p3820_p5, %p3819_p4 }
 0x679   : > { %p3817_p12 = pneg %p3816_p3 }
 0x67a   : > { %p3823_p9 = por %p3822_p8, %p3821_p10 }
 0x67c   : > { %p3824_p7 = pnand %p3823_p9, %p3817_p12 }
 0x67e   : > { %3827 = shalt.err (!%p3824_p7)
}
 0x67f   : > { %s3975_s21 = smov 128   ;;  %s3976_s11 = smov 8  }
 0x680   : > { %3471 = dma.vmem_to_hbm [thread:$0]  (%p5186_p2), %s4960_s23, 1024, %s4958_s25, %s2150_s7, %s3975_s21, %s3975_s21, %s3976_s11  }
 0x681 PF: > { %s5187_s10 = sld [smem:[#allocation36_spill]]  ;;  %p3504_p6 = scmp.ge.s32.totalorder %s3962_s22, 2 }
 0x682   : > { %s2181_s9 = sand.u32 1, %s3934_s15  }
 0x683   : > { %s2182_s5 = scalar_lea.sflag [#allocation5], %s2181_s9 }
 0x687   : > { %p5188_p13 = scmp.ne.s32.totalorder %s5187_s10, 0 }
 0x689   : > { %p3494_p11 = pnand %p3504_p6, %p5188_p13 }
 0x68b   : > { %3905 = dma.done.wait (!%p3494_p11), %s2182_s5, 1024  }
 0x68c   : > { %3907 = vsyncadd (!%p3494_p11), %s2182_s5, 4294966272  ;;  %s30_s22 = sadd.s32 1, %s3962_s22   ;;  %s5190_s30 = sld [smem:[#allocation22_spill]] }
 0x68d   : > { %p4993_p0 = scmp.ge.s32.totalorder %s30_s22, 10   ;;  %s5191_s10 = sld [smem:[#allocation23_spill]] }
 0x68e   : > { %s5192_s19 = sld [smem:[#allocation24_spill]]  ;;  %s5193_s4 = smov %s4189_s12 }
 0x68f   : > { %s5194_s23 = sld [smem:[#allocation35_spill]]  ;;  %s5195_s18 = sld [smem:[#allocation27_spill]] }
 0x690   : > { %s5196_s25 = sld [smem:[#allocation28_spill]]  ;;  %s5197_s20 = sld [smem:[#allocation30_spill]] }
 0x691   : > { %s5198_s21 = sld [smem:[#allocation31_spill]]  ;;  %s5199_s11 = smov %s5222_s2 }
 0x692   : > { %s5201_s13 = smov %s3930_s14  ;;  %s5202_s14 = smov %s5193_s4 }
 0x693   : > { %s5203_s15 = smov %s3938_s16  ;;  %s5204_s16 = smov %s3942_s17 }
 0x694   : > { %s5200_s12 = smov %s5192_s19  ;;  %29 = sbr.rel (!%p4993_p0) target bundleno = 25 (0x19), region = 155 }
 0x695   : > { %s5205_s17 = smov %s5194_s23 }
 0x696   : > { %s5206_s19 = smov %s5196_s25 }
 0x69b   :  { %2187 = vsyncpa [#allocation4], 1 }
 0x69c   :  { %2189 = vsyncpa [#allocation4 + $0x1], 1 }
 0x69d   :  { %2190 = vsyncpa [#allocation7], 1 }
 0x69e   :  { %2192 = vsyncpa [#allocation7 + $0x1], 1 }
 0x69f   :  { %2193 = vsyncpa [#allocation10], 1 }
 0x6a0   :  { %2194 = vsyncpa [#allocation13], 1 }
 0x6a1   :  { %2195 = vsyncpa [#allocation5], 1 }
 0x6a2   :  { %2197 = vsyncpa [#allocation5 + $0x1], 1 }

// kernel: tpu_custom_call.1
= control target key start
LH: loop header
LB: loop body
LE: loop exit
PB: predicated region body
PF: predicated region fallthrough
CT: control target
= control target key end

     0   :  { %s5040_s0 = inlined_call_operand.hbm [shape: f32[2,16,16,128], index: 0, kind: input, shape index: {}]   ;;  %s5041_s1 = inlined_call_operand.hbm [shape: f32[2,16,16,128], index: 1, kind: input, shape index: {}]   ;;  %s5042_s2 = inlined_call_operand.hbm [shape: f32[2,16,16,128], index: 2, kind: input, shape index: {}]   ;;  %s5043_s3 = inlined_call_operand.hbm [shape: f32[128,128], index: 3, kind: input, shape index: {}]   ;;  %s5044_s4 = inlined_call_operand.vmem [shape: f32[1,128], index: 4, kind: input, shape index: {}]   ;;  %s5045_s5 = inlined_call_operand.hbm [shape: f32[3,384,128], index: 5, kind: input, shape index: {}]   ;;  %s5046_s6 = inlined_call_operand.vmem [shape: f32[1,128], index: 6, kind: input, shape index: {}]   ;;  %s5047_s7 = inlined_call_operand.hbm [shape: f32[128,128], index: 7, kind: input, shape index: {}]   ;;  %s5048_s8 = inlined_call_operand.vmem [shape: f32[1,128], index: 8, kind: input, shape index: {}]   ;;  %s5049_s9 = inlined_call_operand.hbm [shape: f32[2,16,16,128], index: 9, kind: output, shape index: {}]  }
   0x1   :  { %5083 = sst [smem:[#allocation37_spill]] %s5040_s0 }
   0x2   :  { %5084 = sst [smem:[#allocation38_spill]] %s5041_s1 }
   0x3   :  { %5085 = sst [smem:[#allocation39_spill]] %s5042_s2 }
   0x4   :  { %5086 = sst [smem:[#allocation40_spill]] %s5043_s3 }
   0x5   :  { %5087 = sst [smem:[#allocation41_spill]] %s5044_s4 }
   0x6   :  { %5088 = sst [smem:[#allocation42_spill]] %s5045_s5 }
   0x7   :  { %5089 = sst [smem:[#allocation43_spill]] %s5046_s6 }
   0x8   :  { %5090 = sst [smem:[#allocation44_spill]] %s5047_s7 }
   0x9   :  { %5091 = sst [smem:[#allocation45_spill]] %s5048_s8 }
   0xa   :  { %5092 = sst [smem:[#allocation46_spill]] %s5049_s9 }
   0xb   :  { %14 = vsyncpa [#allocation4], 0 }
   0xc   :  { %16 = vsyncpa [#allocation4 + $0x1], 0 }
   0xd   :  { %17 = vsyncpa [#allocation7], 0 }
   0xe   :  { %19 = vsyncpa [#allocation7 + $0x1], 0 }
   0xf   :  { %20 = vsyncpa [#allocation10], 0 }
  0x10   :  { %21 = vsyncpa [#allocation13], 0 }
  0x11   :  { %22 = vsyncpa [#allocation5], 0 }
  0x12   :  { %24 = vsyncpa [#allocation5 + $0x1], 0  ;;  %s4027_s30 = smov 0   ;;  %s4029_s10 = smov 0  }
  0x13   :  { %s4031_s11 = smov 0   ;;  %s4033_s12 = smov 0  }
  0x14   :  { %s4035_s13 = smov 0   ;;  %s4037_s14 = smov 0  }
  0x15   :  { %s4039_s15 = smov 0   ;;  %s4041_s16 = smov 0  }
  0x16   :  { %s4043_s17 = smov 0   ;;  %s4045_s18 = smov 0  }
  0x17   :  { %s4047_s19 = smov 0   ;;  %s4049_s20 = smov 0  }
  0x18   :  { %s4051_s21 = smov 0   ;;  %s4053_s22 = smov 0  }
  0x19 LB: > { %5093 = sst [smem:[#allocation21_spill]] %s3910_s30  ;;  %s4098_s23 = sadd.s32 4294967295, %s3962_s22   ;;  %s3962_s22 = sphi %s4053_s22, %s30_s22   ;;  %s3958_s21 = sphi %s4051_s21, %s5198_s21   ;;  %s3954_s20 = sphi %s4049_s20, %s5197_s20   ;;  %s3950_s19 = sphi %s4047_s19, %s5206_s19   ;;  %s3946_s18 = sphi %s4045_s18, %s5195_s18   ;;  %s3942_s17 = sphi %s4043_s17, %s5205_s17   ;;  %s3938_s16 = sphi %s4041_s16, %s5204_s16   ;;  %s3934_s15 = sphi %s4039_s15, %s5203_s15   ;;  %s3930_s14 = sphi %s4037_s14, %s5202_s14   ;;  %s3926_s13 = sphi %s4035_s13, %s5201_s13   ;;  %s3922_s12 = sphi %s4033_s12, %s5200_s12   ;;  %s3918_s11 = sphi %s4031_s11, %s5199_s11   ;;  %s3914_s10 = sphi %s4029_s10, %s5191_s10   ;;  %s3910_s30 = sphi %s4027_s30, %s5190_s30  }
  0x1a   : > { %5094 = sst [smem:[#allocation22_spill]] %s3914_s10  ;;  %p2342_p0 = scmp.ge.s32.totalorder %s3962_s22, 1 }
  0x1b   : > { %5095 = sst [smem:[#allocation23_spill]] %s3918_s11  ;;  %p5051_p1 = scmp.eq.s32.totalorder %s4098_s23, 0 }
  0x1c   : > { %5096 = sst [smem:[#allocation24_spill]] %s3926_s13  ;;  %p301_p3 = scmp.lt.s32.totalorder %s3962_s22, 9 }
  0x1d   : > { %5097 = sst [smem:[#allocation25_spill]] %s3946_s18  ;;  %s3964_s25 = smov [#allocation9]  }
  0x1e   : > { %5098 = sst [smem:[#allocation26_spill]] %s3950_s19  ;;  %p4104_p4 = pnand %p2342_p0, %p301_p3 }
  0x1f   : > { %5099 = sst [smem:[#allocation27_spill]] %s3954_s20  ;;  %s313_s26 = sshll.u32 %s3964_s25, 4  ;;  %s314_s26 = int_to_ptr.vmem [resolvable:$true] %s313_s26 }
  0x20   : > { %5100 = sst [smem:[#allocation28_spill]] %s3958_s21  ;;  %p3473_p5 = pneg %p4104_p4 }
  0x21   : > { %s5101_s24 = scalar_select %p4104_p4, 1, 0 }
  0x22   : > { %p4112_p6 = pnand %p3473_p5, %p5051_p1  ;;  %s5104_s3 = sld [smem:[#allocation40_spill]] }
  0x23   : > { %5102 = sst [smem:[#allocation29_spill]] %s5101_s24 }
  0x24   : > { %s5103_s27 = scalar_select %p4112_p6, 1, 0 }
  0x25   : > { %p4124_p8 = pneg %p4112_p6 }
  0x28   : > { %s3626_s9 = scalar_lea.hbm %s5104_s3, 2048 }
  0x29   : > { %p3627_p7 = scmp.ne.s32.totalorder %s5104_s3, %s3626_s9  ;;  %p3633_p11 = scmp.lt.u32.totalorder %s3626_s9, %s5104_s3 }
  0x2b   : > { %p3629_p9 = pnand %p4124_p8, %p3627_p7 }
  0x2d   : > { %p3630_p10 = pneg %p3629_p9 }
  0x2f   : > { %p3635_p12 = pnand %p3633_p11, %p3630_p10 }
  0x31   : > { %3638 = shalt.err (!%p3635_p12)
}
  0x32   : > { %s3639_s28 = scalar_lea.vmem %s314_s26, 2048  ;;  %p3647_p5 = scmp.lt.s32.totalorder %s314_s26, %s314_s26 }
  0x33   : > { %p3640_p13 = scmp.ne.s32.totalorder %s314_s26, %s3639_s28  ;;  %p3648_p2 = scmp.lt.s32.totalorder %s3639_s28, %s3639_s28 }
  0x35   : > { %p3642_p0 = pnand %p3640_p13, %p4124_p8  ;;  %p3649_p1 = por %p3648_p2, %p3647_p5 }
  0x37   : > { %p3643_p3 = pneg %p3642_p0 }
  0x39   : > { %p3650_p4 = pnand %p3649_p1, %p3643_p3 }
  0x3b   : > { %3653 = shalt.err (!%p3650_p4)
}
  0x3c   : > { %s5055_s8 = smov 128   ;;  %s5057_s6 = smov 8  }
  0x3d   : > { %3476 = dma.hbm_to_vmem [thread:$0]  (!%p4112_p6), %s5104_s3, 2048, %s314_s26, [#allocation10], %s5055_s8, %s5055_s8, %s5057_s6  }
  0x3e   : > { %s39_s19 = sadd.s32 1, %s3954_s20  ;;  %s42_s29 = sadd.s32 1, %s3958_s21 }
  0x3f   : > { %p40_p1 = scmp.ge.s32.totalorder %s39_s19, 4  ;;  %p5071_p2 = scmp.eq.s32.totalorder %s3962_s22, 0 }
  0x40   : > { %s2336_s28 = sshll.u32 %s3954_s20, 2  ;;  %s87_s4 = sadd.s32 1, %s3930_s14 }
  0x41   : > { %s5208_s19 = smov (%p40_p1, %s39_s19), 0  ;;  %s5210_s29 = smov (!%p40_p1, %s42_s29), %s3958_s21 }
  0x42   : > { %5106 = sst [smem:[#allocation30_spill]] %s5208_s19  ;;  %s47_s24 = ssub.s32 %s3954_s20, %s5208_s19 }
  0x43   : > { %s2337_s2 = sadd.s32 4294967295, %s2336_s28  ;;  %p44_p4 = scmp.ge.s32.totalorder %s5210_s29, 2 }
  0x44   : > { %p76_p7 = scmp.gt.s32.totalorder %s2337_s2, 0  ;;  %s2338_s26 = sshll.u32 %s5208_s19, 2 }
  0x45   : > { %p94_p9 = scmp.ne.s32.totalorder %s3930_s14, %s3926_s13  ;;  %s5212_s29 = smov (%p44_p4, %s5210_s29), 0 }
  0x46   : > { %5107 = sst [smem:[#allocation31_spill]] %s5212_s29  ;;  %s5214_s2 = smov (!%p76_p7, %s2337_s2), 0 }
  0x47   : > { %s4160_s9 = ssub.s32 %s3958_s21, %s5212_s29  ;;  %s2339_s18 = sadd.s32 4294967295, %s2338_s26 }
  0x48   : > { %5108 = sst [smem:[#allocation32_spill]] %s4160_s9  ;;  %s4163_s8 = sor.u32 %s47_s24, %s4160_s9 }
  0x49   : > { %p80_p10 = scmp.gt.s32.totalorder %s2339_s18, 0  ;;  %p4168_p12 = por %p94_p9, %p5071_p2 }
  0x4a   : > { %p100_p13 = scmp.ne.s32.totalorder %s3926_s13, %s3922_s12  ;;  %s4174_s3 = sadd.s32 4, %s2336_s28 }
  0x4b   : > { %s5216_s18 = smov (!%p80_p10, %s2339_s18), 0  ;;  %5110 = sst [smem:[#allocation33_spill]] %s4174_s3 }
  0x4c   : > { %s83_s29 = ssub.s32 %s5214_s2, %s5216_s18  ;;  %p5111_p3 = scmp.eq.s32.totalorder %s4098_s23, 0 }
  0x4d   : > { %s84_s24 = sor.u32 %s83_s29, %s4160_s9  ;;  %s4184_s30 = sadd.s32 4, %s2338_s26 }
  0x4e   : > { %p4180_p5 = por %p100_p13, %p5111_p3  ;;  %p85_p1 = scmp.eq.s32.totalorder %s84_s24, 0 }
  0x4f   : > { %p5070_p7 = scmp.lt.s32.totalorder %s3962_s22, 8  ;;  %s4192_s28 = sshll.u32 %s3958_s21, 5 }
  0x50   : > { %s5112_s19 = scalar_select %p4180_p5, 1, 0 }
  0x51   : > { %s4189_s12 = scalar_select %p85_p1, %s3930_s14, %s87_s4  }
  0x52   : > { %5113 = sst [smem:[#allocation34_spill]] %s5112_s19  ;;  %s386_s18 = sand.u32 1, %s3962_s22  }
  0x53   : > { %s388_s29 = sand.u32 1, %s3930_s14   ;;  %s2355_s9 = sshll.u32 %s5214_s2, 1 }
  0x54   : > { %s2352_s13 = sshll.u32 %s388_s29, 4  ;;  %s400_s10 = sadd.s32 %s2355_s9, %s4192_s28 }
  0x55   : > { %s2357_s3 = sshll.u32 %s400_s10, 7  ;;  %s390_s19 = scalar_lea.vmem [#allocation6], %s2352_s13 }
  0x56   : > { %s403_s24 = sshll.u32 %s390_s19, 4  ;;  %s5114_s1 = sld [smem:[#allocation38_spill]]  ;;  %s4202_s24 = int_to_ptr.vmem [resolvable:$true] %s403_s24 }
  0x57   : > { %p4208_p9 = pnand %p5070_p7, %p4168_p12  ;;  %s3967_s2 = smov [#allocation11]  }
  0x58   : > { %s329_s10 = sshll.u32 %s3967_s2, 4  ;;  %s4214_s0 = scalar_lea.sflag [#allocation7], %s386_s18  ;;  %s4212_s10 = int_to_ptr.vmem [resolvable:$true] %s329_s10 }
  0x59   : > { %p3656_p13 = pneg %p4208_p9 }
  0x5c   : > { %s4200_s26 = scalar_lea.hbm %s5114_s1, %s2357_s3  ;;  %s3659_s6 = scalar_lea.hbm %s5114_s1, 8192 }
  0x5d   : > { %s3654_s3 = scalar_lea.hbm %s4200_s26, 256  ;;  %p3660_p12 = scmp.lt.u32.totalorder %s4200_s26, %s5114_s1 }
  0x5e   : > { %p3655_p10 = scmp.ne.s32.totalorder %s4200_s26, %s3654_s3  ;;  %p3661_p4 = scmp.lt.u32.totalorder %s3659_s6, %s3654_s3 }
  0x5f   : > { %p3663_p7 = scmp.lt.u32.totalorder %s3654_s3, %s4200_s26 }
  0x60   : > { %p3657_p3 = pnand %p3656_p13, %p3655_p10  ;;  %p3662_p0 = por %p3661_p4, %p3660_p12 }
  0x62   : > { %p3658_p1 = pneg %p3657_p3  ;;  %p3664_p2 = por %p3663_p7, %p3662_p0 }
  0x64   : > { %p3665_p11 = pnand %p3664_p2, %p3658_p1 }
  0x66   : > { %3668 = shalt.err (!%p3665_p11)
}
  0x67   : > { %s3669_s18 = scalar_lea.vmem %s4202_s24, 256  ;;  %s3968_s29 = smov [#allocation6]  }
  0x68   : > { %p3670_p10 = scmp.ne.s32.totalorder %s4202_s24, %s3669_s18  ;;  %s3674_s2 = sshll.u32 %s3968_s29, 4  ;;  %s3675_s2 = int_to_ptr.vmem [resolvable:$false] %s3674_s2 }
  0x69   : > { %s3676_s11 = scalar_lea.vmem %s3675_s2, 512  ;;  %p3677_p6 = scmp.lt.s32.totalorder %s4202_s24, %s3675_s2 }
  0x6a   : > { %p3672_p3 = pnand %p3670_p10, %p3656_p13  ;;  %p3678_p4 = scmp.lt.s32.totalorder %s3676_s11, %s3669_s18 }
  0x6c   : > { %p3673_p5 = pneg %p3672_p3  ;;  %p3679_p12 = por %p3678_p4, %p3677_p6 }
  0x6e   : > { %p3680_p0 = pnand %p3679_p12, %p3673_p5 }
  0x70   : > { %3683 = shalt.err (!%p3680_p0)
}
  0x71   : > { %s5116_s3 = smov 8   ;;  %s5117_s13 = smov 128  }
  0x72   : > { %3489 = dma.hbm_to_vmem [thread:$0]  (!%p4208_p9), %s4200_s26, 256, %s4202_s24, %s4214_s0, %s5117_s13, %s5117_s13, %s5116_s3  }
  0x73   : > { %s5118_s5 = sld [smem:[#allocation42_spill]] }
  0x79   : > { %s3684_s9 = scalar_lea.hbm %s5118_s5, 18432 }
  0x7a   : > { %p3685_p6 = scmp.ne.s32.totalorder %s5118_s5, %s3684_s9  ;;  %p3691_p5 = scmp.lt.u32.totalorder %s3684_s9, %s5118_s5 }
  0x7c   : > { %p3687_p2 = pnand %p3685_p6, %p4124_p8 }
  0x7e   : > { %p3688_p11 = pneg %p3687_p2 }
  0x80   : > { %p3693_p7 = pnand %p3691_p5, %p3688_p11 }
  0x82   : > { %3696 = shalt.err (!%p3693_p7)
}
  0x83   : > { %s3697_s24 = scalar_lea.vmem %s4212_s10, 18432  ;;  %p3705_p10 = scmp.lt.s32.totalorder %s4212_s10, %s4212_s10 }
  0x84   : > { %p3698_p9 = scmp.ne.s32.totalorder %s4212_s10, %s3697_s24  ;;  %p3706_p3 = scmp.lt.s32.totalorder %s3697_s24, %s3697_s24 }
  0x86   : > { %p3700_p13 = pnand %p3698_p9, %p4124_p8  ;;  %p3707_p4 = por %p3706_p3, %p3705_p10 }
  0x88   : > { %p3701_p1 = pneg %p3700_p13 }
  0x8a   : > { %p3708_p12 = pnand %p3707_p4, %p3701_p1 }
  0x8c   : > { %3711 = shalt.err (!%p3708_p12)
}
  0x8d   : > { %p5119_p0 = scmp.ne.s32.totalorder %s5103_s27, 0  ;;  %s3969_s6 = smov [#allocation12]  }
  0x8e   : > { %s345_s19 = sshll.u32 %s3969_s6, 4  ;;  %s5120_s7 = sld [smem:[#allocation44_spill]]  ;;  %s346_s19 = int_to_ptr.vmem [resolvable:$true] %s345_s19 }
  0x8f   : > { %3479 = dma.hbm_to_vmem [thread:$0]  (!%p5119_p0), %s5118_s5, 18432, %s4212_s10, [#allocation10], %s5117_s13, %s5117_s13, %s5116_s3  }
  0x94   : > { %s3712_s2 = scalar_lea.hbm %s5120_s7, 2048 }
  0x95   : > { %p3713_p6 = scmp.ne.s32.totalorder %s5120_s7, %s3712_s2  ;;  %p3719_p5 = scmp.lt.u32.totalorder %s3712_s2, %s5120_s7 }
  0x97   : > { %p3715_p2 = pnand %p3713_p6, %p4124_p8 }
  0x99   : > { %p3716_p11 = pneg %p3715_p2 }
  0x9b   : > { %p3721_p7 = pnand %p3719_p5, %p3716_p11 }
  0x9d   : > { %3724 = shalt.err (!%p3721_p7)
}
  0x9e   : > { %s3725_s10 = scalar_lea.vmem %s346_s19, 2048  ;;  %p3733_p10 = scmp.lt.s32.totalorder %s346_s19, %s346_s19 }
  0x9f   : > { %p3726_p9 = scmp.ne.s32.totalorder %s346_s19, %s3725_s10  ;;  %p3734_p3 = scmp.lt.s32.totalorder %s3725_s10, %s3725_s10 }
  0xa1   : > { %p3728_p13 = pnand %p3726_p9, %p4124_p8  ;;  %p3735_p4 = por %p3734_p3, %p3733_p10 }
  0xa3   : > { %p3729_p1 = pneg %p3728_p13 }
  0xa5   : > { %p3736_p12 = pnand %p3735_p4, %p3729_p1 }
  0xa7   : > { %3739 = shalt.err (!%p3736_p12)
}
  0xa8   : > { %3482 = dma.hbm_to_vmem [thread:$0]  (!%p5119_p0), %s5120_s7, 2048, %s346_s19, [#allocation13], %s5117_s13, %s5117_s13, %s5116_s3  }
  0xa9   : > { %s2335_s27 = sadd.s32 4294967294, %s3962_s22   ;;  %s51_s25 = sadd.s32 1, %s3942_s17 }
  0xaa   : > { %p5121_p8 = scmp.eq.s32.totalorder %s4163_s8, 0  ;;  %p58_p6 = scmp.ne.s32.totalorder %s3942_s17, %s3938_s16 }
  0xab   : > { %p64_p2 = scmp.ne.s32.totalorder %s3938_s16, %s3934_s15  ;;  %p294_p11 = scmp.eq.s32.totalorder %s2335_s27, 7 }
  0xac   : > { %s4297_s11 = scalar_select %p5121_p8, %s3942_s17, %s51_s25  }
  0xad   : > { %s362_s6 = sand.u32 1, %s3942_s17   ;;  %p5123_p5 = scmp.eq.s32.totalorder %s3962_s22, 0 }
  0xae   : > { %5122 = sst [smem:[#allocation35_spill]] %s4297_s11  ;;  %p5124_p9 = scmp.eq.s32.totalorder %s4098_s23, 0 }
  0xaf   : > { %p60_p7 = por %p5123_p5, %p58_p6  ;;  %p5126_p1 = scmp.eq.s32.totalorder %s4098_s23, 7 }
  0xb0   : > { %p4308_p13 = por %p5124_p9, %p64_p2  ;;  %p4318_p0 = por %p294_p11, %p64_p2 }
  0xb1   : > { %p4314_p10 = por %p5126_p1, %p58_p6  ;;  %s2347_s29 = sshll.u32 %s362_s6, 6 }
  0xb2   : > { %s5128_s8 = scalar_select %p4318_p0, 1, 0 }
  0xb3   : > { %s5127_s19 = scalar_select %p4314_p10, 1, 0 }
  0xb4   : > { %5129 = sst [smem:[#allocation36_spill]] %s5128_s8  ;;  %s2433_s2 = sshll.u32 %s3954_s20, 3 }
  0xb5   : > { %s373_s4 = sadd.s32 %s2433_s2, %s4192_s28  ;;  %s366_s18 = scalar_lea.vmem [#allocation3], %s2347_s29 }
  0xb6   : > { %s376_s24 = sshll.u32 %s366_s18, 4  ;;  %s2351_s10 = sshll.u32 %s373_s4, 7  ;;  %s4324_s24 = int_to_ptr.vmem [resolvable:$true] %s376_s24 }
  0xb7   : > { %s5130_s27 = sld [smem:[#allocation37_spill]]  ;;  %p5131_p3 = scmp.lt.s32.totalorder %s3962_s22, 8 }
  0xb8   : > { %s4337_s29 = scalar_lea.sflag [#allocation4], %s362_s6 }
  0xb9   : > { %p4333_p4 = pnand %p5131_p3, %p60_p7 }
  0xbb   : > { %p3742_p8 = pneg %p4333_p4 }
  0xbd   : > { %s4329_s25 = scalar_lea.hbm %s5130_s27, %s2351_s10  ;;  %s3745_s10 = scalar_lea.hbm %s5130_s27, 8192 }
  0xbe   : > { %s3740_s2 = scalar_lea.hbm %s4329_s25, 1024  ;;  %p3746_p11 = scmp.lt.u32.totalorder %s4329_s25, %s5130_s27 }
  0xbf   : > { %p3741_p12 = scmp.ne.s32.totalorder %s4329_s25, %s3740_s2  ;;  %p3747_p5 = scmp.lt.u32.totalorder %s3745_s10, %s3740_s2 }
  0xc0   : > { %p3749_p9 = scmp.lt.u32.totalorder %s3740_s2, %s4329_s25 }
  0xc1   : > { %p3743_p6 = pnand %p3742_p8, %p3741_p12  ;;  %p3748_p7 = por %p3747_p5, %p3746_p11 }
  0xc3   : > { %p3744_p2 = pneg %p3743_p6  ;;  %p3750_p1 = por %p3749_p9, %p3748_p7 }
  0xc5   : > { %p3751_p3 = pnand %p3750_p1, %p3744_p2 }
  0xc7   : > { %3754 = shalt.err (!%p3751_p3)
}
  0xc8   : > { %s3755_s6 = scalar_lea.vmem %s4324_s24, 1024  ;;  %s3970_s4 = smov [#allocation3]  }
  0xc9   : > { %p3756_p12 = scmp.ne.s32.totalorder %s4324_s24, %s3755_s6  ;;  %s3760_s18 = sshll.u32 %s3970_s4, 4  ;;  %s3761_s18 = int_to_ptr.vmem [resolvable:$false] %s3760_s18 }
  0xca   : > { %s3762_s1 = scalar_lea.vmem %s3761_s18, 2048  ;;  %p3763_p10 = scmp.lt.s32.totalorder %s4324_s24, %s3761_s18 }
  0xcb   : > { %p3758_p6 = pnand %p3756_p12, %p3742_p8  ;;  %p3764_p11 = scmp.lt.s32.totalorder %s3762_s1, %s3755_s6 }
  0xcd   : > { %p3759_p0 = pneg %p3758_p6  ;;  %p3765_p5 = por %p3764_p11, %p3763_p10 }
  0xcf   : > { %p3766_p7 = pnand %p3765_p5, %p3759_p0 }
  0xd1   : > { %3769 = shalt.err (!%p3766_p7)
}
  0xd2   : > { %s5133_s2 = sld [smem:[#allocation23_spill]]  ;;  %s5134_s10 = sld [smem:[#allocation33_spill]] }
  0xd3   : > { %s5135_s26 = sld [smem:[#allocation22_spill]]  ;;  %s5137_s6 = sld [smem:[#allocation32_spill]] }
  0xd4   : > { %s5136_s4 = sld [smem:[#allocation21_spill]]  ;;  %p5139_p0 = scmp.lt.s32.totalorder %s4184_s30, 15 }
  0xd5   : > { %3486 = dma.hbm_to_vmem [thread:$0]  (!%p4333_p4), %s4329_s25, 1024, %s4324_s24, %s4337_s29, %s5117_s13, %s5117_s13, %s5116_s3  }
  0xd6   : > { %s5220_s30 = smov (!%p5139_p0, %s4184_s30), 15  ;;  %p5140_p9 = scmp.eq.s32.totalorder %s3962_s22, 0 }
  0xd7   : > { %p5141_p12 = scmp.eq.s32.totalorder %s4098_s23, 0  ;;  %s5143_s11 = sld [smem:[#allocation39_spill]] }
  0xd8   : > { %s123_s5 = sadd.s32 1, %s5133_s2  ;;  %p5138_p10 = scmp.lt.s32.totalorder %s5134_s10, 15 }
  0xd9   : > { %p130_p8 = scmp.ne.s32.totalorder %s5133_s2, %s5135_s26  ;;  %s415_s1 = sand.u32 1, %s5133_s2  }
  0xda   : > { %s5218_s10 = smov (!%p5138_p10, %s5134_s10), 15  ;;  %p136_p2 = scmp.ne.s32.totalorder %s5135_s26, %s5136_s4 }
  0xdb   : > { %s119_s18 = ssub.s32 %s5218_s10, %s5220_s30  ;;  %p132_p1 = por %p130_p8, %p5140_p9 }
  0xdc   : > { %s120_s7 = sor.u32 %s119_s18, %s5137_s6  ;;  %p4385_p6 = por %p136_p2, %p5141_p12 }
  0xdd   : > { %p121_p3 = scmp.eq.s32.totalorder %s120_s7, 0  ;;  %s2358_s24 = sshll.u32 %s415_s1, 4 }
  0xde   : > { %s5142_s27 = scalar_select %p4385_p6, 1, 0 }
  0xdf   : > { %s2360_s25 = sshll.u32 %s5218_s10, 1  ;;  %s5222_s2 = smov (!%p121_p3, %s5133_s2), %s123_s5 }
  0xe0   : > { %s427_s29 = sadd.s32 %s2360_s25, %s4192_s28  ;;  %s417_s20 = scalar_lea.vmem [#allocation8], %s2358_s24 }
  0xe1   : > { %s2362_s21 = sshll.u32 %s427_s29, 7  ;;  %s430_s26 = sshll.u32 %s417_s20, 4  ;;  %s4398_s26 = int_to_ptr.vmem [resolvable:$true] %s430_s26 }
  0xe2   : > { %s5144_s8 = smov %s5143_s11  ;;  %s4396_s6 = scalar_lea.hbm %s5143_s11, %s2362_s21 }
  0xe3   : > { %p5145_p4 = scmp.lt.s32.totalorder %s3962_s22, 8  ;;  %s3770_s28 = scalar_lea.hbm %s4396_s6, 256 }
  0xe4   : > { %p3771_p5 = scmp.ne.s32.totalorder %s4396_s6, %s3770_s28  ;;  %s3775_s11 = scalar_lea.hbm %s5144_s8, 8192 }
  0xe5   : > { %p4402_p11 = pnand %p5145_p4, %p132_p1  ;;  %p3776_p8 = scmp.lt.u32.totalorder %s4396_s6, %s5144_s8 }
  0xe6   : > { %p3777_p2 = scmp.lt.u32.totalorder %s3775_s11, %s3770_s28  ;;  %p3779_p1 = scmp.lt.u32.totalorder %s3770_s28, %s4396_s6 }
  0xe7   : > { %p3772_p7 = pneg %p4402_p11 }
  0xe8   : > { %p3778_p9 = por %p3777_p2, %p3776_p8 }
  0xe9   : > { %p3773_p10 = pnand %p3772_p7, %p3771_p5 }
  0xea   : > { %p3780_p3 = por %p3779_p1, %p3778_p9 }
  0xeb   : > { %p3774_p0 = pneg %p3773_p10 }
  0xed   : > { %p3781_p12 = pnand %p3780_p3, %p3774_p0 }
  0xef   : > { %3784 = shalt.err (!%p3781_p12)
}
  0xf0   : > { %s3785_s18 = scalar_lea.vmem %s4398_s26, 256  ;;  %s3971_s1 = smov [#allocation8]  }
  0xf1   : > { %p3786_p4 = scmp.ne.s32.totalorder %s4398_s26, %s3785_s18  ;;  %s3790_s24 = sshll.u32 %s3971_s1, 4  ;;  %s3791_s24 = int_to_ptr.vmem [resolvable:$false] %s3790_s24 }
  0xf2   : > { %s3792_s25 = scalar_lea.vmem %s3791_s24, 512  ;;  %p3793_p6 = scmp.lt.s32.totalorder %s4398_s26, %s3791_s24 }
  0xf3   : > { %p3788_p5 = pnand %p3786_p4, %p3772_p7  ;;  %p3794_p8 = scmp.lt.s32.totalorder %s3792_s25, %s3785_s18 }
  0xf5   : > { %p3789_p10 = pneg %p3788_p5  ;;  %p3795_p2 = por %p3794_p8, %p3793_p6 }
  0xf7   : > { %p3796_p9 = pnand %p3795_p2, %p3789_p10 }
  0xf9   : > { %3799 = shalt.err (!%p3796_p9)
}
  0xfa   : > { %3492 = dma.hbm_to_vmem [thread:$0]  (!%p4402_p11), %s4396_s6, 256, %s4398_s26, %s4214_s0, %s5117_s13, %s5117_s13, %s5116_s3  }
  0xfb   : > { %s5147_s29 = sld [smem:[#allocation29_spill]] }
 0x101   : > { %p5148_p7 = scmp.ne.s32.totalorder %s5147_s29, 0 }
 0x102   : > { %s4438_s4 = sand.u32 (!%p5148_p7), 1, %s3938_s16  }
 0x103   : > { %442 = sbr.rel (%p5148_p7) target bundleno = 1665 (0x681), region = 56  ;;  %s2364_s30 = sshll.u32 (!%p5148_p7), %s4438_s4, 6 }
 0x104   : > { %s445_s28 = scalar_lea.sflag (!%p5148_p7), [#allocation4], %s4438_s4  ;;  %s4444_s7 = scalar_lea.vmem (!%p5148_p7), [#allocation3], %s2364_s30 }
 0x10a   : > { %3885 = dma.done.wait (%p4308_p13), %s445_s28, 1024  }
 0x10b   : > { %3887 = vsyncadd (%p4308_p13), %s445_s28, 4294966272  ;;  %s5149_s0 = sld [smem:[#allocation24_spill]]  ;;  %s5150_s3 = sld [smem:[#allocation34_spill]] }
 0x10c   : > { %s453_s13 = sand.u32 1, %s4098_s23  }
 0x10d   : > { %s454_s20 = scalar_lea.sflag [#allocation7], %s453_s13 }
 0x111   : > { %s455_s26 = sand.u32 1, %s5149_s0   ;;  %p5151_p6 = scmp.ne.s32.totalorder %s5150_s3, 0 }
 0x112   : > { %s4452_s6 = sshll.u32 %s455_s26, 4 }
 0x113   : > { %s457_s21 = scalar_lea.vmem [#allocation6], %s4452_s6 }
 0x114   : > { %3889 = dma.done.wait (%p5151_p6), %s454_s20, 256  }
 0x115   : > { %3891 = vsyncadd (%p5151_p6), %s454_s20, 4294967040  ;;  %s5152_s11 = sld [smem:[#allocation22_spill]]  ;;  %p5153_p13 = scmp.ne.s32.totalorder %s5142_s27, 0 }
 0x11b   : > { %s464_s10 = sand.u32 1, %s5152_s11  }
 0x11c   : > { %s4460_s9 = sshll.u32 %s464_s10, 4 }
 0x11d   : > { %s466_s5 = scalar_lea.vmem [#allocation8], %s4460_s9 }
 0x11e   : > { %3893 = dma.done.wait (%p5153_p13), %s454_s20, 256  }
 0x11f   : > { %3895 = vsyncadd (%p5153_p13), %s454_s20, 4294967040  ;;  %p5154_p11 = scmp.eq.s32.totalorder %s4098_s23, 0 }
 0x121   : > { %3897 = dma.done.wait (%p5154_p11), [#allocation10], 20480   ;;  %p5155_p0 = pmov %p5154_p11 }
 0x123   : > { %3899 = vsyncadd (%p5155_p0), [#allocation10], 4294946816  ;;  %p5156_p1 = pmov %p5155_p0 }
 0x124   : > { %p5157_p3 = pmov %p5155_p0 }
 0x125   : > { %3901 = dma.done.wait (%p5156_p1), [#allocation13], 2048  }
 0x126   : > { %3903 = vsyncadd (%p5157_p3), [#allocation13], 4294965248  ;;  %v533_v0 = vld [vmem:[#allocation9] sm:$0xff]  ;;  %v534_v1 = vld [vmem:[#allocation9 + $0x8] sm:$0xff]  ;;  %s5158_s18 = sld [smem:[#allocation41_spill]]  ;;  %s4546_s1 = scalar_lea.vmem [#allocation14], %s2364_s30 }
 0x127   : > { %v535_v2 = vld [vmem:[#allocation9 + $0x10] sm:$0xff]  ;;  %v4475_v3 = vpack.c.bf16 %v534_v1, %v533_v0  ;;  %v536_v4 = vld [vmem:[#allocation9 + $0x18] sm:$0xff]  ;;  %v537_v6 = vld [vmem:[#allocation9 + $0x20] sm:$0xff]  ;;  %s5159_s24 = sld [smem:[#allocation25_spill]] }
 0x128   : > { %v4477_v5 = vpack.c.bf16 %v536_v4, %v535_v2  ;;  %v538_v7 = vld [vmem:[#allocation9 + $0x28] sm:$0xff]  ;;  %v550_v9 = vld [vmem:[%s4444_s7] sm:$0xff]  ;;  %v539_v11 = vld [vmem:[#allocation9 + $0x30] sm:$0xff] }
 0x129   : > { %3062 = vmatprep.subr.bf16.mxu0 %v4475_v3  ;;  %3381 = vmatprep.subr.bf16.mxu1 %v4475_v3  ;;  %v4485_v8 = vpack.c.bf16 %v538_v7, %v537_v6  ;;  %v554_v10 = vld [vmem:[%s4444_s7 + $0x20] sm:$0xff]  ;;  %v540_v12 = vld [vmem:[#allocation9 + $0x38] sm:$0xff]  ;;  %v542_v15 = vld [vmem:[#allocation9 + $0x48] sm:$0xff] }
 0x12a   : > { %3064 = vmatpush3.bf16.msra.mxu0 %v4475_v3  ;;  %3389 = vmatpush3.bf16.msra.mxu1 %v4475_v3  ;;  %v4493_v13 = vpack.c.bf16 %v540_v12, %v539_v11  ;;  %v541_v14 = vld [vmem:[#allocation9 + $0x40] sm:$0xff]  ;;  %v543_v17 = vld [vmem:[#allocation9 + $0x50] sm:$0xff]  ;;  %v544_v18 = vld [vmem:[#allocation9 + $0x58] sm:$0xff] }
 0x12b   : > { %3066 = vmatprep.subr.bf16.mxu0 %v4477_v5  ;;  %3382 = vmatprep.subr.bf16.mxu1 %v4477_v5  ;;  %v4499_v16 = vpack.c.bf16 %v542_v15, %v541_v14  ;;  %v4505_v19 = vpack.c.bf16 %v544_v18, %v543_v17  ;;  %v545_v20 = vld [vmem:[#allocation9 + $0x60] sm:$0xff]  ;;  %v546_v21 = vld [vmem:[#allocation9 + $0x68] sm:$0xff]  ;;  %v547_v23 = vld [vmem:[#allocation9 + $0x70] sm:$0xff] }
 0x12c   : > { %2803 = vmatprep.mubr.f32.mxu0 %v550_v9  ;;  %2809 = vmatprep.mubr.f32.mxu1 %v554_v10  ;;  %v4511_v22 = vpack.c.bf16 %v546_v21, %v545_v20  ;;  %v548_v24 = vld [vmem:[#allocation9 + $0x78] sm:$0xff]  ;;  %v551_v26 = vld [vmem:[%s4444_s7 + $0x8] sm:$0xff]  ;;  %v552_v28 = vld [vmem:[%s4444_s7 + $0x10] sm:$0xff] }
 0x12d   : > { %v4517_v25 = vpack.c.bf16 %v548_v24, %v547_v23  ;;  %v555_v27 = vld [vmem:[%s4444_s7 + $0x28] sm:$0xff]  ;;  %v556_v29 = vld [vmem:[%s4444_s7 + $0x30] sm:$0xff]  ;;  %v553_v30 = vld [vmem:[%s4444_s7 + $0x18] sm:$0xff]  ;;  %p2372_p12 = scmp.ne.s32.totalorder %s5159_s24, 0 }
 0x12e   : > { %3068 = vmatpush3.bf16.msra.mxu0 %v4477_v5  ;;  %3390 = vmatpush3.bf16.msra.mxu1 %v4477_v5  ;;  %v557_v31 = vld [vmem:[%s4444_s7 + $0x38] sm:$0xff]  ;;  %v4534_v32 = vld [vmem:[%s5158_s18] ss:$0 sm:$0xff]  ;;  %v3972_v57 = vmov (!%p2372_p12), 0.0  }
 0x12f   : > { %3070 = vmatprep.subr.bf16.mxu0 %v4485_v8  ;;  %3383 = vmatprep.subr.bf16.mxu1 %v4485_v8  ;;  %689 = vst [vmem:[#allocation2] sm:$0xff] (!%p2372_p12), %v3972_v57  ;;  %690 = vst [vmem:[#allocation2 + $0x8] sm:$0xff] (!%p2372_p12), %v3972_v57 }
 0x132   : > { %3072 = vmatpush3.bf16.msra.mxu0 %v4485_v8  ;;  %3391 = vmatpush3.bf16.msra.mxu1 %v4485_v8 }
 0x133   : > { %3074 = vmatprep.subr.bf16.mxu0 %v4493_v13  ;;  %3384 = vmatprep.subr.bf16.mxu1 %v4493_v13 }
 0x136   : > { %3076 = vmatpush3.bf16.msra.mxu0 %v4493_v13  ;;  %3392 = vmatpush3.bf16.msra.mxu1 %v4493_v13 }
 0x137   : > { %3078 = vmatprep.subr.bf16.mxu0 %v4499_v16  ;;  %3385 = vmatprep.subr.bf16.mxu1 %v4499_v16 }
 0x13a   : > { %3080 = vmatpush3.bf16.msra.mxu0 %v4499_v16  ;;  %3393 = vmatpush3.bf16.msra.mxu1 %v4499_v16 }
 0x13b   : > { %3082 = vmatprep.subr.bf16.mxu0 %v4505_v19  ;;  %3386 = vmatprep.subr.bf16.mxu1 %v4505_v19 }
 0x13e   : > { %3084 = vmatpush3.bf16.msra.mxu0 %v4505_v19  ;;  %3394 = vmatpush3.bf16.msra.mxu1 %v4505_v19 }
 0x13f   : > { %3086 = vmatprep.subr.bf16.mxu0 %v4511_v22  ;;  %3387 = vmatprep.subr.bf16.mxu1 %v4511_v22 }
 0x142   : > { %3088 = vmatpush3.bf16.msra.mxu0 %v4511_v22  ;;  %3395 = vmatpush3.bf16.msra.mxu1 %v4511_v22 }
 0x143   : > { %3090 = vmatprep.subr.bf16.mxu0 %v4517_v25  ;;  %3388 = vmatprep.subr.bf16.mxu1 %v4517_v25 }
 0x146   : > { %3092 = vmatpush3.bf16.msra.mxu0 %v4517_v25  ;;  %3396 = vmatpush3.bf16.msra.mxu1 %v4517_v25 }
 0x149   : > { %2804 = vmatmul.mubr.f32.vlgmr.msra.gmra.mrb[0].mxu0 %v551_v26  ;;  %2810 = vmatmul.mubr.f32.vlgmr.msra.gmra.mrb[0].mxu1 %v555_v27 }
 0x14a   : > { %2806 = vmatprep.mubr.f32.mxu0 %v552_v28  ;;  %2812 = vmatprep.mubr.f32.mxu1 %v556_v29 }
 0x14d   : > { %2807 = vmatmul.mubr.f32.gmra.mrb[2].mxu0 %v553_v30  ;;  %2813 = vmatmul.mubr.f32.gmra.mrb[2].mxu1 %v557_v31 }
 0x21c   : > { %v2805_v33 = vpop.f32.mrb[0].mxu0  ;;  %v2811_v34 = vpop.f32.mrb[0].mxu1 }
 0x21d   : > { %v636_v35 = vadd.f32 %v2805_v33, %v4534_v32  ;;  %v656_v36 = vadd.f32 %v2811_v34, %v4534_v32  ;;  %v630_v37 = vpop.f32.mrb[1].mxu0  ;;  %v650_v38 = vpop.f32.mrb[1].mxu1 }
 0x21e   : > { %v631_v39 = vadd.f32 %v4534_v32, %v630_v37  ;;  %v651_v40 = vadd.f32 %v4534_v32, %v650_v38 }
 0x21f   : > { %v670_v41 = vmax.f32 %v636_v35, 0.0  ;;  %v674_v42 = vmax.f32 %v656_v36, 0.0 }
 0x220   : > { %v669_v43 = vmax.f32 %v631_v39, 0.0  ;;  %v673_v44 = vmax.f32 %v651_v40, 0.0  ;;  %v2808_v45 = vpop.f32.mrb[2].mxu0  ;;  %v2814_v46 = vpop.f32.mrb[2].mxu1  ;;  %688 = sbr.rel (%p2372_p12) target bundleno = 551 (0x227), region = 84 }
 0x221   : > { %678 = vst [vmem:[#allocation2 + $0x18] sm:$0xff] %v670_v41  ;;  %682 = vst [vmem:[#allocation2 + $0x38] sm:$0xff] %v674_v42  ;;  %v646_v47 = vadd.f32 %v2808_v45, %v4534_v32  ;;  %v666_v48 = vadd.f32 %v2814_v46, %v4534_v32  ;;  %v640_v49 = vpop.f32.mrb[3].mxu0  ;;  %v660_v50 = vpop.f32.mrb[3].mxu1 }
 0x222   : > { %677 = vst [vmem:[#allocation2 + $0x10] sm:$0xff] %v669_v43  ;;  %681 = vst [vmem:[#allocation2 + $0x30] sm:$0xff] %v673_v44  ;;  %v641_v51 = vadd.f32 %v4534_v32, %v640_v49  ;;  %v661_v52 = vadd.f32 %v4534_v32, %v660_v50 }
 0x223   : > { %v672_v53 = vmax.f32 %v646_v47, 0.0  ;;  %v676_v54 = vmax.f32 %v666_v48, 0.0 }
 0x224   : > { %v671_v55 = vmax.f32 %v641_v51, 0.0  ;;  %v675_v56 = vmax.f32 %v661_v52, 0.0 }
 0x225   : > { %680 = vst [vmem:[#allocation2 + $0x28] sm:$0xff] %v672_v53  ;;  %684 = vst [vmem:[#allocation2 + $0x48] sm:$0xff] %v676_v54 }
 0x226   : > { %679 = vst [vmem:[#allocation2 + $0x20] sm:$0xff] %v671_v55  ;;  %683 = vst [vmem:[#allocation2 + $0x40] sm:$0xff] %v675_v56 }
 0x227 PF: > { %s5160_s25 = sld [smem:[#allocation25_spill]] }
 0x22d   : > { %p2373_p4 = scmp.le.s32.totalorder %s5160_s25, 0 }
 0x22e   : > { %3094 = vmatprep.subr.bf16.mxu0 (!%p2373_p4), %v4475_v3  ;;  %v695_v58 = vld [vmem:[%s457_s21] sm:$0xff] (!%p2373_p4)  ;;  %v696_v59 = vld [vmem:[%s457_s21 + $0x8] sm:$0xff] (!%p2373_p4) }
 0x22f   : > { %694 = sbr.rel (%p2373_p4) target bundleno = 808 (0x328), region = 88  ;;  %3096 = vmatpush3.bf16.msra.mxu0 (!%p2373_p4), %v4475_v3  ;;  %2847 = vmatprep.mubr.f32.mxu0 (!%p2373_p4), %v695_v58 }
 0x230   : > { %3098 = vmatprep.subr.bf16.mxu0 (!%p2373_p4), %v4477_v5 }
 0x233   : > { %3100 = vmatpush3.bf16.msra.mxu0 (!%p2373_p4), %v4477_v5 }
 0x234   : > { %3102 = vmatprep.subr.bf16.mxu0 (!%p2373_p4), %v4485_v8 }
 0x237   : > { %3104 = vmatpush3.bf16.msra.mxu0 %v4485_v8 }
 0x238   : > { %3106 = vmatprep.subr.bf16.mxu0 %v4493_v13 }
 0x23b   : > { %3108 = vmatpush3.bf16.msra.mxu0 %v4493_v13 }
 0x23c   : > { %3110 = vmatprep.subr.bf16.mxu0 %v4499_v16 }
 0x23f   : > { %3112 = vmatpush3.bf16.msra.mxu0 %v4499_v16 }
 0x240   : > { %3114 = vmatprep.subr.bf16.mxu0 %v4505_v19 }
 0x243   : > { %3116 = vmatpush3.bf16.msra.mxu0 %v4505_v19 }
 0x244   : > { %3118 = vmatprep.subr.bf16.mxu0 %v4511_v22 }
 0x247   : > { %3120 = vmatpush3.bf16.msra.mxu0 %v4511_v22 }
 0x248   : > { %3122 = vmatprep.subr.bf16.mxu0 %v4517_v25 }
 0x24b   : > { %3124 = vmatpush3.bf16.msra.mxu0 %v4517_v25 }
 0x24e   : > { %2848 = vmatmul.mubr.f32.vlgmr.msra.gmra.mrb[0].mxu0 %v696_v59 }
 0x321   : > { %v2849_v60 = vpop.f32.mrb[0].mxu0 }
 0x322   : > { %v769_v61 = vadd.f32 %v2849_v60, %v4534_v32  ;;  %v763_v62 = vpop.f32.mrb[1].mxu0 }
 0x323   : > { %v764_v63 = vadd.f32 %v4534_v32, %v763_v62 }
 0x324   : > { %v773_v0 = vmax.f32 %v769_v61, 0.0 }
 0x325   : > { %v772_v1 = vmax.f32 %v764_v63, 0.0 }
 0x326   : > { %775 = vst [vmem:[#allocation2 + $0x8] sm:$0xff] %v773_v0 }
 0x327   : > { %774 = vst [vmem:[#allocation2] sm:$0xff] %v772_v1 }
 0x328 PF: > { %s5161_s29 = sld [smem:[#allocation25_spill]] }
 0x32e   : > { %p2374_p5 = scmp.ne.s32.totalorder %s5161_s29, 3 }
 0x32f   : > { %v3973_v2 = vmov (!%p2374_p5), 0.0  }
 0x330   : > { %779 = sbr.rel (%p2374_p5) target bundleno = 823 (0x337), region = 92  ;;  %780 = vst [vmem:[#allocation2 + $0x50] sm:$0xff] (!%p2374_p5), %v3973_v2  ;;  %781 = vst [vmem:[#allocation2 + $0x58] sm:$0xff] (!%p2374_p5), %v3973_v2 }
 0x337 PF: > { %s5162_s30 = sld [smem:[#allocation25_spill]] }
 0x33d   : > { %p2375_p10 = scmp.ge.s32.totalorder %s5162_s30, 3 }
 0x33e   : > { %3126 = vmatprep.subr.bf16.mxu0 (!%p2375_p10), %v4475_v3  ;;  %v786_v4 = vld [vmem:[%s466_s5] sm:$0xff] (!%p2375_p10) }
 0x33f   : > { %785 = sbr.rel (%p2375_p10) target bundleno = 1080 (0x438), region = 96  ;;  %3128 = vmatpush3.bf16.msra.mxu0 (!%p2375_p10), %v4475_v3  ;;  %2882 = vmatprep.mubr.f32.mxu0 (!%p2375_p10), %v786_v4  ;;  %v787_v3 = vld [vmem:[%s466_s5 + $0x8] sm:$0xff] (!%p2375_p10) }
 0x340   : > { %3130 = vmatprep.subr.bf16.mxu0 (!%p2375_p10), %v4477_v5 }
 0x343   : > { %3132 = vmatpush3.bf16.msra.mxu0 (!%p2375_p10), %v4477_v5 }
 0x344   : > { %3134 = vmatprep.subr.bf16.mxu0 (!%p2375_p10), %v4485_v8 }
 0x347   : > { %3136 = vmatpush3.bf16.msra.mxu0 %v4485_v8 }
 0x348   : > { %3138 = vmatprep.subr.bf16.mxu0 %v4493_v13 }
 0x34b   : > { %3140 = vmatpush3.bf16.msra.mxu0 %v4493_v13 }
 0x34c   : > { %3142 = vmatprep.subr.bf16.mxu0 %v4499_v16 }
 0x34f   : > { %3144 = vmatpush3.bf16.msra.mxu0 %v4499_v16 }
 0x350   : > { %3146 = vmatprep.subr.bf16.mxu0 %v4505_v19 }
 0x353   : > { %3148 = vmatpush3.bf16.msra.mxu0 %v4505_v19 }
 0x354   : > { %3150 = vmatprep.subr.bf16.mxu0 %v4511_v22 }
 0x357   : > { %3152 = vmatpush3.bf16.msra.mxu0 %v4511_v22 }
 0x358   : > { %3154 = vmatprep.subr.bf16.mxu0 %v4517_v25 }
 0x35b   : > { %3156 = vmatpush3.bf16.msra.mxu0 %v4517_v25 }
 0x35e   : > { %2883 = vmatmul.mubr.f32.vlgmr.msra.gmra.mrb[0].mxu0 %v787_v3 }
 0x431   : > { %v2884_v5 = vpop.f32.mrb[0].mxu0 }
 0x432   : > { %v860_v6 = vadd.f32 %v2884_v5, %v4534_v32  ;;  %v854_v7 = vpop.f32.mrb[1].mxu0 }
 0x433   : > { %v855_v8 = vadd.f32 %v4534_v32, %v854_v7 }
 0x434   : > { %v864_v9 = vmax.f32 %v860_v6, 0.0 }
 0x435   : > { %v863_v10 = vmax.f32 %v855_v8, 0.0 }
 0x436   : > { %866 = vst [vmem:[#allocation2 + $0x58] sm:$0xff] %v864_v9 }
 0x437   : > { %865 = vst [vmem:[#allocation2 + $0x50] sm:$0xff] %v863_v10 }
 0x438 PF: > { %v1247_v11 = vld [vmem:[#allocation11 + $0x200] sm:$0xff]  ;;  %v1248_v12 = vld [vmem:[#allocation11 + $0x208] sm:$0xff]  ;;  %v1249_v20 = vld [vmem:[#allocation11 + $0x210] sm:$0xff]  ;;  %v879_v48 = vlaneseq  ;;  %s5181_s3 = sld [smem:[#allocation43_spill]]  ;;  %s5182_s6 = sld [smem:[#allocation45_spill]] }
 0x439   : > { %v1263_v13 = vld [vmem:[#allocation11 + $0x280] sm:$0xff]  ;;  %v3157_v14 = vpack.c.bf16 %v1248_v12, %v1247_v11  ;;  %v1264_v15 = vld [vmem:[#allocation11 + $0x288] sm:$0xff]  ;;  %v1250_v21 = vld [vmem:[#allocation11 + $0x218] sm:$0xff]  ;;  %s5183_s20 = sld [smem:[#allocation25_spill]]  ;;  %s5184_s21 = sld [smem:[#allocation26_spill]] }
 0x43a   : > { %v1231_v16 = vld [vmem:[#allocation11 + $0x180] sm:$0xff]  ;;  %v1232_v17 = vld [vmem:[#allocation11 + $0x188] sm:$0xff]  ;;  %v3189_v18 = vpack.c.bf16 %v1264_v15, %v1263_v13  ;;  %v1265_v22 = vld [vmem:[#allocation11 + $0x290] sm:$0xff]  ;;  %v3161_v23 = vpack.c.bf16 %v1250_v21, %v1249_v20  ;;  %v4596_v58 = vshrl.u32 %v879_v48, 7  ;;  %s2166_s23 = sshll.u32 %s4546_s1, 4  ;;  %s5185_s24 = sld [smem:[#allocation46_spill]]  ;;  %s4960_s23 = int_to_ptr.vmem [resolvable:$true] %s2166_s23 }
 0x43b   : > { %v3159_v19 = vpack.c.bf16 %v1232_v17, %v1231_v16  ;;  %3158 = vmatprep.subr.bf16.mxu0 %v3157_v14  ;;  %v1266_v24 = vld [vmem:[#allocation11 + $0x298] sm:$0xff]  ;;  %v1233_v25 = vld [vmem:[#allocation11 + $0x190] sm:$0xff]  ;;  %v1251_v29 = vld [vmem:[#allocation11 + $0x220] sm:$0xff]  ;;  %s3800_s29 = scalar_lea.vmem %s4960_s23, 1024  ;;  %p5186_p2 = scmp.ne.s32.totalorder %s5127_s19, 0 }
 0x43c   : > { %v1234_v26 = vld [vmem:[#allocation11 + $0x198] sm:$0xff]  ;;  %3190 = vmatprep.subr.bf16.mxu1 %v3189_v18  ;;  %v3193_v27 = vpack.c.bf16 %v1266_v24, %v1265_v22  ;;  %v1252_v30 = vld [vmem:[#allocation11 + $0x228] sm:$0xff]  ;;  %v1267_v31 = vld [vmem:[#allocation11 + $0x2a0] sm:$0xff]  ;;  %vm1133_vm0 = vcmp.lt.s32.totalorder %v4596_v58, 7  ;;  %v882_v21 = vadd.s32 16, %v4596_v58  ;;  %vm1060_vm1 = vcmp.lt.s32.totalorder %v4596_v58, 1  ;;  %p3801_p8 = scmp.ne.s32.totalorder %s4960_s23, %s3800_s29 }
 0x43d   : > { %3160 = vmatpush3.bf16.msra.mxu0 %v3159_v19  ;;  %v3163_v28 = vpack.c.bf16 %v1234_v26, %v1233_v25  ;;  %3192 = vmatpush3.bf16.msra.mxu1 %v3189_v18  ;;  %v3165_v32 = vpack.c.bf16 %v1252_v30, %v1251_v29  ;;  %v1268_v33 = vld [vmem:[#allocation11 + $0x2a8] sm:$0xff]  ;;  %v1235_v34 = vld [vmem:[#allocation11 + $0x1a0] sm:$0xff]  ;;  %v1253_v37 = vld [vmem:[#allocation11 + $0x230] sm:$0xff]  ;;  %v883_v26 = vadd.s32 24, %v4596_v58  ;;  %s3974_s30 = smov [#allocation14]  }
 0x43e   : > { %3162 = vmatprep.subr.bf16.mxu0 %v3161_v23  ;;  %v1236_v35 = vld [vmem:[#allocation11 + $0x1a8] sm:$0xff]  ;;  %3194 = vmatprep.subr.bf16.mxu1 %v3193_v27  ;;  %v3197_v36 = vpack.c.bf16 %v1268_v33, %v1267_v31  ;;  %v1254_v38 = vld [vmem:[#allocation11 + $0x238] sm:$0xff]  ;;  %v1269_v39 = vld [vmem:[#allocation11 + $0x2b0] sm:$0xff]  ;;  %p3802_p9 = pnand %p3801_p8, %p5186_p2  ;;  %s3804_s28 = sshll.u32 %s3974_s30, 4  ;;  %s3805_s28 = int_to_ptr.vmem [resolvable:$false] %s3804_s28 }
 0x43f   : > { %v1270_v40 = vld [vmem:[#allocation11 + $0x2b8] sm:$0xff]  ;;  %v3167_v41 = vpack.c.bf16 %v1236_v35, %v1235_v34  ;;  %v3169_v42 = vpack.c.bf16 %v1254_v38, %v1253_v37  ;;  %v1237_v43 = vld [vmem:[#allocation11 + $0x1b0] sm:$0xff]  ;;  %v1255_v46 = vld [vmem:[#allocation11 + $0x240] sm:$0xff]  ;;  %v910_v35 = vand.u32 15, %v882_v21  ;;  %v917_v38 = vand.u32 15, %v883_v26  ;;  %s2434_s11 = sshll.u32 %s5183_s20, 3  ;;  %p3807_p6 = scmp.lt.s32.totalorder %s4960_s23, %s3805_s28 }
 0x440   : > { %v1238_v44 = vld [vmem:[#allocation11 + $0x1b8] sm:$0xff]  ;;  %v3201_v45 = vpack.c.bf16 %v1270_v40, %v1269_v39  ;;  %v1256_v47 = vld [vmem:[#allocation11 + $0x248] sm:$0xff]  ;;  %v1271_v49 = vld [vmem:[#allocation11 + $0x2c0] sm:$0xff]  ;;  %v4679_v21 = vadd.s32 48, %v4596_v58  ;;  %s2429_s10 = sshll.u32 %s5184_s21, 5  ;;  %p3803_p7 = pneg %p3802_p9 }
 0x441   : > { %3164 = vmatpush3.bf16.msra.mxu0 %v3163_v28  ;;  %3196 = vmatpush3.bf16.msra.mxu1 %v3193_v27  ;;  %v1272_v50 = vld [vmem:[#allocation11 + $0x2c8] sm:$0xff]  ;;  %v3171_v51 = vpack.c.bf16 %v1238_v44, %v1237_v43  ;;  %v3173_v52 = vpack.c.bf16 %v1256_v47, %v1255_v46  ;;  %v1239_v53 = vld [vmem:[#allocation11 + $0x1c0] sm:$0xff]  ;;  %v1257_v56 = vld [vmem:[#allocation11 + $0x250] sm:$0xff]  ;;  %vm4636_vm2 = vcmp.ne.s32.totalorder %v910_v35, 0  ;;  %vm4647_vm3 = vcmp.ne.s32.totalorder %v917_v38, 15  ;;  %s2163_s9 = sadd.s32 %s2434_s11, %s2429_s10  ;;  %s3806_s0 = scalar_lea.vmem %s3805_s28, 2048 }
 0x442   : > { %3166 = vmatprep.subr.bf16.mxu0 %v3165_v32  ;;  %3198 = vmatprep.subr.bf16.mxu1 %v3197_v36  ;;  %v1240_v54 = vld [vmem:[#allocation11 + $0x1c8] sm:$0xff]  ;;  %v3205_v55 = vpack.c.bf16 %v1272_v50, %v1271_v49  ;;  %v1258_v57 = vld [vmem:[#allocation11 + $0x258] sm:$0xff]  ;;  %v1273_v59 = vld [vmem:[#allocation11 + $0x2d0] sm:$0xff]  ;;  %v885_v50 = vadd.s32 40, %v4596_v58  ;;  %v890_v35 = vadd.s32 80, %v4596_v58  ;;  %s2430_s5 = sshll.u32 %s2163_s9, 7  ;;  %p3808_p13 = scmp.lt.s32.totalorder %s3806_s0, %s3800_s29 }
 0x443   : > { %v1274_v60 = vld [vmem:[#allocation11 + $0x2d8] sm:$0xff]  ;;  %v3175_v61 = vpack.c.bf16 %v1240_v54, %v1239_v53  ;;  %v4598_v62 = vld [vmem:[#allocation2 + $0x10] sm:$0xff]  ;;  %v3177_v0 = vpack.c.bf16 %v1258_v57, %v1257_v56  ;;  %v1259_v6 = vld [vmem:[#allocation11 + $0x260] sm:$0xff]  ;;  %s4958_s25 = scalar_lea.hbm %s5185_s24, %s2430_s5 }
 0x444   : > { %v4600_v63 = vld [vmem:[#allocation2 + $0x18] sm:$0xff]  ;;  %v1241_v1 = vld [vmem:[#allocation11 + $0x1d0] sm:$0xff]  ;;  %v1123_v4 = vrot.slane %v4598_v62, 1  ;;  %v3209_v5 = vpack.c.bf16 %v1274_v60, %v1273_v59  ;;  %v1260_v7 = vld [vmem:[#allocation11 + $0x268] sm:$0xff]  ;;  %1343 = vmatprep.mubr.f32.mxu0 %v4598_v62  ;;  %v1050_v34 = vrot.slane %v4598_v62, 7  ;;  %p3809_p11 = por %p3808_p13, %p3807_p6 }
 0x445   : > { %3168 = vmatpush3.bf16.msra.mxu0 %v3167_v41  ;;  %3200 = vmatpush3.bf16.msra.mxu1 %v3197_v36  ;;  %v1242_v2 = vld [vmem:[#allocation11 + $0x1d8] sm:$0xff]  ;;  %v1124_v3 = vrot.slane %v4600_v63, 1  ;;  %v1275_v8 = vld [vmem:[#allocation11 + $0x2e0] sm:$0xff]  ;;  %v1276_v9 = vld [vmem:[#allocation11 + $0x2e8] sm:$0xff]  ;;  %v3181_v12 = vpack.c.bf16 %v1260_v7, %v1259_v6  ;;  %v1051_v46 = vrot.slane %v4600_v63, 7  ;;  %v887_v6 = vadd.s32 56, %v4596_v58 }
 0x446   : > { %3170 = vmatprep.subr.bf16.mxu0 %v3169_v42  ;;  %3202 = vmatprep.subr.bf16.mxu1 %v3201_v45  ;;  %v3179_v11 = vpack.c.bf16 %v1242_v2, %v1241_v1  ;;  %v1243_v13 = vld [vmem:[#allocation11 + $0x1e0] sm:$0xff]  ;;  %v1244_v14 = vld [vmem:[#allocation11 + $0x1e8] sm:$0xff]  ;;  %v3213_v15 = vpack.c.bf16 %v1276_v9, %v1275_v8  ;;  %v1261_v16 = vld [vmem:[#allocation11 + $0x270] sm:$0xff]  ;;  %p3810_p0 = pnand %p3809_p11, %p3803_p7 }
 0x447   : > { %v4612_v10 = vsel %vm1133_vm0, %v1123_v4, %v1124_v3  ;;  %v1262_v17 = vld [vmem:[#allocation11 + $0x278] sm:$0xff]  ;;  %v1277_v18 = vld [vmem:[#allocation11 + $0x2f0] sm:$0xff]  ;;  %v3183_v20 = vpack.c.bf16 %v1244_v14, %v1243_v13  ;;  %v4616_v25 = vld [vmem:[#allocation2 + $0x8] sm:$0xff] }
 0x448   : > { %2917 = vmatprep.mubr.f32.mxu1 %v4612_v10  ;;  %v1278_v19 = vld [vmem:[#allocation11 + $0x2f8] sm:$0xff]  ;;  %v3185_v22 = vpack.c.bf16 %v1262_v17, %v1261_v16  ;;  %v1245_v23 = vld [vmem:[#allocation11 + $0x1f0] sm:$0xff]  ;;  %v1198_v28 = vld [vmem:[#allocation11 + $0x80] sm:$0xff]  ;;  %v1049_v36 = vrot.slane %v4616_v25, 7 }
 0x449   : > { %3172 = vmatpush3.bf16.msra.mxu0 %v3171_v51  ;;  %3204 = vmatpush3.bf16.msra.mxu1 %v3201_v45  ;;  %v1246_v24 = vld [vmem:[#allocation11 + $0x1f8] sm:$0xff]  ;;  %v3217_v27 = vpack.c.bf16 %v1278_v19, %v1277_v18  ;;  %v1199_v29 = vld [vmem:[#allocation11 + $0x88] sm:$0xff]  ;;  %v4619_v30 = vld [vmem:[#allocation2 + $0x20] sm:$0xff]  ;;  %v884_v45 = vadd.s32 32, %v4596_v58 }
 0x44a   : > { %3174 = vmatprep.subr.bf16.mxu0 %v3173_v52  ;;  %3206 = vmatprep.subr.bf16.mxu1 %v3205_v55  ;;  %v1214_v31 = vld [vmem:[#allocation11 + $0x100] sm:$0xff]  ;;  %v1215_v32 = vld [vmem:[#allocation11 + $0x108] sm:$0xff]  ;;  %v3187_v33 = vpack.c.bf16 %v1246_v24, %v1245_v23  ;;  %v3221_v37 = vpack.c.bf16 %v1199_v29, %v1198_v28  ;;  %v1125_v39 = vrot.slane %v4619_v30, 1  ;;  %v1200_v43 = vld [vmem:[#allocation11 + $0x90] sm:$0xff]  ;;  %v4634_v51 = vsel %vm1060_vm1, %v1049_v36, %v1050_v34 }
 0x44b   : > { %v1182_v40 = vld [vmem:[#allocation11] sm:$0xff]  ;;  %v1183_v41 = vld [vmem:[#allocation11 + $0x8] sm:$0xff]  ;;  %v3253_v42 = vpack.c.bf16 %v1215_v32, %v1214_v31  ;;  %v1201_v44 = vld [vmem:[#allocation11 + $0x98] sm:$0xff]  ;;  %v1052_v14 = vrot.slane %v4619_v30, 7  ;;  %v945_v28 = vand.u32 15, %v887_v6  ;;  %v889_v29 = vadd.s32 72, %v4596_v58 }
 0x44c   : > { %v1216_v47 = vld [vmem:[#allocation11 + $0x110] sm:$0xff]  ;;  %v1217_v48 = vld [vmem:[#allocation11 + $0x118] sm:$0xff]  ;;  %v4627_v49 = vld [vmem:[#allocation2 + $0x28] sm:$0xff]  ;;  %v3223_v53 = vpack.c.bf16 %v1183_v41, %v1182_v40  ;;  %v3225_v60 = vpack.c.bf16 %v1201_v44, %v1200_v43 }
 0x44d   : > { %3176 = vmatpush3.bf16.msra.mxu0 %v3175_v61  ;;  %3208 = vmatpush3.bf16.msra.mxu1 %v3205_v55  ;;  %v1126_v54 = vrot.slane %v4627_v49, 1  ;;  %v4645_v55 = vsel %vm1133_vm0, %v1124_v3, %v1125_v39  ;;  %v1184_v57 = vld [vmem:[#allocation11 + $0x10] sm:$0xff]  ;;  %v1185_v59 = vld [vmem:[#allocation11 + $0x18] sm:$0xff]  ;;  %v3257_v61 = vpack.c.bf16 %v1217_v48, %v1216_v47  ;;  %v1202_v1 = vld [vmem:[#allocation11 + $0xa0] sm:$0xff]  ;;  %v4661_v3 = vsel %vm1060_vm1, %v1050_v34, %v1051_v46 }
 0x44e   : > { %3178 = vmatprep.subr.bf16.mxu0 %v3177_v0  ;;  %3210 = vmatprep.subr.bf16.mxu1 %v3209_v5  ;;  %v924_v0 = vand.u32 15, %v884_v45  ;;  %v1203_v2 = vld [vmem:[#allocation11 + $0xa8] sm:$0xff]  ;;  %v1218_v7 = vld [vmem:[#allocation11 + $0x120] sm:$0xff]  ;;  %v4663_v9 = vld [vmem:[#allocation2 + $0x38] sm:$0xff]  ;;  %v3227_v13 = vpack.c.bf16 %v1185_v59, %v1184_v57  ;;  %v1053_v31 = vrot.slane %v4627_v49, 7  ;;  %v4705_v38 = vsel %vm1060_vm1, %v1051_v46, %v1052_v14 }
 0x44f   : > { %v1219_v8 = vld [vmem:[#allocation11 + $0x128] sm:$0xff]  ;;  %v4674_v16 = vld [vmem:[#allocation2 + $0x40] sm:$0xff]  ;;  %v1128_v17 = vrot.slane %v4663_v9, 1  ;;  %v3229_v18 = vpack.c.bf16 %v1203_v2, %v1202_v1  ;;  %v1204_v26 = vld [vmem:[#allocation11 + $0xb0] sm:$0xff]  ;;  %v938_v46 = vand.u32 15, %v4679_v21  ;;  %vm4720_vm6 = vcmp.ne.s32.totalorder %v945_v28, 15 }
 0x450   : > { %v1186_v19 = vld [vmem:[#allocation11 + $0x20] sm:$0xff]  ;;  %vm4683_vm4 = vcmp.ne.s32.totalorder %v924_v0, 0  ;;  %v3261_v24 = vpack.c.bf16 %v1219_v8, %v1218_v7  ;;  %v1220_v32 = vld [vmem:[#allocation11 + $0x130] sm:$0xff]  ;;  %v1189_v45 = vld [vmem:[#allocation11 + $0x38] sm:$0xff]  ;;  %v959_v57 = vand.u32 15, %v889_v29  ;;  %v4731_v59 = vsel %vm1060_vm1, %v1052_v14, %v1053_v31 }
 0x451   : > { %3180 = vmatpush3.bf16.msra.mxu0 %v3179_v11  ;;  %3212 = vmatpush3.bf16.msra.mxu1 %v3209_v5  ;;  %v4651_v5 = vld [vmem:[#allocation2 + $0x30] sm:$0xff]  ;;  %v931_v11 = vand.u32 15, %v885_v50  ;;  %v4714_v47 = vld [vmem:[#allocation2] sm:$0xff]  ;;  %v1122_v2 = vrot.slane %v4616_v25, 1  ;;  %v1191_v14 = vld [vmem:[#allocation11 + $0x48] sm:$0xff]  ;;  %vm4751_vm7 = vcmp.ne.s32.totalorder %v938_v46, 0 }
 0x452   : > { %3182 = vmatprep.subr.bf16.mxu0 %v3181_v12  ;;  %3214 = vmatprep.subr.bf16.mxu1 %v3213_v15  ;;  %v1127_v12 = vrot.slane %v4651_v5, 1  ;;  %v1188_v44 = vld [vmem:[#allocation11 + $0x30] sm:$0xff]  ;;  %v1206_v50 = vld [vmem:[#allocation11 + $0xc0] sm:$0xff]  ;;  %v1054_v7 = vrot.slane %v4651_v5, 7  ;;  %vm4763_vm8 = vcmp.ne.s32.totalorder %v959_v57, 15  ;;  %v1056_v57 = vrot.slane %v4674_v16, 7 }
 0x453   : > { %vm4695_vm5 = vcmp.ne.s32.totalorder %v931_v11, 15  ;;  %v3235_v6 = vpack.c.bf16 %v1189_v45, %v1188_v44  ;;  %v5081_v11 = vrot.slane %v4714_v47, 1  ;;  %v1224_v21 = vld [vmem:[#allocation11 + $0x150] sm:$0xff]  ;;  %v1210_v45 = vld [vmem:[#allocation11 + $0xe0] sm:$0xff]  ;;  %v1743_v52 = vld [vmem:[#allocation11 + $0x458] sm:$0xff] }
 0x454   : > { %v4693_v34 = vsel %vm1133_vm0, %v1126_v54, %v1127_v12  ;;  %v4709_v40 = vsel %vm1133_vm0, %v1127_v12, %v1128_v17  ;;  %v4772_v29 = vsel %vm1060_vm1, %v1053_v31, %v1054_v7  ;;  %v1211_v31 = vld [vmem:[#allocation11 + $0xe8] sm:$0xff]  ;;  %v1226_v46 = vld [vmem:[#allocation11 + $0x160] sm:$0xff]  ;;  %v1996_v28 = vld [vmem:[#allocation12 + $0x38] sm:$0xff] }
 0x455   : > { %3184 = vmatpush3.bf16.msra.mxu0 %v3183_v20  ;;  %3216 = vmatpush3.bf16.msra.mxu1 %v3213_v15  ;;  %v4672_v15 = vsel %vm1133_vm0, %v1125_v39, %v1126_v54  ;;  %v1187_v20 = vld [vmem:[#allocation11 + $0x28] sm:$0xff] }
 0x456   : > { %3186 = vmatprep.subr.bf16.mxu0 %v3185_v22  ;;  %3218 = vmatprep.subr.bf16.mxu1 %v3217_v27  ;;  %v4681_v22 = vld [vmem:[#allocation2 + $0x48] sm:$0xff]  ;;  %v3231_v39 = vpack.c.bf16 %v1187_v20, %v1186_v19  ;;  %v1209_v19 = vld [vmem:[#allocation11 + $0xd8] sm:$0xff] }
 0x457   : > { %v1130_v41 = vrot.slane %v4681_v22, 1  ;;  %v1990_v54 = vld [vmem:[#allocation12 + $0x8] sm:$0xff] }
 0x458   : > { %v1994_v20 = vld [vmem:[#allocation12 + $0x28] sm:$0xff] }
 0x459   : > { %3188 = vmatpush3.bf16.msra.mxu0 %v3187_v33  ;;  %3220 = vmatpush3.bf16.msra.mxu1 %v3217_v27  ;;  %v1205_v27 = vld [vmem:[#allocation11 + $0xb8] sm:$0xff] }
 0x45a   : > { %3222 = vmatprep.subr.bf16.mxu0 %v3221_v37  ;;  %3254 = vmatprep.subr.bf16.mxu1 %v3253_v42  ;;  %v1221_v33 = vld [vmem:[#allocation11 + $0x138] sm:$0xff]  ;;  %v1129_v37 = vrot.slane %v4674_v16, 1  ;;  %v3233_v43 = vpack.c.bf16 %v1205_v27, %v1204_v26  ;;  %v888_v26 = vadd.s32 64, %v4596_v58 }
 0x45b   : > { %v3265_v48 = vpack.c.bf16 %v1221_v33, %v1220_v32  ;;  %v1055_v33 = vrot.slane %v4663_v9, 7 }
 0x45c   : > { %2377 = vmatmul.mubr.msk.f32.vlgmr.msra.gmra.mrb[0].mxu0 %vm4636_vm2, %v4634_v51  ;;  %2918 = vmatmul.mubr.msk.f32.vlgmr.msra.gmra.mrb[0].mxu1 %vm4647_vm3, %v4645_v55  ;;  %v4736_v0 = vsel %vm1133_vm0, %v1128_v17, %v1129_v37  ;;  %v4744_v8 = vsel %vm1133_vm0, %v1129_v37, %v1130_v41  ;;  %v1144_v37 = vsel %vm1133_vm0, %v5081_v11, %v1122_v2  ;;  %v1719_v11 = vld [vmem:[#allocation11 + $0x398] sm:$0xff] }
 0x45d   : > { %3224 = vmatpush3.bf16.msra.mxu0 %v3223_v53  ;;  %3256 = vmatpush3.bf16.msra.mxu1 %v3253_v42  ;;  %v4712_v42 = vld [vmem:[#allocation2 + $0x50] sm:$0xff]  ;;  %v1207_v53 = vld [vmem:[#allocation11 + $0xc8] sm:$0xff] }
 0x45e   : > { %1348 = vmatprep.mubr.f32.mxu0 %v4600_v63  ;;  %3226 = vmatprep.subr.bf16.mxu0 %v3225_v60  ;;  %v1222_v60 = vld [vmem:[#allocation11 + $0x140] sm:$0xff]  ;;  %v5082_v1 = vrot.slane %v4712_v42, 1  ;;  %v3237_v12 = vpack.c.bf16 %v1207_v53, %v1206_v50  ;;  %v1227_v50 = vld [vmem:[#allocation11 + $0x168] sm:$0xff]  ;;  %v5179_v23 = vrot.slane %v4712_v42, 1 }
 0x45f   : > { %3258 = vmatprep.subr.bf16.mxu1 %v3257_v61  ;;  %2920 = vmatprep.mubr.f32.mxu1 %v4672_v15 }
 0x460   : > { %1349 = vmatmul.mubr.f32.gmra.mrb[2].mxu0 %v4661_v3  ;;  %2921 = vmatmul.mubr.msk.f32.gmra.mrb[2].mxu1 %vm4695_vm5, %v4693_v34  ;;  %v4761_v27 = vsel %vm1133_vm0, %v1130_v41, %v5082_v1  ;;  %v1192_v41 = vld [vmem:[#allocation11 + $0x50] sm:$0xff] }
 0x461   : > { %3228 = vmatpush3.bf16.msra.mxu0 %v3227_v13  ;;  %1353 = vmatprep.mubr.f32.mxu0 %v4619_v30  ;;  %v1190_v13 = vld [vmem:[#allocation11 + $0x40] sm:$0xff]  ;;  %v1734_v1 = vld [vmem:[#allocation11 + $0x410] sm:$0xff] }
 0x462   : > { %3260 = vmatpush3.bf16.msra.mxu1 %v3257_v61  ;;  %3230 = vmatprep.subr.bf16.mxu0 %v3229_v18  ;;  %v1223_v61 = vld [vmem:[#allocation11 + $0x148] sm:$0xff]  ;;  %v1208_v18 = vld [vmem:[#allocation11 + $0xd0] sm:$0xff]  ;;  %v3239_v32 = vpack.c.bf16 %v1191_v14, %v1190_v13  ;;  %v3277_v13 = vpack.c.bf16 %v1227_v50, %v1226_v46  ;;  %v896_v46 = vand.u32 15, %v4596_v58  ;;  %v1732_v50 = vld [vmem:[#allocation11 + $0x400] sm:$0xff] }
 0x463   : > { %3262 = vmatprep.subr.bf16.mxu1 %v3261_v24  ;;  %2923 = vmatprep.mubr.f32.mxu1 %v4709_v40  ;;  %v3269_v17 = vpack.c.bf16 %v1223_v61, %v1222_v60  ;;  %v952_v60 = vand.u32 15, %v888_v26  ;;  %v3245_v61 = vpack.c.bf16 %v1211_v31, %v1210_v45  ;;  %v1212_v14 = vld [vmem:[#allocation11 + $0xf0] sm:$0xff]  ;;  %v1057_v26 = vrot.slane %v4681_v22, 7  ;;  %v1717_v31 = vld [vmem:[#allocation11 + $0x388] sm:$0xff] }
 0x464   : > { %2379 = vmatmul.mubr.msk.f32.gmra.mrb[4].mxu0 %vm4683_vm4, %v4705_v38  ;;  %2924 = vmatmul.mubr.msk.f32.gmra.mrb[4].mxu1 %vm4720_vm6, %v4736_v0  ;;  %vm2435_vm10 = vcmp.ne.s32.totalorder %v896_v46, 0  ;;  %v1736_v46 = vld [vmem:[#allocation11 + $0x420] sm:$0xff] }
 0x465   : > { %3232 = vmatpush3.bf16.msra.mxu0 %v3231_v39  ;;  %1358 = vmatprep.mubr.f32.mxu0 %v4627_v49  ;;  %v3241_v39 = vpack.c.bf16 %v1209_v19, %v1208_v18  ;;  %v1213_v18 = vld [vmem:[#allocation11 + $0xf8] sm:$0xff]  ;;  %v1228_v19 = vld [vmem:[#allocation11 + $0x170] sm:$0xff]  ;;  %vm4799_vm9 = vcmp.ne.s32.totalorder %v952_v60, 0 }
 0x466   : > { %3264 = vmatpush3.bf16.msra.mxu1 %v3261_v24  ;;  %3234 = vmatprep.subr.bf16.mxu0 %v3233_v43  ;;  %v1225_v24 = vld [vmem:[#allocation11 + $0x158] sm:$0xff] }
 0x467   : > { %3266 = vmatprep.subr.bf16.mxu1 %v3265_v48  ;;  %2926 = vmatprep.mubr.f32.mxu1 %v4744_v8  ;;  %v1193_v43 = vld [vmem:[#allocation11 + $0x58] sm:$0xff]  ;;  %v3273_v44 = vpack.c.bf16 %v1225_v24, %v1224_v21 }
 0x468   : > { %1359 = vmatmul.mubr.f32.gmra.mrb[6].mxu0 %v4731_v59  ;;  %2927 = vmatmul.mubr.msk.f32.gmra.mrb[6].mxu1 %vm4763_vm8, %v4761_v27  ;;  %v3243_v53 = vpack.c.bf16 %v1193_v43, %v1192_v41  ;;  %v1229_v21 = vld [vmem:[#allocation11 + $0x178] sm:$0xff]  ;;  %v881_v43 = vadd.s32 8, %v4596_v58 }
 0x469   : > { %3236 = vmatpush3.bf16.msra.mxu0 %v3235_v6  ;;  %1363 = vmatprep.mubr.f32.mxu0 %v4651_v5  ;;  %v1194_v6 = vld [vmem:[#allocation11 + $0x60] sm:$0xff]  ;;  %v4804_v41 = vld [vmem:[#allocation2 + $0x58] sm:$0xff]  ;;  %v3281_v45 = vpack.c.bf16 %v1229_v21, %v1228_v19  ;;  %v1701_v19 = vld [vmem:[#allocation11 + $0x308] sm:$0xff] }
 0x46a   : > { %3268 = vmatpush3.bf16.msra.mxu1 %v3265_v48  ;;  %3238 = vmatprep.subr.bf16.mxu0 %v3237_v12  ;;  %v4790_v48 = vsel %vm1060_vm1, %v1054_v7, %v1055_v33  ;;  %v1195_v12 = vld [vmem:[#allocation11 + $0x68] sm:$0xff]  ;;  %v4797_v7 = vsel %vm1060_vm1, %v1055_v33, %v1056_v57  ;;  %v1716_v33 = vld [vmem:[#allocation11 + $0x380] sm:$0xff] }
 0x46b   : > { %3270 = vmatprep.subr.bf16.mxu1 %v3269_v17  ;;  %2961 = vmatprep.mubr.f32.mxu1 %v1144_v37  ;;  %v3247_v24 = vpack.c.bf16 %v1195_v12, %v1194_v6  ;;  %v1196_v37 = vld [vmem:[#allocation11 + $0x70] sm:$0xff]  ;;  %v1059_v6 = vrot.slane %v4804_v41, 7  ;;  %v3285_v12 = vpack.c.bf16 %v1717_v31, %v1716_v33 }
 0x46c   : > { %2381 = vmatmul.mubr.msk.f32.gmra.mrb[8].mxu0 %vm4751_vm7, %v4772_v29 }
 0x46d   : > { %3240 = vmatpush3.bf16.msra.mxu0 %v3239_v32  ;;  %1368 = vmatprep.mubr.f32.mxu0 %v4663_v9  ;;  %v3249_v32 = vpack.c.bf16 %v1213_v18, %v1212_v14  ;;  %v903_v14 = vand.u32 15, %v881_v43  ;;  %v1700_v18 = vld [vmem:[#allocation11 + $0x300] sm:$0xff]  ;;  %v1703_v43 = vld [vmem:[#allocation11 + $0x318] sm:$0xff] }
 0x46e   : > { %3272 = vmatpush3.bf16.msra.mxu1 %v3269_v17  ;;  %3242 = vmatprep.subr.bf16.mxu0 %v3241_v39  ;;  %v1197_v39 = vld [vmem:[#allocation11 + $0x78] sm:$0xff] }
 0x46f   : > { %3274 = vmatprep.subr.bf16.mxu1 %v3273_v44  ;;  %v3251_v60 = vpack.c.bf16 %v1197_v39, %v1196_v37  ;;  %v1143_v37 = vsel %vm1133_vm0, %v1122_v2, %v1123_v4  ;;  %vm2436_vm11 = vcmp.ne.s32.totalorder %v903_v14, 15  ;;  %v1702_v39 = vld [vmem:[#allocation11 + $0x310] sm:$0xff]  ;;  %v1704_v2 = vld [vmem:[#allocation11 + $0x320] sm:$0xff] }
 0x470   : > { %1369 = vmatmul.mubr.f32.gmra.mrb[10].mxu0 %v4790_v48  ;;  %v1722_v14 = vld [vmem:[#allocation11 + $0x3b0] sm:$0xff] }
 0x471   : > { %3244 = vmatpush3.bf16.msra.mxu0 %v3243_v53  ;;  %1373 = vmatprep.mubr.f32.mxu0 %v4674_v16  ;;  %v4816_v53 = vsel %vm1060_vm1, %v1056_v57, %v1057_v26  ;;  %v1735_v57 = vld [vmem:[#allocation11 + $0x418] sm:$0xff] }
 0x472   : > { %3276 = vmatpush3.bf16.msra.mxu1 %v3273_v44  ;;  %3246 = vmatprep.subr.bf16.mxu0 %v3245_v61  ;;  %v1733_v44 = vld [vmem:[#allocation11 + $0x408] sm:$0xff]  ;;  %v1048_v61 = vrot.slane %v4714_v47, 7  ;;  %v3321_v31 = vpack.c.bf16 %v1735_v57, %v1734_v1 }
 0x473   : > { %3278 = vmatprep.subr.bf16.mxu1 %v3277_v13  ;;  %v3317_v21 = vpack.c.bf16 %v1733_v44, %v1732_v50  ;;  %v1720_v50 = vld [vmem:[#allocation11 + $0x3a0] sm:$0xff]  ;;  %v1721_v44 = vld [vmem:[#allocation11 + $0x3a8] sm:$0xff] }
 0x474   : > { %2383 = vmatmul.mubr.msk.f32.gmra.mrb[12].mxu0 %vm4799_vm9, %v4797_v7  ;;  %v3293_v4 = vpack.c.bf16 %v1721_v44, %v1720_v50  ;;  %v1710_v44 = vld [vmem:[#allocation11 + $0x350] sm:$0xff] }
 0x475   : > { %3248 = vmatpush3.bf16.msra.mxu0 %v3247_v24  ;;  %1378 = vmatprep.mubr.f32.mxu0 %v4681_v22  ;;  %v1718_v24 = vld [vmem:[#allocation11 + $0x390] sm:$0xff] }
 0x476   : > { %3280 = vmatpush3.bf16.msra.mxu1 %v3277_v13  ;;  %3250 = vmatprep.subr.bf16.mxu0 %v3249_v32  ;;  %v1072_v13 = vsel %vm1060_vm1, %v1059_v6, %v1048_v61  ;;  %v3287_v32 = vpack.c.bf16 %v1701_v19, %v1700_v18  ;;  %v3289_v33 = vpack.c.bf16 %v1719_v11, %v1718_v24  ;;  %v1705_v11 = vld [vmem:[#allocation11 + $0x328] sm:$0xff]  ;;  %v1723_v18 = vld [vmem:[#allocation11 + $0x3b8] sm:$0xff]  ;;  %v1738_v19 = vld [vmem:[#allocation11 + $0x430] sm:$0xff] }
 0x477   : > { %3282 = vmatprep.subr.bf16.mxu1 %v3281_v45  ;;  %v1739_v24 = vld [vmem:[#allocation11 + $0x438] sm:$0xff] }
 0x478   : > { %1379 = vmatmul.mubr.f32.gmra.mrb[14].mxu0 %v4816_v53  ;;  %v3329_v57 = vpack.c.bf16 %v1739_v24, %v1738_v19  ;;  %v1730_v19 = vld [vmem:[#allocation11 + $0x3f0] sm:$0xff]  ;;  %v1731_v24 = vld [vmem:[#allocation11 + $0x3f8] sm:$0xff] }
 0x479   : > { %3252 = vmatpush3.bf16.msra.mxu0 %v3251_v60  ;;  %1553 = vmatprep.mubr.f32.mxu0 %v4714_v47  ;;  %v1737_v60 = vld [vmem:[#allocation11 + $0x428] sm:$0xff] }
 0x47a   : > { %3284 = vmatpush3.bf16.msra.mxu1 %v3281_v45  ;;  %3286 = vmatprep.subr.bf16.mxu0 %v3285_v12  ;;  %v1071_v45 = vsel %vm1060_vm1, %v1048_v61, %v1049_v36  ;;  %v3291_v12 = vpack.c.bf16 %v1703_v43, %v1702_v39  ;;  %v3325_v1 = vpack.c.bf16 %v1737_v60, %v1736_v46  ;;  %v1706_v61 = vld [vmem:[#allocation11 + $0x330] sm:$0xff]  ;;  %v1708_v43 = vld [vmem:[#allocation11 + $0x340] sm:$0xff]  ;;  %v1711_v46 = vld [vmem:[#allocation11 + $0x358] sm:$0xff] }
 0x47b   : > { %3318 = vmatprep.subr.bf16.mxu1 %v3317_v21  ;;  %v3295_v36 = vpack.c.bf16 %v1705_v11, %v1704_v2  ;;  %v3307_v2 = vpack.c.bf16 %v1711_v46, %v1710_v44 }
 0x47c   : > { %2393 = vmatmul.mubr.msk.f32.vlgmr.msra.gmra.mrb[16].mxu0 %vm2435_vm10, %v1072_v13  ;;  %v1724_v13 = vld [vmem:[#allocation11 + $0x3c0] sm:$0xff] }
 0x47d   : > { %2962 = vmatmul.mubr.msk.f32.vlgmr.msra.gmra.mrb[0].mxu1 %vm2436_vm11, %v1143_v37  ;;  %3288 = vmatpush3.bf16.msra.mxu0 %v3287_v32  ;;  %v1725_v32 = vld [vmem:[#allocation11 + $0x3c8] sm:$0xff] }
 0x47e   : > { %3320 = vmatpush3.bf16.msra.mxu1 %v3317_v21  ;;  %1558 = vmatprep.mubr.f32.mxu0 %v4616_v25  ;;  %v3297_v25 = vpack.c.bf16 %v1723_v18, %v1722_v14  ;;  %v1707_v21 = vld [vmem:[#allocation11 + $0x338] sm:$0xff]  ;;  %v3301_v39 = vpack.c.bf16 %v1725_v32, %v1724_v13  ;;  %v1713_v14 = vld [vmem:[#allocation11 + $0x368] sm:$0xff] }
 0x47f   : > { %3290 = vmatprep.subr.bf16.mxu0 %v3289_v33  ;;  %3322 = vmatprep.subr.bf16.mxu1 %v3321_v31  ;;  %v3299_v37 = vpack.c.bf16 %v1707_v21, %v1706_v61  ;;  %v1709_v33 = vld [vmem:[#allocation11 + $0x348] sm:$0xff]  ;;  %v3313_v61 = vpack.c.bf16 %v1731_v24, %v1730_v19  ;;  %v1714_v21 = vld [vmem:[#allocation11 + $0x370] sm:$0xff] }
 0x480   : > { %1559 = vmatmul.mubr.f32.gmra.mrb[18].mxu0 %v1071_v45  ;;  %2964 = vmatprep.mubr.f32.mxu1 %v4612_v10  ;;  %v1740_v10 = vld [vmem:[#allocation11 + $0x440] sm:$0xff] }
 0x481   : > { %3292 = vmatpush3.bf16.msra.mxu0 %v3291_v12  ;;  %1563 = vmatprep.mubr.f32.mxu0 %v4598_v62  ;;  %v1741_v62 = vld [vmem:[#allocation11 + $0x448] sm:$0xff]  ;;  %v1728_v45 = vld [vmem:[#allocation11 + $0x3e0] sm:$0xff] }
 0x482   : > { %3324 = vmatpush3.bf16.msra.mxu1 %v3321_v31  ;;  %3294 = vmatprep.subr.bf16.mxu0 %v3293_v4  ;;  %v3333_v56 = vpack.c.bf16 %v1741_v62, %v1740_v10  ;;  %v1727_v31 = vld [vmem:[#allocation11 + $0x3d8] sm:$0xff]  ;;  %v1729_v12 = vld [vmem:[#allocation11 + $0x3e8] sm:$0xff]  ;;  %v891_v10 = vadd.s32 88, %v4596_v58  ;;  %v1132_v62 = vrot.slane %v4804_v41, 1  ;;  %v1995_v58 = vld [vmem:[#allocation12 + $0x30] sm:$0xff] }
 0x483   : > { %3326 = vmatprep.subr.bf16.mxu1 %v3325_v1  ;;  %2965 = vmatmul.mubr.msk.f32.gmra.mrb[2].mxu1 %vm4647_vm3, %v4645_v55  ;;  %v1726_v55 = vld [vmem:[#allocation11 + $0x3d0] sm:$0xff]  ;;  %v1745_v4 = vld [vmem:[#allocation11 + $0x468] sm:$0xff]  ;;  %v3309_v11 = vpack.c.bf16 %v1729_v12, %v1728_v45 }
 0x484   : > { %2395 = vmatmul.mubr.msk.f32.gmra.mrb[20].mxu0 %vm4636_vm2, %v4634_v51  ;;  %2967 = vmatprep.mubr.f32.mxu1 %v4672_v15  ;;  %v1742_v51 = vld [vmem:[#allocation11 + $0x450] sm:$0xff]  ;;  %v3305_v50 = vpack.c.bf16 %v1727_v31, %v1726_v55 }
 0x485   : > { %3296 = vmatpush3.bf16.msra.mxu0 %v3295_v36  ;;  %1568 = vmatprep.mubr.f32.mxu0 %v4600_v63  ;;  %v3303_v63 = vpack.c.bf16 %v1709_v33, %v1708_v43  ;;  %v3337_v60 = vpack.c.bf16 %v1743_v52, %v1742_v51  ;;  %v1746_v36 = vld [vmem:[#allocation11 + $0x470] sm:$0xff]  ;;  %v2004_v33 = vld [vmem:[#allocation12 + $0x78] sm:$0xff] }
 0x486   : > { %3328 = vmatpush3.bf16.msra.mxu1 %v3325_v1  ;;  %3298 = vmatprep.subr.bf16.mxu0 %v3297_v25  ;;  %v1712_v1 = vld [vmem:[#allocation11 + $0x360] sm:$0xff]  ;;  %v1747_v25 = vld [vmem:[#allocation11 + $0x478] sm:$0xff]  ;;  %v2003_v43 = vld [vmem:[#allocation12 + $0x70] sm:$0xff] }
 0x487   : > { %3330 = vmatprep.subr.bf16.mxu1 %v3329_v57  ;;  %2968 = vmatmul.mubr.msk.f32.gmra.mrb[4].mxu1 %vm4695_vm5, %v4693_v34  ;;  %v3345_v13 = vpack.c.bf16 %v1747_v25, %v1746_v36 }
 0x488   : > { %1569 = vmatmul.mubr.f32.gmra.mrb[22].mxu0 %v4661_v3  ;;  %2970 = vmatprep.mubr.f32.mxu1 %v4709_v40  ;;  %v1744_v3 = vld [vmem:[#allocation11 + $0x460] sm:$0xff] }
 0x489   : > { %3300 = vmatpush3.bf16.msra.mxu0 %v3299_v37  ;;  %1573 = vmatprep.mubr.f32.mxu0 %v4619_v30  ;;  %v3341_v18 = vpack.c.bf16 %v1745_v4, %v1744_v3  ;;  %v2002_v37 = vld [vmem:[#allocation12 + $0x68] sm:$0xff] }
 0x48a   : > { %3332 = vmatpush3.bf16.msra.mxu1 %v3329_v57  ;;  %3302 = vmatprep.subr.bf16.mxu0 %v3301_v39  ;;  %v1715_v57 = vld [vmem:[#allocation11 + $0x378] sm:$0xff] }
 0x48b   : > { %3334 = vmatprep.subr.bf16.mxu1 %v3333_v56  ;;  %2971 = vmatmul.mubr.msk.f32.gmra.mrb[6].mxu1 %vm4720_vm6, %v4736_v0  ;;  %v3315_v32 = vpack.c.bf16 %v1715_v57, %v1714_v21 }
 0x48c   : > { %2397 = vmatmul.mubr.msk.f32.gmra.mrb[24].mxu0 %vm4683_vm4, %v4705_v38  ;;  %3005 = vmatprep.mubr.f32.mxu1 %v4672_v15  ;;  %v3311_v15 = vpack.c.bf16 %v1713_v14, %v1712_v1 }
 0x48d   : > { %3304 = vmatpush3.bf16.msra.mxu0 %v3303_v63  ;;  %1578 = vmatprep.mubr.f32.mxu0 %v4627_v49 }
 0x48e   : > { %3336 = vmatpush3.bf16.msra.mxu1 %v3333_v56  ;;  %3306 = vmatprep.subr.bf16.mxu0 %v3305_v50  ;;  %v3377_v56 = vpack.c.bf16 %v2004_v33, %v2003_v43 }
 0x48f   : > { %3338 = vmatprep.subr.bf16.mxu1 %v3337_v60 }
 0x490   : > { %1579 = vmatmul.mubr.f32.gmra.mrb[26].mxu0 %v4731_v59 }
 0x491   : > { %3308 = vmatpush3.bf16.msra.mxu0 %v3307_v2  ;;  %1583 = vmatprep.mubr.f32.mxu0 %v4651_v5 }
 0x492   : > { %3340 = vmatpush3.bf16.msra.mxu1 %v3337_v60  ;;  %3310 = vmatprep.subr.bf16.mxu0 %v3309_v11 }
 0x493   : > { %3342 = vmatprep.subr.bf16.mxu1 %v3341_v18 }
 0x494   : > { %2399 = vmatmul.mubr.msk.f32.gmra.mrb[28].mxu0 %vm4751_vm7, %v4772_v29 }
 0x495   : > { %3312 = vmatpush3.bf16.msra.mxu0 %v3311_v15  ;;  %1588 = vmatprep.mubr.f32.mxu0 %v4663_v9 }
 0x496   : > { %3344 = vmatpush3.bf16.msra.mxu1 %v3341_v18  ;;  %3314 = vmatprep.subr.bf16.mxu0 %v3313_v61 }
 0x497   : > { %3346 = vmatprep.subr.bf16.mxu1 %v3345_v13 }
 0x498   : > { %1589 = vmatmul.mubr.f32.gmra.mrb[30].mxu0 %v4790_v48 }
 0x499   : > { %3316 = vmatpush3.bf16.msra.mxu0 %v3315_v32  ;;  %1812 = vmatprep.mubr.f32.mxu0 %v4619_v30  ;;  %v973_v30 = vand.u32 15, %v891_v10 }
 0x49a   : > { %3348 = vmatpush3.bf16.msra.mxu1 %v3345_v13 }
 0x49b   : > { %vm2438_vm12 = vcmp.ne.s32.totalorder %v973_v30, 15 }
 0x49c   : > { %2409 = vmatmul.mubr.msk.f32.vlgmr.msra.gmra.mrb[32].mxu0 %vm4683_vm4, %v4705_v38  ;;  %v1058_v38 = vrot.slane %v4712_v42, 7 }
 0x49d   : > { %3006 = vmatmul.mubr.msk.f32.vlgmr.msra.gmra.mrb[0].mxu1 %vm4695_vm5, %v4693_v34  ;;  %1817 = vmatprep.mubr.f32.mxu0 %v4627_v49  ;;  %v1134_v49 = vsel %vm1133_vm0, %v5179_v23, %v1132_v62 }
 0x49e   : > { %3008 = vmatprep.mubr.f32.mxu1 %v4709_v40  ;;  %v1061_v40 = vsel %vm1060_vm1, %v1058_v38, %v1059_v6  ;;  %v2001_v6 = vld [vmem:[#allocation12 + $0x60] sm:$0xff] }
 0x49f   : > { %v3373_v39 = vpack.c.bf16 %v2002_v37, %v2001_v6 }
 0x4a0   : > { %1818 = vmatmul.mubr.f32.gmra.mrb[34].mxu0 %v4731_v59 }
 0x4a1   : > { %3009 = vmatmul.mubr.msk.f32.gmra.mrb[2].mxu1 %vm4720_vm6, %v4736_v0  ;;  %1822 = vmatprep.mubr.f32.mxu0 %v4651_v5  ;;  %v5180_v5 = vrot.slane %v4714_v47, 1  ;;  %v1989_v47 = vld [vmem:[#allocation12] sm:$0xff] }
 0x4a2   : > { %3011 = vmatprep.mubr.f32.mxu1 %v4744_v8  ;;  %v3349_v59 = vpack.c.bf16 %v1990_v54, %v1989_v47  ;;  %v1993_v8 = vld [vmem:[#allocation12 + $0x20] sm:$0xff] }
 0x4a3   : > { %v1145_v34 = vsel %vm1133_vm0, %v1132_v62, %v5180_v5 }
 0x4a4   : > { %2411 = vmatmul.mubr.msk.f32.gmra.mrb[36].mxu0 %vm4751_vm7, %v4772_v29  ;;  %3350 = vmatprep.subr.bf16.mxu0 %v3349_v59  ;;  %v3361_v29 = vpack.c.bf16 %v1996_v28, %v1995_v58 }
 0x4a5   : > { %3012 = vmatmul.mubr.msk.f32.gmra.mrb[4].mxu1 %vm4763_vm8, %v4761_v27  ;;  %1827 = vmatprep.mubr.f32.mxu0 %v4663_v9  ;;  %v966_v9 = vand.u32 15, %v890_v35  ;;  %v3357_v27 = vpack.c.bf16 %v1994_v20, %v1993_v8 }
 0x4a6   : > { %3014 = vmatprep.mubr.f32.mxu1 %v1134_v49  ;;  %3397 = vmatprep.subr.bf16.mxu1 %v3349_v59 }
 0x4a7   : > { %vm2437_vm13 = vcmp.ne.s32.totalorder %v966_v9, 0  ;;  %3352 = vmatpush3.bf16.msra.mxu0 %v3349_v59  ;;  %3405 = vmatpush3.bf16.msra.mxu1 %v3349_v59 }
 0x4a8   : > { %1828 = vmatmul.mubr.f32.gmra.mrb[38].mxu0 %v4790_v48  ;;  %v1997_v48 = vld [vmem:[#allocation12 + $0x40] sm:$0xff] }
 0x4a9   : > { %3015 = vmatmul.mubr.msk.f32.gmra.mrb[6].mxu1 %vm2438_vm12, %v1145_v34  ;;  %1832 = vmatprep.mubr.f32.mxu0 %v4674_v16  ;;  %v1062_v16 = vsel %vm1060_vm1, %v1057_v26, %v1058_v38  ;;  %v1999_v26 = vld [vmem:[#allocation12 + $0x50] sm:$0xff] }
 0x4ac   : > { %2413 = vmatmul.mubr.msk.f32.gmra.mrb[40].mxu0 %vm4799_vm9, %v4797_v7  ;;  %v1998_v7 = vld [vmem:[#allocation12 + $0x48] sm:$0xff] }
 0x4ad   : > { %1837 = vmatprep.mubr.f32.mxu0 %v4681_v22  ;;  %v1991_v22 = vld [vmem:[#allocation12 + $0x10] sm:$0xff]  ;;  %v3365_v17 = vpack.c.bf16 %v1998_v7, %v1997_v48 }
 0x4b0   : > { %1838 = vmatmul.mubr.f32.gmra.mrb[42].mxu0 %v4816_v53 }
 0x4b1   : > { %1842 = vmatprep.mubr.f32.mxu0 %v4712_v42  ;;  %v1992_v42 = vld [vmem:[#allocation12 + $0x18] sm:$0xff] }
 0x4b2   : > { %v3353_v0 = vpack.c.bf16 %v1992_v42, %v1991_v22 }
 0x4b4   : > { %2415 = vmatmul.mubr.msk.f32.gmra.mrb[44].mxu0 %vm2437_vm13, %v1062_v16  ;;  %3354 = vmatprep.subr.bf16.mxu0 %v3353_v0 }
 0x4b5   : > { %1847 = vmatprep.mubr.f32.mxu0 %v4804_v41  ;;  %3398 = vmatprep.subr.bf16.mxu1 %v3353_v0  ;;  %v2000_v41 = vld [vmem:[#allocation12 + $0x58] sm:$0xff] }
 0x4b6   : > { %3356 = vmatpush3.bf16.msra.mxu0 %v3353_v0  ;;  %3406 = vmatpush3.bf16.msra.mxu1 %v3353_v0  ;;  %v3369_v53 = vpack.c.bf16 %v2000_v41, %v1999_v26 }
 0x4b7   : > { %3358 = vmatprep.subr.bf16.mxu0 %v3357_v27  ;;  %3399 = vmatprep.subr.bf16.mxu1 %v3357_v27 }
 0x4b8   : > { %1848 = vmatmul.mubr.f32.gmra.mrb[46].mxu0 %v1061_v40 }
 0x4ba   : > { %3360 = vmatpush3.bf16.msra.mxu0 %v3357_v27  ;;  %3407 = vmatpush3.bf16.msra.mxu1 %v3357_v27 }
 0x4bb   : > { %3362 = vmatprep.subr.bf16.mxu0 %v3361_v29  ;;  %3400 = vmatprep.subr.bf16.mxu1 %v3361_v29 }
 0x4be   : > { %3364 = vmatpush3.bf16.msra.mxu0 %v3361_v29  ;;  %3408 = vmatpush3.bf16.msra.mxu1 %v3361_v29 }
 0x4bf   : > { %3366 = vmatprep.subr.bf16.mxu0 %v3365_v17  ;;  %3401 = vmatprep.subr.bf16.mxu1 %v3365_v17 }
 0x4c2   : > { %3368 = vmatpush3.bf16.msra.mxu0 %v3365_v17  ;;  %3409 = vmatpush3.bf16.msra.mxu1 %v3365_v17 }
 0x4c3   : > { %3370 = vmatprep.subr.bf16.mxu0 %v3369_v53  ;;  %3402 = vmatprep.subr.bf16.mxu1 %v3369_v53 }
 0x4c6   : > { %3372 = vmatpush3.bf16.msra.mxu0 %v3369_v53  ;;  %3410 = vmatpush3.bf16.msra.mxu1 %v3369_v53 }
 0x4c7   : > { %3374 = vmatprep.subr.bf16.mxu0 %v3373_v39  ;;  %3403 = vmatprep.subr.bf16.mxu1 %v3373_v39 }
 0x4ca   : > { %3376 = vmatpush3.bf16.msra.mxu0 %v3373_v39  ;;  %3411 = vmatpush3.bf16.msra.mxu1 %v3373_v39 }
 0x4cb   : > { %3378 = vmatprep.subr.bf16.mxu0 %v3377_v56  ;;  %3404 = vmatprep.subr.bf16.mxu1 %v3377_v56 }
 0x4ce   : > { %3380 = vmatpush3.bf16.msra.mxu0 %v3377_v56  ;;  %3412 = vmatpush3.bf16.msra.mxu1 %v3377_v56  ;;  %v4924_v56 = vld [vmem:[%s5181_s3] ss:$0 sm:$0xff] }
 0x52f   : > { %v2539_v55 = vpop.f32.mrb[0].mxu0 }
 0x530   : > { %v2540_v31 = vpop.f32.mrb[1].mxu0 }
 0x531   : > { %v2541_v51 = vadd.f32 %v2540_v31, %v2539_v55 }
 0x533   : > { %v2542_v52 = vpop.f32.mrb[2].mxu0 }
 0x534   : > { %v2543_v63 = vpop.f32.mrb[3].mxu0 }
 0x535   : > { %v2544_v50 = vadd.f32 %v2543_v63, %v2542_v52 }
 0x537   : > { %v2545_v44 = vpop.f32.mrb[4].mxu0 }
 0x538   : > { %v2546_v46 = vpop.f32.mrb[5].mxu0 }
 0x539   : > { %v2547_v60 = vadd.f32 %v2546_v46, %v2545_v44 }
 0x53b   : > { %v2548_v45 = vpop.f32.mrb[6].mxu0 }
 0x53c   : > { %v2549_v12 = vpop.f32.mrb[7].mxu0 }
 0x53d   : > { %v2550_v3 = vadd.f32 %v2549_v12, %v2548_v45 }
 0x53f   : > { %v2551_v4 = vpop.f32.mrb[8].mxu0 }
 0x540   : > { %v2552_v2 = vpop.f32.mrb[9].mxu0 }
 0x541   : > { %v2553_v11 = vadd.f32 %v2552_v2, %v2551_v4 }
 0x543   : > { %v2554_v1 = vpop.f32.mrb[10].mxu0 }
 0x544   : > { %v2555_v14 = vpop.f32.mrb[11].mxu0 }
 0x545   : > { %v2556_v18 = vadd.f32 %v2555_v14, %v2554_v1 }
 0x547   : > { %v2557_v19 = vpop.f32.mrb[12].mxu0 }
 0x548   : > { %v2558_v24 = vpop.f32.mrb[13].mxu0 }
 0x549   : > { %v2559_v36 = vadd.f32 %v2558_v24, %v2557_v19 }
 0x54b   : > { %v2560_v25 = vpop.f32.mrb[14].mxu0 }
 0x54c   : > { %v2561_v15 = vpop.f32.mrb[15].mxu0 }
 0x54d   : > { %v2562_v61 = vadd.f32 %v2561_v15, %v2560_v25 }
 0x54f   : > { %v2619_v21 = vpop.f32.mrb[16].mxu0 }
 0x550   : > { %v2620_v57 = vpop.f32.mrb[17].mxu0 }
 0x551   : > { %v2621_v13 = vadd.f32 %v2620_v57, %v2619_v21 }
 0x553   : > { %v3416_v32 = vadd.f32 %v2621_v13, %v2541_v51  ;;  %v2622_v10 = vpop.f32.mrb[18].mxu0 }
 0x554   : > { %v2623_v62 = vpop.f32.mrb[19].mxu0 }
 0x555   : > { %v2624_v30 = vadd.f32 %v2623_v62, %v2622_v10 }
 0x557   : > { %v3413_v23 = vadd.f32 %v2624_v30, %v2544_v50  ;;  %v2625_v49 = vpop.f32.mrb[20].mxu0 }
 0x558   : > { %v2626_v5 = vpop.f32.mrb[21].mxu0 }
 0x559   : > { %v2627_v34 = vadd.f32 %v2626_v5, %v2625_v49 }
 0x55b   : > { %v3422_v35 = vadd.f32 %v2627_v34, %v2547_v60  ;;  %v2628_v9 = vpop.f32.mrb[22].mxu0 }
 0x55c   : > { %v2629_v38 = vpop.f32.mrb[23].mxu0 }
 0x55d   : > { %v2630_v16 = vadd.f32 %v2629_v38, %v2628_v9 }
 0x55f   : > { %v3419_v40 = vadd.f32 %v2630_v16, %v2550_v3  ;;  %v2631_v47 = vpop.f32.mrb[24].mxu0 }
 0x560   : > { %v2632_v54 = vpop.f32.mrb[25].mxu0 }
 0x561   : > { %v2633_v59 = vadd.f32 %v2632_v54, %v2631_v47 }
 0x563   : > { %v3428_v22 = vadd.f32 %v2633_v59, %v2553_v11  ;;  %v2634_v42 = vpop.f32.mrb[26].mxu0 }
 0x564   : > { %v2635_v0 = vpop.f32.mrb[27].mxu0 }
 0x565   : > { %v2636_v8 = vadd.f32 %v2635_v0, %v2634_v42 }
 0x567   : > { %v3425_v20 = vadd.f32 %v2636_v8, %v2556_v18  ;;  %v2637_v27 = vpop.f32.mrb[28].mxu0 }
 0x568   : > { %v2638_v58 = vpop.f32.mrb[29].mxu0 }
 0x569   : > { %v2639_v28 = vadd.f32 %v2638_v58, %v2637_v27 }
 0x56b   : > { %v3434_v29 = vadd.f32 %v2639_v28, %v2559_v36  ;;  %v2640_v48 = vpop.f32.mrb[30].mxu0 }
 0x56c   : > { %v2641_v7 = vpop.f32.mrb[31].mxu0 }
 0x56d   : > { %v2642_v17 = vadd.f32 %v2641_v7, %v2640_v48 }
 0x56f   : > { %v4919_v26 = vadd.f32 %v2642_v17, %v2562_v61  ;;  %v2699_v41 = vpop.f32.mrb[32].mxu0 }
 0x570   : > { %v3007_v53 = vpop.f32.mrb[0].mxu1  ;;  %v2700_v6 = vpop.f32.mrb[33].mxu0 }
 0x571   : > { %v2701_v37 = vadd.f32 %v2700_v6, %v2699_v41  ;;  %v1919_v39 = vpop.f32.mrb[1].mxu1  ;;  %v2425_v6 = vld [vmem:[%s5182_s6] ss:$0 sm:$0xff] }
 0x573   : > { %v3417_v43 = vadd.f32 %v3416_v32, %v2701_v37  ;;  %v2702_v33 = vpop.f32.mrb[34].mxu0 }
 0x574   : > { %v3010_v55 = vpop.f32.mrb[2].mxu1  ;;  %v2703_v31 = vpop.f32.mrb[35].mxu0 }
 0x575   : > { %v3418_v51 = vadd.f32 %v3417_v43, %v1919_v39  ;;  %v2704_v52 = vadd.f32 %v2703_v31, %v2702_v33  ;;  %v1929_v63 = vpop.f32.mrb[3].mxu1  ;;  %v2117_v33 = vld [vmem:[%s4444_s7] sm:$0xff] }
 0x577   : > { %v1973_v50 = vadd.f32 %v3418_v51, %v4924_v56  ;;  %v3414_v44 = vadd.f32 %v3413_v23, %v2704_v52  ;;  %v2705_v46 = vpop.f32.mrb[36].mxu0 }
 0x578   : > { %v3013_v60 = vpop.f32.mrb[4].mxu1  ;;  %v2706_v45 = vpop.f32.mrb[37].mxu0 }
 0x579   : > { %v1981_v12 = vmax.f32 %v1973_v50, 0.0  ;;  %v3415_v3 = vadd.f32 %v3414_v44, %v3007_v53  ;;  %v2707_v4 = vadd.f32 %v2706_v45, %v2705_v46  ;;  %v1939_v2 = vpop.f32.mrb[5].mxu1  ;;  %v2120_v50 = vld [vmem:[%s4444_s7 + $0x18] sm:$0xff] }
 0x57b   : > { %v1974_v11 = vadd.f32 %v3415_v3, %v4924_v56  ;;  %v3423_v1 = vadd.f32 %v3422_v35, %v2707_v4  ;;  %v2708_v14 = vpop.f32.mrb[38].mxu0  ;;  %3049 = vmatprep.mubr.f32.mxu0 %v1981_v12 }
 0x57c   : > { %v3016_v18 = vpop.f32.mrb[6].mxu1  ;;  %v2709_v19 = vpop.f32.mrb[39].mxu0 }
 0x57d   : > { %v1982_v24 = vmax.f32 %v1974_v11, 0.0  ;;  %v3424_v36 = vadd.f32 %v3423_v1, %v1929_v63  ;;  %v2710_v25 = vadd.f32 %v2709_v19, %v2708_v14  ;;  %v1949_v15 = vpop.f32.mrb[7].mxu1  ;;  %v2122_v1 = vld [vmem:[%s4444_s7 + $0x28] sm:$0xff]  ;;  %v2121_v19 = vld [vmem:[%s4444_s7 + $0x20] sm:$0xff] }
 0x57f   : > { %v3420_v61 = vadd.f32 %v3419_v40, %v2710_v25  ;;  %v2711_v21 = vpop.f32.mrb[40].mxu0  ;;  %3050 = vmatmul.mubr.f32.vlgmr.msra.gmra.mrb[48].mxu0 %v1982_v24  ;;  %v1975_v57 = vadd.f32 %v3424_v36, %v4924_v56 }
 0x580   : > { %v2712_v13 = vpop.f32.mrb[41].mxu0 }
 0x581   : > { %v3421_v32 = vadd.f32 %v3420_v61, %v3010_v55  ;;  %v2713_v10 = vadd.f32 %v2712_v13, %v2711_v21  ;;  %v1983_v62 = vmax.f32 %v1975_v57, 0.0  ;;  %v2124_v57 = vld [vmem:[%s4444_s7 + $0x38] sm:$0xff] }
 0x583   : > { %v3429_v30 = vadd.f32 %v3428_v22, %v2713_v10  ;;  %v2714_v23 = vpop.f32.mrb[42].mxu0  ;;  %3052 = vmatprep.mubr.f32.mxu0 %v1983_v62  ;;  %v1976_v49 = vadd.f32 %v3421_v32, %v4924_v56  ;;  %v2123_v10 = vld [vmem:[%s4444_s7 + $0x30] sm:$0xff] }
 0x584   : > { %v2715_v5 = vpop.f32.mrb[43].mxu0 }
 0x585   : > { %v3430_v34 = vadd.f32 %v3429_v30, %v1939_v2  ;;  %v2716_v35 = vadd.f32 %v2715_v5, %v2714_v23  ;;  %v1984_v9 = vmax.f32 %v1976_v49, 0.0 }
 0x587   : > { %v3426_v38 = vadd.f32 %v3425_v20, %v2716_v35  ;;  %v2717_v16 = vpop.f32.mrb[44].mxu0  ;;  %3053 = vmatmul.mubr.f32.gmra.mrb[50].mxu0 %v1984_v9  ;;  %v1977_v40 = vadd.f32 %v3430_v34, %v4924_v56 }
 0x588   : > { %v2718_v47 = vpop.f32.mrb[45].mxu0 }
 0x589   : > { %v3427_v54 = vadd.f32 %v3426_v38, %v3013_v60  ;;  %v2719_v59 = vadd.f32 %v2718_v47, %v2717_v16  ;;  %v1985_v42 = vmax.f32 %v1977_v40, 0.0  ;;  %v2119_v60 = vld [vmem:[%s4444_s7 + $0x10] sm:$0xff] }
 0x58b   : > { %v1978_v0 = vadd.f32 %v3427_v54, %v4924_v56  ;;  %v3435_v22 = vadd.f32 %v3434_v29, %v2719_v59  ;;  %v2720_v8 = vpop.f32.mrb[46].mxu0  ;;  %3055 = vmatprep.mubr.f32.mxu1 %v1985_v42 }
 0x58c   : > { %v2721_v27 = vpop.f32.mrb[47].mxu0 }
 0x58d   : > { %v1986_v58 = vmax.f32 %v1978_v0, 0.0  ;;  %v3436_v28 = vadd.f32 %v3435_v22, %v1949_v15  ;;  %v2722_v48 = vadd.f32 %v2721_v27, %v2720_v8 }
 0x58f   : > { %v3432_v20 = vadd.f32 %v4919_v26, %v2722_v48  ;;  %3056 = vmatmul.mubr.f32.vlgmr.msra.gmra.mrb[8].mxu1 %v1986_v58  ;;  %v1979_v7 = vadd.f32 %v3436_v28, %v4924_v56  ;;  %v2118_v26 = vld [vmem:[%s4444_s7 + $0x8] sm:$0xff]  ;;  %s2150_s7 = scalar_lea.sflag [#allocation5], %s4438_s4 }
 0x591   : > { %v3433_v17 = vadd.f32 %v3432_v20, %v3016_v18  ;;  %v1987_v41 = vmax.f32 %v1979_v7, 0.0 }
 0x593   : > { %3058 = vmatprep.mubr.f32.mxu1 %v1987_v41  ;;  %v1980_v29 = vadd.f32 %v3433_v17, %v4924_v56 }
 0x595   : > { %v1988_v53 = vmax.f32 %v1980_v29, 0.0 }
 0x597   : > { %3059 = vmatmul.mubr.f32.gmra.mrb[10].mxu1 %v1988_v53 }
 0x652   : > { %v3051_v37 = vpop.f32.mrb[48].mxu0 }
 0x653   : > { %v2084_v39 = vadd.f32 %v3051_v37, %v2425_v6  ;;  %v2078_v43 = vpop.f32.mrb[49].mxu0 }
 0x654   : > { %v2079_v55 = vadd.f32 %v2425_v6, %v2078_v43 }
 0x655   : > { %v2126_v31 = vadd.f32 %v2118_v26, %v2084_v39 }
 0x656   : > { %v2125_v51 = vadd.f32 %v2117_v33, %v2079_v55 }
 0x657   : > { %v2134_v52 = vmax.f32 %v2126_v31, 0.0 }
 0x658   : > { %v2133_v56 = vmax.f32 %v2125_v51, 0.0 }
 0x659   : > { %2142 = vst [vmem:[%s4546_s1 + $0x8] sm:$0xff] %v2134_v52 }
 0x65a   : > { %2141 = vst [vmem:[%s4546_s1] sm:$0xff] %v2133_v56  ;;  %v3054_v63 = vpop.f32.mrb[50].mxu0 }
 0x65b   : > { %v2094_v44 = vadd.f32 %v3054_v63, %v2425_v6  ;;  %v2088_v46 = vpop.f32.mrb[51].mxu0 }
 0x65c   : > { %v2089_v45 = vadd.f32 %v2425_v6, %v2088_v46 }
 0x65d   : > { %v2128_v12 = vadd.f32 %v2120_v50, %v2094_v44 }
 0x65e   : > { %v2127_v3 = vadd.f32 %v2119_v60, %v2089_v45 }
 0x65f   : > { %v2136_v4 = vmax.f32 %v2128_v12, 0.0 }
 0x660   : > { %v2135_v2 = vmax.f32 %v2127_v3, 0.0 }
 0x661   : > { %2144 = vst [vmem:[%s4546_s1 + $0x18] sm:$0xff] %v2136_v4 }
 0x662   : > { %2143 = vst [vmem:[%s4546_s1 + $0x10] sm:$0xff] %v2135_v2  ;;  %v3057_v11 = vpop.f32.mrb[8].mxu1 }
 0x663   : > { %v2104_v14 = vadd.f32 %v3057_v11, %v2425_v6  ;;  %v2098_v18 = vpop.f32.mrb[9].mxu1 }
 0x664   : > { %v2099_v24 = vadd.f32 %v2425_v6, %v2098_v18 }
 0x665   : > { %v2130_v36 = vadd.f32 %v2122_v1, %v2104_v14 }
 0x666   : > { %v2129_v25 = vadd.f32 %v2121_v19, %v2099_v24 }
 0x667   : > { %v2138_v15 = vmax.f32 %v2130_v36, 0.0 }
 0x668   : > { %v2137_v61 = vmax.f32 %v2129_v25, 0.0 }
 0x669   : > { %2146 = vst [vmem:[%s4546_s1 + $0x28] sm:$0xff] %v2138_v15 }
 0x66a   : > { %2145 = vst [vmem:[%s4546_s1 + $0x20] sm:$0xff] %v2137_v61  ;;  %v3060_v21 = vpop.f32.mrb[10].mxu1 }
 0x66b   : > { %v2114_v13 = vadd.f32 %v3060_v21, %v2425_v6  ;;  %v2108_v32 = vpop.f32.mrb[11].mxu1 }
 0x66c   : > { %v2109_v62 = vadd.f32 %v2425_v6, %v2108_v32 }
 0x66d   : > { %v2132_v30 = vadd.f32 %v2124_v57, %v2114_v13 }
 0x66e   : > { %v2131_v23 = vadd.f32 %v2123_v10, %v2109_v62 }
 0x66f   : > { %v2140_v49 = vmax.f32 %v2132_v30, 0.0 }
 0x670   : > { %v2139_v5 = vmax.f32 %v2131_v23, 0.0 }
 0x671   : > { %2148 = vst [vmem:[%s4546_s1 + $0x38] sm:$0xff] %v2140_v49 }
 0x672   : > { %2147 = vst [vmem:[%s4546_s1 + $0x30] sm:$0xff] %v2139_v5 }
 0x673   : > { %3813 = shalt.err (!%p3810_p0)
}
 0x674   : > { %s3814_s1 = scalar_lea.hbm %s4958_s25, 1024  ;;  %s3818_s26 = scalar_lea.hbm %s5185_s24, 8192 }
 0x675   : > { %p3815_p1 = scmp.ne.s32.totalorder %s4958_s25, %s3814_s1  ;;  %p3819_p4 = scmp.lt.u32.totalorder %s4958_s25, %s5185_s24 }
 0x676   : > { %p3820_p5 = scmp.lt.u32.totalorder %s3818_s26, %s3814_s1  ;;  %p3822_p8 = scmp.lt.u32.totalorder %s3814_s1, %s4958_s25 }
 0x677   : > { %p3816_p3 = pnand %p3815_p1, %p5186_p2 }
 0x678   : > { %p3821_p10 = por %p3820_p5, %p3819_p4 }
 0x679   : > { %p3817_p12 = pneg %p3816_p3 }
 0x67a   : > { %p3823_p9 = por %p3822_p8, %p3821_p10 }
 0x67c   : > { %p3824_p7 = pnand %p3823_p9, %p3817_p12 }
 0x67e   : > { %3827 = shalt.err (!%p3824_p7)
}
 0x67f   : > { %s3975_s21 = smov 128   ;;  %s3976_s11 = smov 8  }
 0x680   : > { %3471 = dma.vmem_to_hbm [thread:$0]  (%p5186_p2), %s4960_s23, 1024, %s4958_s25, %s2150_s7, %s3975_s21, %s3975_s21, %s3976_s11  }
 0x681 PF: > { %s5187_s10 = sld [smem:[#allocation36_spill]]  ;;  %p3504_p6 = scmp.ge.s32.totalorder %s3962_s22, 2 }
 0x682   : > { %s2181_s9 = sand.u32 1, %s3934_s15  }
 0x683   : > { %s2182_s5 = scalar_lea.sflag [#allocation5], %s2181_s9 }
 0x687   : > { %p5188_p13 = scmp.ne.s32.totalorder %s5187_s10, 0 }
 0x689   : > { %p3494_p11 = pnand %p3504_p6, %p5188_p13 }
 0x68b   : > { %3905 = dma.done.wait (!%p3494_p11), %s2182_s5, 1024  }
 0x68c   : > { %3907 = vsyncadd (!%p3494_p11), %s2182_s5, 4294966272  ;;  %s30_s22 = sadd.s32 1, %s3962_s22   ;;  %s5190_s30 = sld [smem:[#allocation22_spill]] }
 0x68d   : > { %p4993_p0 = scmp.ge.s32.totalorder %s30_s22, 10   ;;  %s5191_s10 = sld [smem:[#allocation23_spill]] }
 0x68e   : > { %s5192_s19 = sld [smem:[#allocation24_spill]]  ;;  %s5193_s4 = smov %s4189_s12 }
 0x68f   : > { %s5194_s23 = sld [smem:[#allocation35_spill]]  ;;  %s5195_s18 = sld [smem:[#allocation27_spill]] }
 0x690   : > { %s5196_s25 = sld [smem:[#allocation28_spill]]  ;;  %s5197_s20 = sld [smem:[#allocation30_spill]] }
 0x691   : > { %s5198_s21 = sld [smem:[#allocation31_spill]]  ;;  %s5199_s11 = smov %s5222_s2 }
 0x692   : > { %s5201_s13 = smov %s3930_s14  ;;  %s5202_s14 = smov %s5193_s4 }
 0x693   : > { %s5203_s15 = smov %s3938_s16  ;;  %s5204_s16 = smov %s3942_s17 }
 0x694   : > { %s5200_s12 = smov %s5192_s19  ;;  %29 = sbr.rel (!%p4993_p0) target bundleno = 25 (0x19), region = 155 }
 0x695   : > { %s5205_s17 = smov %s5194_s23 }
 0x696   : > { %s5206_s19 = smov %s5196_s25 }
 0x69b   :  { %2187 = vsyncpa [#allocation4], 1 }
 0x69c   :  { %2189 = vsyncpa [#allocation4 + $0x1], 1 }
 0x69d   :  { %2190 = vsyncpa [#allocation7], 1 }
 0x69e   :  { %2192 = vsyncpa [#allocation7 + $0x1], 1 }
 0x69f   :  { %2193 = vsyncpa [#allocation10], 1 }
 0x6a0   :  { %2194 = vsyncpa [#allocation13], 1 }
 0x6a1   :  { %2195 = vsyncpa [#allocation5], 1 }
 0x6a2   :  { %2197 = vsyncpa [#allocation5 + $0x1], 1 }

</bundles_post_ra>
